<compile_context>
chip_gen: v7x
topology: tpu7x:2x2x1
jax: 0.10.0
libtpu: 0.0.40
codegen_flags: <defaults>
</compile_context>

<pallas_src>
import jax
import jax.numpy as jnp
from jax import lax
from jax.experimental import pallas as pl
from jax.experimental.pallas import tpu as pltpu

# bf16 MXU operands (f32 accumulate). Set to jnp.float32 for bit-closer PyTorch numerics.
MATMUL_DTYPE = jnp.bfloat16


# ----------------------------------------------------------------------------
# In-kernel helpers
# ----------------------------------------------------------------------------
def _precompute_input_gates(x_ref, wif_ref, wib_ref, bf_ref, bb_ref,
                            gxf_sc, gxb_sc):
    """Hoisted input projection: one matmul per direction over the full
    sequence (bias folded in), stored in (T,B,4H) VMEM scratch."""
    T, B, In = x_ref.shape
    four_h = gxf_sc.shape[-1]
    x2d = x_ref[...].reshape(T * B, In).astype(wif_ref.dtype)
    gxf_sc[...] = (jnp.dot(x2d, wif_ref[...], preferred_element_type=jnp.float32)
                   + bf_ref[...]).reshape(T, B, four_h)
    gxb_sc[...] = (jnp.dot(x2d, wib_ref[...], preferred_element_type=jnp.float32)
                   + bb_ref[...]).reshape(T, B, four_h)


def _gate_math(gates, c_prev):
    """Batched nonlinearities over the full (B,4H) gate tile, then slice i/f/g/o."""
    H = c_prev.shape[-1]
    sg = jax.nn.sigmoid(gates)
    th = jnp.tanh(gates)
    i_g = sg[:, 0 * H:1 * H]
    f_g = sg[:, 1 * H:2 * H]
    g_g = th[:, 2 * H:3 * H]
    o_g = sg[:, 3 * H:4 * H]
    c_new = f_g * c_prev + i_g * g_g
    h_new = o_g * jnp.tanh(c_new)
    return h_new, c_new


def _bidir_step(s, T, H, lengths, whh, gxf_sc, gxb_sc, h_sc, c_sc):
    """Advance fwd direction at t=s and bwd direction at t=T-1-s with ONE fused
    recurrence matmul; packed-sequence masking freezes state while t >= length."""
    t_f = s
    t_b = T - 1 - s

    h_all = h_sc[...]                                   # (B, 2H) = [h_f | h_b]
    c_all = c_sc[...]

    # single MXU call for both directions (block-diagonal W_hh)
    gates_hh = jnp.dot(h_all.astype(whh.dtype), whh,
                       preferred_element_type=jnp.float32)        # (B, 8H)
    gates_f = gates_hh[:, :4 * H] + gxf_sc[t_f]                   # (B, 4H)
    gates_b = gates_hh[:, 4 * H:] + gxb_sc[t_b]                   # (B, 4H)

    hf_new, cf_new = _gate_math(gates_f, c_all[:, :H])
    hb_new, cb_new = _gate_math(gates_b, c_all[:, H:])

    m_f = t_f < lengths                                  # (B, 1) bool
    m_b = t_b < lengths
    hf_upd = jnp.where(m_f, hf_new, h_all[:, :H])
    cf_upd = jnp.where(m_f, cf_new, c_all[:, :H])
    hb_upd = jnp.where(m_b, hb_new, h_all[:, H:])
    cb_upd = jnp.where(m_b, cb_new, c_all[:, H:])

    h_sc[:, pl.ds(0, H)] = hf_upd
    h_sc[:, pl.ds(H, H)] = hb_upd
    c_sc[:, pl.ds(0, H)] = cf_upd
    c_sc[:, pl.ds(H, H)] = cb_upd
    return t_f, hf_upd, t_b, hb_upd


# ----------------------------------------------------------------------------
# Kernels
# ----------------------------------------------------------------------------
def _bilstm_seq_kernel(x_ref, len_ref, h0_ref, c0_ref,
                       wif_ref, wib_ref, whh_ref, bf_ref, bb_ref,
                       out_ref, gxf_sc, gxb_sc, h_sc, c_sc):
    """Fused fwd+bwd LSTM layer; writes the (T,B,2H) bidirectional sequence."""
    T = x_ref.shape[0]
    H = h0_ref.shape[-1] // 2

    h_sc[...] = h0_ref[...]
    c_sc[...] = c0_ref[...]
    _precompute_input_gates(x_ref, wif_ref, wib_ref, bf_ref, bb_ref,
                            gxf_sc, gxb_sc)

    lengths = len_ref[...]                    # (B, 1) int32
    whh = whh_ref[...]                        # hoisted weight load
    out_dtype = out_ref.dtype

    def body(s, carry):
        t_f, hf_upd, t_b, hb_upd = _bidir_step(
            s, T, H, lengths, whh, gxf_sc, gxb_sc, h_sc, c_sc)
        out_ref[t_f, :, pl.ds(0, H)] = hf_upd.astype(out_dtype)
        out_ref[t_b, :, pl.ds(H, H)] = hb_upd.astype(out_dtype)
        return carry

    # TODO(synk): cap unroll (e.g. unroll=8) once T grows beyond ~16.
    lax.fori_loop(0, T, body, 0, unroll=True)


def _bilstm_head_kernel(x_ref, len_ref, h0_ref, c0_ref,
                        wif_ref, wib_ref, whh_ref, bf_ref, bb_ref,
                        fw_ref, fb_ref,
                        out_ref, gxf_sc, gxb_sc, h_sc, c_sc, gb_sc):
    """Last fused fwd+bwd LSTM layer: keeps only the gathered last-valid
    outputs in VMEM and fuses the (split) Linear + softmax epilogue."""
    T = x_ref.shape[0]
    H = h0_ref.shape[-1] // 2

    h_sc[...] = h0_ref[...]
    c_sc[...] = c0_ref[...]
    gb_sc[...] = jnp.zeros_like(gb_sc)
    _precompute_input_gates(x_ref, wif_ref, wib_ref, bf_ref, bb_ref,
                            gxf_sc, gxb_sc)

    lengths = len_ref[...]                    # (B, 1) int32
    whh = whh_ref[...]

    def body(s, carry):
        _, _, t_b, hb_upd = _bidir_step(
            s, T, H, lengths, whh, gxf_sc, gxb_sc, h_sc, c_sc)
        # backward output at t == len-1 (first real step of the backward
        # recurrence over the valid sub-sequence).
        gb_sc[...] = jnp.where(t_b == lengths - 1, hb_upd, gb_sc[...])
        return carry

    lax.fori_loop(0, T, body, 0, unroll=True)

    # forward output at t == len-1 is the final (masked-frozen) carry.
    h_all = h_sc[...]
    hf_last = h_all[:, :H]                    # (B, H)
    fw = fw_ref[...]                          # (2H, C)
    # split FC: avoids a lane-offset concat of [hf | hb]
    logits = (jnp.dot(hf_last, fw[:H, :], preferred_element_type=jnp.float32)
              + jnp.dot(gb_sc[...], fw[H:, :], preferred_element_type=jnp.float32)
              + fb_ref[...])
    m = jnp.max(logits, axis=-1, keepdims=True)
    e = jnp.exp(logits - m)
    out_ref[...] = e / jnp.sum(e, axis=-1, keepdims=True)


# ----------------------------------------------------------------------------
# pallas_call wrappers
# ----------------------------------------------------------------------------
_VMEM = pl.BlockSpec(memory_space=pltpu.MemorySpace.VMEM)


def bilstm_layer_seq(x, lengths, h0c, c0c, lp):
    T, B, _ = x.shape
    H = h0c.shape[-1] // 2
    return pl.pallas_call(
        _bilstm_seq_kernel,
        out_shape=jax.ShapeDtypeStruct((T, B, 2 * H), jnp.float32),
        in_specs=[_VMEM] * 9,
        out_specs=_VMEM,
        scratch_shapes=[
            pltpu.VMEM((T, B, 4 * H), jnp.float32),   # hoisted fwd input gates
            pltpu.VMEM((T, B, 4 * H), jnp.float32),   # hoisted bwd input gates
            pltpu.VMEM((B, 2 * H), jnp.float32),      # combined h state
            pltpu.VMEM((B, 2 * H), jnp.float32),      # combined c state
        ],
    )(x, lengths, h0c, c0c, lp["w_ih_f"], lp["w_ih_b"], lp["w_hh_blk"],
      lp["b_f"], lp["b_b"])


def bilstm_layer_head(x, lengths, h0c, c0c, lp, f_w_t, f_b):
    T, B, _ = x.shape
    H = h0c.shape[-1] // 2
    C = f_w_t.shape[-1]
    return pl.pallas_call(
        _bilstm_head_kernel,
        out_shape=jax.ShapeDtypeStruct((B, C), jnp.float32),
        in_specs=[_VMEM] * 11,
        out_specs=_VMEM,
        scratch_shapes=[
            pltpu.VMEM((T, B, 4 * H), jnp.float32),
            pltpu.VMEM((T, B, 4 * H), jnp.float32),
            pltpu.VMEM((B, 2 * H), jnp.float32),
            pltpu.VMEM((B, 2 * H), jnp.float32),
            pltpu.VMEM((B, H), jnp.float32),          # gathered bwd last output
        ],
    )(x, lengths, h0c, c0c, lp["w_ih_f"], lp["w_ih_b"], lp["w_hh_blk"],
      lp["b_f"], lp["b_b"], f_w_t, f_b)


# ----------------------------------------------------------------------------
# Parameters & forward pass
# ----------------------------------------------------------------------------
def init_params(key, feature_size, n_hidden, n_layers, n_classes,
                matmul_dtype=MATMUL_DTYPE):
    """Deterministic parameter init mirroring nn.LSTM default + Net.init_weights.
    Per layer we store W_ih^T per direction (In,4H), a block-diagonal fused
    recurrence weight (2H,8H), and fused biases (b_ih + b_hh)."""
    k = 1.0 / float(n_hidden) ** 0.5
    H = n_hidden
    params = {"lstm": []}
    for layer in range(n_layers):
        in_size = feature_size if layer == 0 else 2 * n_hidden
        dirs = {}
        for dname in ("fwd", "bwd"):
            key, k1, k2, k3, k4 = jax.random.split(key, 5)
            w_ih = jax.random.uniform(k1, (4 * H, in_size), jnp.float32, -k, k)
            w_hh = jax.random.uniform(k2, (4 * H, H), jnp.float32, -k, k)
            b_ih = jax.random.uniform(k3, (4 * H,), jnp.float32, -k, k)
            b_hh = jax.random.uniform(k4, (4 * H,), jnp.float32, -k, k)
            dirs[dname] = (w_ih, w_hh, b_ih + b_hh)
        # block-diagonal [[W_hh_f^T, 0], [0, W_hh_b^T]] -> one MXU call per step
        w_hh_blk = jnp.zeros((2 * H, 8 * H), jnp.float32)
        w_hh_blk = w_hh_blk.at[:H, :4 * H].set(dirs["fwd"][1].T)
        w_hh_blk = w_hh_blk.at[H:, 4 * H:].set(dirs["bwd"][1].T)
        params["lstm"].append({
            "w_ih_f": dirs["fwd"][0].T.astype(matmul_dtype),
            "w_ih_b": dirs["bwd"][0].T.astype(matmul_dtype),
            "w_hh_blk": w_hh_blk.astype(matmul_dtype),
            "b_f": dirs["fwd"][2].reshape(1, 4 * H).astype(jnp.float32),
            "b_b": dirs["bwd"][2].reshape(1, 4 * H).astype(jnp.float32),
        })
    key, kw = jax.random.split(key)
    # Net.init_weights: f.weight ~ U(-0.5, 0.5), f.bias = 0.5
    f_w = jax.random.uniform(kw, (n_classes, 2 * n_hidden), jnp.float32, -0.5, 0.5)
    params["f_w_t"] = jnp.asarray(f_w.T)
    params["f_b"] = jnp.full((1, n_classes), 0.5, jnp.float32)
    return params, key


def net_forward(params, input_seq, input_len, h0, c0):
    """Forward pass of Net: bidirectional multi-layer LSTM -> gather last valid
    output per sequence -> Linear -> softmax (gather + FC + softmax fused into
    the last layer's kernel)."""
    T, B, _ = input_seq.shape
    lengths = input_len.astype(jnp.int32).reshape(B, 1)
    layer_in = input_seq.astype(jnp.float32)
    n_layers = len(params["lstm"])
    # TODO(synk): nn.LSTM inter-layer dropout is train-mode only; not applied here.
    out = None
    for layer, lp in enumerate(params["lstm"]):
        sf, sb = 2 * layer, 2 * layer + 1             # PyTorch (layer, direction) slots
        h0c = jnp.concatenate([h0[sf], h0[sb]], axis=-1)   # (B, 2H) combined state init
        c0c = jnp.concatenate([c0[sf], c0[sb]], axis=-1)
        if layer < n_layers - 1:
            layer_in = bilstm_layer_seq(layer_in, lengths, h0c, c0c, lp)
        else:
            out = bilstm_layer_head(layer_in, lengths, h0c, c0c, lp,
                                    params["f_w_t"], params["f_b"])
    return out


# ----------------------------------------------------------------------------
# Example / smoke test
# ----------------------------------------------------------------------------
if __name__ == "__main__":
    # small config consistent with the module
    feature_size, n_hidden, n_layers, n_classes = 16, 32, 2, 4
    T, B = 8, 8

    key = jax.random.PRNGKey(0)
    params, key = init_params(key, feature_size, n_hidden, n_layers, n_classes)

    key, kx, kc = jax.random.split(key, 3)
    input_seq = jax.random.normal(kx, (T, B, feature_size), jnp.float32)
    # sorted-descending lengths (pack_padded_sequence default requires this)
    input_len = jnp.array([8, 8, 7, 6, 5, 4, 3, 2], dtype=jnp.int32)

    # Net.init_hidden: h0 = zeros, c0 = randn  (deterministic via PRNGKey here)
    h0 = jnp.zeros((2 * n_layers, B, n_hidden), jnp.float32)
    c0 = jax.random.normal(kc, (2 * n_layers, B, n_hidden), jnp.float32)

    out = jax.jit(net_forward)(params, input_seq, input_len, h0, c0)
    out = jax.block_until_ready(out)
    assert out.shape == (B, n_classes)
    assert bool(jnp.all(jnp.isfinite(out)))
    # softmax rows should sum to ~1
    assert bool(jnp.all(jnp.abs(jnp.sum(out, axis=-1) - 1.0) < 1e-3))
    print("KERNEL_OK")
</pallas_src>

<mosaic_0001>
module attributes {stable_mosaic.version = 11 : i64} {
  func.func @_bilstm_seq_kernel(%arg0: memref<8x8x16xf32, #tpu.memory_space<vmem>>, %arg1: memref<8x1xi32, #tpu.memory_space<vmem>>, %arg2: memref<8x64xf32, #tpu.memory_space<vmem>>, %arg3: memref<8x64xf32, #tpu.memory_space<vmem>>, %arg4: memref<16x128xbf16, #tpu.memory_space<vmem>>, %arg5: memref<16x128xbf16, #tpu.memory_space<vmem>>, %arg6: memref<64x256xbf16, #tpu.memory_space<vmem>>, %arg7: memref<1x128xf32, #tpu.memory_space<vmem>>, %arg8: memref<1x128xf32, #tpu.memory_space<vmem>>, %arg9: memref<8x8x64xf32, #tpu.memory_space<vmem>>, %arg10: memref<8x8x128xf32, #tpu.memory_space<vmem>>, %arg11: memref<8x8x128xf32, #tpu.memory_space<vmem>>, %arg12: memref<8x64xf32, #tpu.memory_space<vmem>>, %arg13: memref<8x64xf32, #tpu.memory_space<vmem>>) attributes {dimension_semantics = [], scalar_prefetch = 0 : i64, scratch_operands = 4 : i64, tpu.core_type = #tpu.core_type<tc>} {
    %c0 = arith.constant 0 : index
    %c0_0 = arith.constant 0 : index
    %0 = vector.load %arg2[%c0, %c0_0] : memref<8x64xf32, #tpu.memory_space<vmem>>, vector<8x64xf32>
    %c0_1 = arith.constant 0 : index
    %c0_2 = arith.constant 0 : index
    %1 = vector.load %arg12[%c0_1, %c0_2] : memref<8x64xf32, #tpu.memory_space<vmem>>, vector<8x64xf32>
    tpu.vector_store %arg12[%c0_1, %c0_2], %0 {strides = array<i32>} : memref<8x64xf32, #tpu.memory_space<vmem>>, vector<8x64xf32>,
    %c0_3 = arith.constant 0 : index
    %c0_4 = arith.constant 0 : index
    %2 = vector.load %arg3[%c0_3, %c0_4] : memref<8x64xf32, #tpu.memory_space<vmem>>, vector<8x64xf32>
    %c0_5 = arith.constant 0 : index
    %c0_6 = arith.constant 0 : index
    %3 = vector.load %arg13[%c0_5, %c0_6] : memref<8x64xf32, #tpu.memory_space<vmem>>, vector<8x64xf32>
    tpu.vector_store %arg13[%c0_5, %c0_6], %2 {strides = array<i32>} : memref<8x64xf32, #tpu.memory_space<vmem>>, vector<8x64xf32>,
    %c0_7 = arith.constant 0 : index
    %c0_8 = arith.constant 0 : index
    %c0_9 = arith.constant 0 : index
    %4 = vector.load %arg0[%c0_7, %c0_8, %c0_9] : memref<8x8x16xf32, #tpu.memory_space<vmem>>, vector<8x8x16xf32>
    %5 = vector.shape_cast %4 : vector<8x8x16xf32> to vector<64x16xf32>
    %6 = arith.truncf %5 : vector<64x16xf32> to vector<64x16xbf16>
    %c0_10 = arith.constant 0 : index
    %c0_11 = arith.constant 0 : index
    %7 = vector.load %arg4[%c0_10, %c0_11] : memref<16x128xbf16, #tpu.memory_space<vmem>>, vector<16x128xbf16>
    %cst = arith.constant dense<0.000000e+00> : vector<64x128xf32>
    %8 = tpu.matmul %6, %7, %cst {dimension_numbers = #tpu.dot_dimension_numbers<[1], [0], [0], [1], [0, 0, 1, 1], [], []>} : vector<64x16xbf16>, vector<16x128xbf16>, vector<64x128xf32> -> vector<64x128xf32>
    %c0_12 = arith.constant 0 : index
    %c0_13 = arith.constant 0 : index
    %9 = vector.load %arg7[%c0_12, %c0_13] : memref<1x128xf32, #tpu.memory_space<vmem>>, vector<1x128xf32>
    %10 = vector.broadcast %9 : vector<1x128xf32> to vector<64x128xf32>
    %11 = arith.addf %8, %10 : vector<64x128xf32>
    %12 = vector.shape_cast %11 : vector<64x128xf32> to vector<8x8x128xf32>
    %c0_14 = arith.constant 0 : index
    %c0_15 = arith.constant 0 : index
    %c0_16 = arith.constant 0 : index
    %13 = vector.load %arg10[%c0_14, %c0_15, %c0_16] : memref<8x8x128xf32, #tpu.memory_space<vmem>>, vector<8x8x128xf32>
    tpu.vector_store %arg10[%c0_14, %c0_15, %c0_16], %12 {strides = array<i32>} : memref<8x8x128xf32, #tpu.memory_space<vmem>>, vector<8x8x128xf32>,
    %c0_17 = arith.constant 0 : index
    %c0_18 = arith.constant 0 : index
    %14 = vector.load %arg5[%c0_17, %c0_18] : memref<16x128xbf16, #tpu.memory_space<vmem>>, vector<16x128xbf16>
    %cst_19 = arith.constant dense<0.000000e+00> : vector<64x128xf32>
    %15 = tpu.matmul %6, %14, %cst_19 {dimension_numbers = #tpu.dot_dimension_numbers<[1], [0], [0], [1], [0, 0, 1, 1], [], []>} : vector<64x16xbf16>, vector<16x128xbf16>, vector<64x128xf32> -> vector<64x128xf32>
    %c0_20 = arith.constant 0 : index
    %c0_21 = arith.constant 0 : index
    %16 = vector.load %arg8[%c0_20, %c0_21] : memref<1x128xf32, #tpu.memory_space<vmem>>, vector<1x128xf32>
    %17 = vector.broadcast %16 : vector<1x128xf32> to vector<64x128xf32>
    %18 = arith.addf %15, %17 : vector<64x128xf32>
    %19 = vector.shape_cast %18 : vector<64x128xf32> to vector<8x8x128xf32>
    %c0_22 = arith.constant 0 : index
    %c0_23 = arith.constant 0 : index
    %c0_24 = arith.constant 0 : index
    %20 = vector.load %arg11[%c0_22, %c0_23, %c0_24] : memref<8x8x128xf32, #tpu.memory_space<vmem>>, vector<8x8x128xf32>
    tpu.vector_store %arg11[%c0_22, %c0_23, %c0_24], %19 {strides = array<i32>} : memref<8x8x128xf32, #tpu.memory_space<vmem>>, vector<8x8x128xf32>,
    %c0_25 = arith.constant 0 : index
    %c0_26 = arith.constant 0 : index
    %21 = vector.load %arg1[%c0_25, %c0_26] : memref<8x1xi32, #tpu.memory_space<vmem>>, vector<8x1xi32>
    %c0_27 = arith.constant 0 : index
    %c0_28 = arith.constant 0 : index
    %22 = vector.load %arg6[%c0_27, %c0_28] : memref<64x256xbf16, #tpu.memory_space<vmem>>, vector<64x256xbf16>
    %c0_i32 = arith.constant 0 : i32
    %c7_i32 = arith.constant 7 : i32
    %23 = arith.subi %c7_i32, %c0_i32 : i32
    %c0_29 = arith.constant 0 : index
    %c0_30 = arith.constant 0 : index
    %24 = vector.load %arg12[%c0_29, %c0_30] : memref<8x64xf32, #tpu.memory_space<vmem>>, vector<8x64xf32>
    %c0_31 = arith.constant 0 : index
    %c0_32 = arith.constant 0 : index
    %25 = vector.load %arg13[%c0_31, %c0_32] : memref<8x64xf32, #tpu.memory_space<vmem>>, vector<8x64xf32>
    %26 = arith.truncf %24 : vector<8x64xf32> to vector<8x64xbf16>
    %cst_33 = arith.constant dense<0.000000e+00> : vector<8x256xf32>
    %27 = tpu.matmul %26, %22, %cst_33 {dimension_numbers = #tpu.dot_dimension_numbers<[1], [0], [0], [1], [0, 0, 1, 1], [], []>} : vector<8x64xbf16>, vector<64x256xbf16>, vector<8x256xf32> -> vector<8x256xf32>
    %28 = vector.extract_strided_slice %27 {offsets = [0, 0], sizes = [8, 128], strides = [1, 1]} : vector<8x256xf32> to vector<8x128xf32>
    %29 = arith.index_cast %c0_i32 : i32 to index
    %c0_34 = arith.constant 0 : index
    %c0_35 = arith.constant 0 : index
    %30 = vector.load %arg10[%29, %c0_34, %c0_35] : memref<8x8x128xf32, #tpu.memory_space<vmem>>, vector<1x8x128xf32>
    %31 = vector.shape_cast %30 : vector<1x8x128xf32> to vector<8x128xf32>
    %32 = arith.addf %28, %31 : vector<8x128xf32>
    %33 = vector.extract_strided_slice %27 {offsets = [0, 128], sizes = [8, 128], strides = [1, 1]} : vector<8x256xf32> to vector<8x128xf32>
    %34 = arith.index_cast %23 : i32 to index
    %c0_36 = arith.constant 0 : index
    %c0_37 = arith.constant 0 : index
    %35 = vector.load %arg11[%34, %c0_36, %c0_37] : memref<8x8x128xf32, #tpu.memory_space<vmem>>, vector<1x8x128xf32>
    %36 = vector.shape_cast %35 : vector<1x8x128xf32> to vector<8x128xf32>
    %37 = arith.addf %33, %36 : vector<8x128xf32>
    %38 = vector.extract_strided_slice %25 {offsets = [0, 0], sizes = [8, 32], strides = [1, 1]} : vector<8x64xf32> to vector<8x32xf32>
    %39 = arith.negf %32 : vector<8x128xf32>
    %40 = math.exp %39 : vector<8x128xf32>
    %cst_38 = arith.constant 1.000000e+00 : f32
    %41 = vector.broadcast %cst_38 : f32 to vector<8x128xf32>
    %42 = arith.addf %41, %40 : vector<8x128xf32>
    %43 = arith.divf %41, %42 : vector<8x128xf32>
    %44 = math.tanh %32 : vector<8x128xf32>
    %45 = vector.extract_strided_slice %43 {offsets = [0, 0], sizes = [8, 32], strides = [1, 1]} : vector<8x128xf32> to vector<8x32xf32>
    %46 = vector.extract_strided_slice %43 {offsets = [0, 32], sizes = [8, 32], strides = [1, 1]} : vector<8x128xf32> to vector<8x32xf32>
    %47 = vector.extract_strided_slice %44 {offsets = [0, 64], sizes = [8, 32], strides = [1, 1]} : vector<8x128xf32> to vector<8x32xf32>
    %48 = vector.extract_strided_slice %43 {offsets = [0, 96], sizes = [8, 32], strides = [1, 1]} : vector<8x128xf32> to vector<8x32xf32>
    %49 = arith.mulf %46, %38 : vector<8x32xf32>
    %50 = arith.mulf %45, %47 : vector<8x32xf32>
    %51 = arith.addf %49, %50 : vector<8x32xf32>
    %52 = math.tanh %51 : vector<8x32xf32>
    %53 = arith.mulf %48, %52 : vector<8x32xf32>
    %54 = vector.extract_strided_slice %25 {offsets = [0, 32], sizes = [8, 32], strides = [1, 1]} : vector<8x64xf32> to vector<8x32xf32>
    %55 = arith.negf %37 : vector<8x128xf32>
    %56 = math.exp %55 : vector<8x128xf32>
    %cst_39 = arith.constant 1.000000e+00 : f32
    %57 = vector.broadcast %cst_39 : f32 to vector<8x128xf32>
    %58 = arith.addf %57, %56 : vector<8x128xf32>
    %59 = arith.divf %57, %58 : vector<8x128xf32>
    %60 = math.tanh %37 : vector<8x128xf32>
    %61 = vector.extract_strided_slice %59 {offsets = [0, 0], sizes = [8, 32], strides = [1, 1]} : vector<8x128xf32> to vector<8x32xf32>
    %62 = vector.extract_strided_slice %59 {offsets = [0, 32], sizes = [8, 32], strides = [1, 1]} : vector<8x128xf32> to vector<8x32xf32>
    %63 = vector.extract_strided_slice %60 {offsets = [0, 64], sizes = [8, 32], strides = [1, 1]} : vector<8x128xf32> to vector<8x32xf32>
    %64 = vector.extract_strided_slice %59 {offsets = [0, 96], sizes = [8, 32], strides = [1, 1]} : vector<8x128xf32> to vector<8x32xf32>
    %65 = arith.mulf %62, %54 : vector<8x32xf32>
    %66 = arith.mulf %61, %63 : vector<8x32xf32>
    %67 = arith.addf %65, %66 : vector<8x32xf32>
    %68 = math.tanh %67 : vector<8x32xf32>
    %69 = arith.mulf %64, %68 : vector<8x32xf32>
    %70 = vector.broadcast %c0_i32 : i32 to vector<8x1xi32>
    %71 = arith.cmpi slt, %70, %21 : vector<8x1xi32>
    %72 = vector.broadcast %23 : i32 to vector<8x1xi32>
    %73 = arith.cmpi slt, %72, %21 : vector<8x1xi32>
    %74 = vector.extract_strided_slice %24 {offsets = [0, 0], sizes = [8, 32], strides = [1, 1]} : vector<8x64xf32> to vector<8x32xf32>
    %75 = vector.shape_cast %71 : vector<8x1xi1> to vector<8x1xi1>
    %76 = vector.broadcast %75 : vector<8x1xi1> to vector<8x32xi1>
    %77 = arith.select %76, %53, %74 : vector<8x32xi1>, vector<8x32xf32>
    %78 = vector.extract_strided_slice %25 {offsets = [0, 0], sizes = [8, 32], strides = [1, 1]} : vector<8x64xf32> to vector<8x32xf32>
    %79 = vector.shape_cast %71 : vector<8x1xi1> to vector<8x1xi1>
    %80 = vector.broadcast %79 : vector<8x1xi1> to vector<8x32xi1>
    %81 = arith.select %80, %51, %78 : vector<8x32xi1>, vector<8x32xf32>
    %82 = vector.extract_strided_slice %24 {offsets = [0, 32], sizes = [8, 32], strides = [1, 1]} : vector<8x64xf32> to vector<8x32xf32>
    %83 = vector.shape_cast %73 : vector<8x1xi1> to vector<8x1xi1>
    %84 = vector.broadcast %83 : vector<8x1xi1> to vector<8x32xi1>
    %85 = arith.select %84, %69, %82 : vector<8x32xi1>, vector<8x32xf32>
    %86 = vector.extract_strided_slice %25 {offsets = [0, 32], sizes = [8, 32], strides = [1, 1]} : vector<8x64xf32> to vector<8x32xf32>
    %87 = vector.shape_cast %73 : vector<8x1xi1> to vector<8x1xi1>
    %88 = vector.broadcast %87 : vector<8x1xi1> to vector<8x32xi1>
    %89 = arith.select %88, %67, %86 : vector<8x32xi1>, vector<8x32xf32>
    %c0_40 = arith.constant 0 : index
    %c0_41 = arith.constant 0 : index
    %90 = vector.load %arg12[%c0_40, %c0_41] : memref<8x64xf32, #tpu.memory_space<vmem>>, vector<8x32xf32>
    tpu.vector_store %arg12[%c0_40, %c0_41], %77 {strides = array<i32>} : memref<8x64xf32, #tpu.memory_space<vmem>>, vector<8x32xf32>,
    %c0_42 = arith.constant 0 : index
    %c32 = arith.constant 32 : index
    %91 = vector.load %arg12[%c0_42, %c32] : memref<8x64xf32, #tpu.memory_space<vmem>>, vector<8x32xf32>
    tpu.vector_store %arg12[%c0_42, %c32], %85 {strides = array<i32>} : memref<8x64xf32, #tpu.memory_space<vmem>>, vector<8x32xf32>,
    %c0_43 = arith.constant 0 : index
    %c0_44 = arith.constant 0 : index
    %92 = vector.load %arg13[%c0_43, %c0_44] : memref<8x64xf32, #tpu.memory_space<vmem>>, vector<8x32xf32>
    tpu.vector_store %arg13[%c0_43, %c0_44], %81 {strides = array<i32>} : memref<8x64xf32, #tpu.memory_space<vmem>>, vector<8x32xf32>,
    %c0_45 = arith.constant 0 : index
    %c32_46 = arith.constant 32 : index
    %93 = vector.load %arg13[%c0_45, %c32_46] : memref<8x64xf32, #tpu.memory_space<vmem>>, vector<8x32xf32>
    tpu.vector_store %arg13[%c0_45, %c32_46], %89 {strides = array<i32>} : memref<8x64xf32, #tpu.memory_space<vmem>>, vector<8x32xf32>,
    %94 = arith.index_cast %c0_i32 : i32 to index
    %c0_47 = arith.constant 0 : index
    %c0_48 = arith.constant 0 : index
    %95 = vector.load %arg9[%94, %c0_47, %c0_48] : memref<8x8x64xf32, #tpu.memory_space<vmem>>, vector<1x8x32xf32>
    %96 = vector.shape_cast %95 : vector<1x8x32xf32> to vector<8x32xf32>
    %97 = vector.shape_cast %77 : vector<8x32xf32> to vector<1x8x32xf32>
    tpu.vector_store %arg9[%94, %c0_47, %c0_48], %97 {strides = array<i32>} : memref<8x8x64xf32, #tpu.memory_space<vmem>>, vector<1x8x32xf32>,
    %98 = arith.index_cast %23 : i32 to index
    %c0_49 = arith.constant 0 : index
    %c32_50 = arith.constant 32 : index
    %99 = vector.load %arg9[%98, %c0_49, %c32_50] : memref<8x8x64xf32, #tpu.memory_space<vmem>>, vector<1x8x32xf32>
    %100 = vector.shape_cast %99 : vector<1x8x32xf32> to vector<8x32xf32>
    %101 = vector.shape_cast %85 : vector<8x32xf32> to vector<1x8x32xf32>
    tpu.vector_store %arg9[%98, %c0_49, %c32_50], %101 {strides = array<i32>} : memref<8x8x64xf32, #tpu.memory_space<vmem>>, vector<1x8x32xf32>,
    %c1_i32 = arith.constant 1 : i32
    %c7_i32_51 = arith.constant 7 : i32
    %102 = arith.subi %c7_i32_51, %c1_i32 : i32
    %c0_52 = arith.constant 0 : index
    %c0_53 = arith.constant 0 : index
    %103 = vector.load %arg12[%c0_52, %c0_53] : memref<8x64xf32, #tpu.memory_space<vmem>>, vector<8x64xf32>
    %c0_54 = arith.constant 0 : index
    %c0_55 = arith.constant 0 : index
    %104 = vector.load %arg13[%c0_54, %c0_55] : memref<8x64xf32, #tpu.memory_space<vmem>>, vector<8x64xf32>
    %105 = arith.truncf %103 : vector<8x64xf32> to vector<8x64xbf16>
    %cst_56 = arith.constant dense<0.000000e+00> : vector<8x256xf32>
    %106 = tpu.matmul %105, %22, %cst_56 {dimension_numbers = #tpu.dot_dimension_numbers<[1], [0], [0], [1], [0, 0, 1, 1], [], []>} : vector<8x64xbf16>, vector<64x256xbf16>, vector<8x256xf32> -> vector<8x256xf32>
    %107 = vector.extract_strided_slice %106 {offsets = [0, 0], sizes = [8, 128], strides = [1, 1]} : vector<8x256xf32> to vector<8x128xf32>
    %108 = arith.index_cast %c1_i32 : i32 to index
    %c0_57 = arith.constant 0 : index
    %c0_58 = arith.constant 0 : index
    %109 = vector.load %arg10[%108, %c0_57, %c0_58] : memref<8x8x128xf32, #tpu.memory_space<vmem>>, vector<1x8x128xf32>
    %110 = vector.shape_cast %109 : vector<1x8x128xf32> to vector<8x128xf32>
    %111 = arith.addf %107, %110 : vector<8x128xf32>
    %112 = vector.extract_strided_slice %106 {offsets = [0, 128], sizes = [8, 128], strides = [1, 1]} : vector<8x256xf32> to vector<8x128xf32>
    %113 = arith.index_cast %102 : i32 to index
    %c0_59 = arith.constant 0 : index
    %c0_60 = arith.constant 0 : index
    %114 = vector.load %arg11[%113, %c0_59, %c0_60] : memref<8x8x128xf32, #tpu.memory_space<vmem>>, vector<1x8x128xf32>
    %115 = vector.shape_cast %114 : vector<1x8x128xf32> to vector<8x128xf32>
    %116 = arith.addf %112, %115 : vector<8x128xf32>
    %117 = vector.extract_strided_slice %104 {offsets = [0, 0], sizes = [8, 32], strides = [1, 1]} : vector<8x64xf32> to vector<8x32xf32>
    %118 = arith.negf %111 : vector<8x128xf32>
    %119 = math.exp %118 : vector<8x128xf32>
    %cst_61 = arith.constant 1.000000e+00 : f32
    %120 = vector.broadcast %cst_61 : f32 to vector<8x128xf32>
    %121 = arith.addf %120, %119 : vector<8x128xf32>
    %122 = arith.divf %120, %121 : vector<8x128xf32>
    %123 = math.tanh %111 : vector<8x128xf32>
    %124 = vector.extract_strided_slice %122 {offsets = [0, 0], sizes = [8, 32], strides = [1, 1]} : vector<8x128xf32> to vector<8x32xf32>
    %125 = vector.extract_strided_slice %122 {offsets = [0, 32], sizes = [8, 32], strides = [1, 1]} : vector<8x128xf32> to vector<8x32xf32>
    %126 = vector.extract_strided_slice %123 {offsets = [0, 64], sizes = [8, 32], strides = [1, 1]} : vector<8x128xf32> to vector<8x32xf32>
    %127 = vector.extract_strided_slice %122 {offsets = [0, 96], sizes = [8, 32], strides = [1, 1]} : vector<8x128xf32> to vector<8x32xf32>
    %128 = arith.mulf %125, %117 : vector<8x32xf32>
    %129 = arith.mulf %124, %126 : vector<8x32xf32>
    %130 = arith.addf %128, %129 : vector<8x32xf32>
    %131 = math.tanh %130 : vector<8x32xf32>
    %132 = arith.mulf %127, %131 : vector<8x32xf32>
    %133 = vector.extract_strided_slice %104 {offsets = [0, 32], sizes = [8, 32], strides = [1, 1]} : vector<8x64xf32> to vector<8x32xf32>
    %134 = arith.negf %116 : vector<8x128xf32>
    %135 = math.exp %134 : vector<8x128xf32>
    %cst_62 = arith.constant 1.000000e+00 : f32
    %136 = vector.broadcast %cst_62 : f32 to vector<8x128xf32>
    %137 = arith.addf %136, %135 : vector<8x128xf32>
    %138 = arith.divf %136, %137 : vector<8x128xf32>
    %139 = math.tanh %116 : vector<8x128xf32>
    %140 = vector.extract_strided_slice %138 {offsets = [0, 0], sizes = [8, 32], strides = [1, 1]} : vector<8x128xf32> to vector<8x32xf32>
    %141 = vector.extract_strided_slice %138 {offsets = [0, 32], sizes = [8, 32], strides = [1, 1]} : vector<8x128xf32> to vector<8x32xf32>
    %142 = vector.extract_strided_slice %139 {offsets = [0, 64], sizes = [8, 32], strides = [1, 1]} : vector<8x128xf32> to vector<8x32xf32>
    %143 = vector.extract_strided_slice %138 {offsets = [0, 96], sizes = [8, 32], strides = [1, 1]} : vector<8x128xf32> to vector<8x32xf32>
    %144 = arith.mulf %141, %133 : vector<8x32xf32>
    %145 = arith.mulf %140, %142 : vector<8x32xf32>
    %146 = arith.addf %144, %145 : vector<8x32xf32>
    %147 = math.tanh %146 : vector<8x32xf32>
    %148 = arith.mulf %143, %147 : vector<8x32xf32>
    %149 = vector.broadcast %c1_i32 : i32 to vector<8x1xi32>
    %150 = arith.cmpi slt, %149, %21 : vector<8x1xi32>
    %151 = vector.broadcast %102 : i32 to vector<8x1xi32>
    %152 = arith.cmpi slt, %151, %21 : vector<8x1xi32>
    %153 = vector.extract_strided_slice %103 {offsets = [0, 0], sizes = [8, 32], strides = [1, 1]} : vector<8x64xf32> to vector<8x32xf32>
    %154 = vector.shape_cast %150 : vector<8x1xi1> to vector<8x1xi1>
    %155 = vector.broadcast %154 : vector<8x1xi1> to vector<8x32xi1>
    %156 = arith.select %155, %132, %153 : vector<8x32xi1>, vector<8x32xf32>
    %157 = vector.extract_strided_slice %104 {offsets = [0, 0], sizes = [8, 32], strides = [1, 1]} : vector<8x64xf32> to vector<8x32xf32>
    %158 = vector.shape_cast %150 : vector<8x1xi1> to vector<8x1xi1>
    %159 = vector.broadcast %158 : vector<8x1xi1> to vector<8x32xi1>
    %160 = arith.select %159, %130, %157 : vector<8x32xi1>, vector<8x32xf32>
    %161 = vector.extract_strided_slice %103 {offsets = [0, 32], sizes = [8, 32], strides = [1, 1]} : vector<8x64xf32> to vector<8x32xf32>
    %162 = vector.shape_cast %152 : vector<8x1xi1> to vector<8x1xi1>
    %163 = vector.broadcast %162 : vector<8x1xi1> to vector<8x32xi1>
    %164 = arith.select %163, %148, %161 : vector<8x32xi1>, vector<8x32xf32>
    %165 = vector.extract_strided_slice %104 {offsets = [0, 32], sizes = [8, 32], strides = [1, 1]} : vector<8x64xf32> to vector<8x32xf32>
    %166 = vector.shape_cast %152 : vector<8x1xi1> to vector<8x1xi1>
    %167 = vector.broadcast %166 : vector<8x1xi1> to vector<8x32xi1>
    %168 = arith.select %167, %146, %165 : vector<8x32xi1>, vector<8x32xf32>
    %c0_63 = arith.constant 0 : index
    %c0_64 = arith.constant 0 : index
    %169 = vector.load %arg12[%c0_63, %c0_64] : memref<8x64xf32, #tpu.memory_space<vmem>>, vector<8x32xf32>
    tpu.vector_store %arg12[%c0_63, %c0_64], %156 {strides = array<i32>} : memref<8x64xf32, #tpu.memory_space<vmem>>, vector<8x32xf32>,
    %c0_65 = arith.constant 0 : index
    %c32_66 = arith.constant 32 : index
    %170 = vector.load %arg12[%c0_65, %c32_66] : memref<8x64xf32, #tpu.memory_space<vmem>>, vector<8x32xf32>
    tpu.vector_store %arg12[%c0_65, %c32_66], %164 {strides = array<i32>} : memref<8x64xf32, #tpu.memory_space<vmem>>, vector<8x32xf32>,
    %c0_67 = arith.constant 0 : index
    %c0_68 = arith.constant 0 : index
    %171 = vector.load %arg13[%c0_67, %c0_68] : memref<8x64xf32, #tpu.memory_space<vmem>>, vector<8x32xf32>
    tpu.vector_store %arg13[%c0_67, %c0_68], %160 {strides = array<i32>} : memref<8x64xf32, #tpu.memory_space<vmem>>, vector<8x32xf32>,
    %c0_69 = arith.constant 0 : index
    %c32_70 = arith.constant 32 : index
    %172 = vector.load %arg13[%c0_69, %c32_70] : memref<8x64xf32, #tpu.memory_space<vmem>>, vector<8x32xf32>
    tpu.vector_store %arg13[%c0_69, %c32_70], %168 {strides = array<i32>} : memref<8x64xf32, #tpu.memory_space<vmem>>, vector<8x32xf32>,
    %173 = arith.index_cast %c1_i32 : i32 to index
    %c0_71 = arith.constant 0 : index
    %c0_72 = arith.constant 0 : index
    %174 = vector.load %arg9[%173, %c0_71, %c0_72] : memref<8x8x64xf32, #tpu.memory_space<vmem>>, vector<1x8x32xf32>
    %175 = vector.shape_cast %174 : vector<1x8x32xf32> to vector<8x32xf32>
    %176 = vector.shape_cast %156 : vector<8x32xf32> to vector<1x8x32xf32>
    tpu.vector_store %arg9[%173, %c0_71, %c0_72], %176 {strides = array<i32>} : memref<8x8x64xf32, #tpu.memory_space<vmem>>, vector<1x8x32xf32>,
    %177 = arith.index_cast %102 : i32 to index
    %c0_73 = arith.constant 0 : index
    %c32_74 = arith.constant 32 : index
    %178 = vector.load %arg9[%177, %c0_73, %c32_74] : memref<8x8x64xf32, #tpu.memory_space<vmem>>, vector<1x8x32xf32>
    %179 = vector.shape_cast %178 : vector<1x8x32xf32> to vector<8x32xf32>
    %180 = vector.shape_cast %164 : vector<8x32xf32> to vector<1x8x32xf32>
    tpu.vector_store %arg9[%177, %c0_73, %c32_74], %180 {strides = array<i32>} : memref<8x8x64xf32, #tpu.memory_space<vmem>>, vector<1x8x32xf32>,
    %c2_i32 = arith.constant 2 : i32
    %c7_i32_75 = arith.constant 7 : i32
    %181 = arith.subi %c7_i32_75, %c2_i32 : i32
    %c0_76 = arith.constant 0 : index
    %c0_77 = arith.constant 0 : index
    %182 = vector.load %arg12[%c0_76, %c0_77] : memref<8x64xf32, #tpu.memory_space<vmem>>, vector<8x64xf32>
    %c0_78 = arith.constant 0 : index
    %c0_79 = arith.constant 0 : index
    %183 = vector.load %arg13[%c0_78, %c0_79] : memref<8x64xf32, #tpu.memory_space<vmem>>, vector<8x64xf32>
    %184 = arith.truncf %182 : vector<8x64xf32> to vector<8x64xbf16>
    %cst_80 = arith.constant dense<0.000000e+00> : vector<8x256xf32>
    %185 = tpu.matmul %184, %22, %cst_80 {dimension_numbers = #tpu.dot_dimension_numbers<[1], [0], [0], [1], [0, 0, 1, 1], [], []>} : vector<8x64xbf16>, vector<64x256xbf16>, vector<8x256xf32> -> vector<8x256xf32>
    %186 = vector.extract_strided_slice %185 {offsets = [0, 0], sizes = [8, 128], strides = [1, 1]} : vector<8x256xf32> to vector<8x128xf32>
    %187 = arith.index_cast %c2_i32 : i32 to index
    %c0_81 = arith.constant 0 : index
    %c0_82 = arith.constant 0 : index
    %188 = vector.load %arg10[%187, %c0_81, %c0_82] : memref<8x8x128xf32, #tpu.memory_space<vmem>>, vector<1x8x128xf32>
    %189 = vector.shape_cast %188 : vector<1x8x128xf32> to vector<8x128xf32>
    %190 = arith.addf %186, %189 : vector<8x128xf32>
    %191 = vector.extract_strided_slice %185 {offsets = [0, 128], sizes = [8, 128], strides = [1, 1]} : vector<8x256xf32> to vector<8x128xf32>
    %192 = arith.index_cast %181 : i32 to index
    %c0_83 = arith.constant 0 : index
    %c0_84 = arith.constant 0 : index
    %193 = vector.load %arg11[%192, %c0_83, %c0_84] : memref<8x8x128xf32, #tpu.memory_space<vmem>>, vector<1x8x128xf32>
    %194 = vector.shape_cast %193 : vector<1x8x128xf32> to vector<8x128xf32>
    %195 = arith.addf %191, %194 : vector<8x128xf32>
    %196 = vector.extract_strided_slice %183 {offsets = [0, 0], sizes = [8, 32], strides = [1, 1]} : vector<8x64xf32> to vector<8x32xf32>
    %197 = arith.negf %190 : vector<8x128xf32>
    %198 = math.exp %197 : vector<8x128xf32>
    %cst_85 = arith.constant 1.000000e+00 : f32
    %199 = vector.broadcast %cst_85 : f32 to vector<8x128xf32>
    %200 = arith.addf %199, %198 : vector<8x128xf32>
    %201 = arith.divf %199, %200 : vector<8x128xf32>
    %202 = math.tanh %190 : vector<8x128xf32>
    %203 = vector.extract_strided_slice %201 {offsets = [0, 0], sizes = [8, 32], strides = [1, 1]} : vector<8x128xf32> to vector<8x32xf32>
    %204 = vector.extract_strided_slice %201 {offsets = [0, 32], sizes = [8, 32], strides = [1, 1]} : vector<8x128xf32> to vector<8x32xf32>
    %205 = vector.extract_strided_slice %202 {offsets = [0, 64], sizes = [8, 32], strides = [1, 1]} : vector<8x128xf32> to vector<8x32xf32>
    %206 = vector.extract_strided_slice %201 {offsets = [0, 96], sizes = [8, 32], strides = [1, 1]} : vector<8x128xf32> to vector<8x32xf32>
    %207 = arith.mulf %204, %196 : vector<8x32xf32>
    %208 = arith.mulf %203, %205 : vector<8x32xf32>
    %209 = arith.addf %207, %208 : vector<8x32xf32>
    %210 = math.tanh %209 : vector<8x32xf32>
    %211 = arith.mulf %206, %210 : vector<8x32xf32>
    %212 = vector.extract_strided_slice %183 {offsets = [0, 32], sizes = [8, 32], strides = [1, 1]} : vector<8x64xf32> to vector<8x32xf32>
    %213 = arith.negf %195 : vector<8x128xf32>
    %214 = math.exp %213 : vector<8x128xf32>
    %cst_86 = arith.constant 1.000000e+00 : f32
    %215 = vector.broadcast %cst_86 : f32 to vector<8x128xf32>
    %216 = arith.addf %215, %214 : vector<8x128xf32>
    %217 = arith.divf %215, %216 : vector<8x128xf32>
    %218 = math.tanh %195 : vector<8x128xf32>
    %219 = vector.extract_strided_slice %217 {offsets = [0, 0], sizes = [8, 32], strides = [1, 1]} : vector<8x128xf32> to vector<8x32xf32>
    %220 = vector.extract_strided_slice %217 {offsets = [0, 32], sizes = [8, 32], strides = [1, 1]} : vector<8x128xf32> to vector<8x32xf32>
    %221 = vector.extract_strided_slice %218 {offsets = [0, 64], sizes = [8, 32], strides = [1, 1]} : vector<8x128xf32> to vector<8x32xf32>
    %222 = vector.extract_strided_slice %217 {offsets = [0, 96], sizes = [8, 32], strides = [1, 1]} : vector<8x128xf32> to vector<8x32xf32>
    %223 = arith.mulf %220, %212 : vector<8x32xf32>
    %224 = arith.mulf %219, %221 : vector<8x32xf32>
    %225 = arith.addf %223, %224 : vector<8x32xf32>
    %226 = math.tanh %225 : vector<8x32xf32>
    %227 = arith.mulf %222, %226 : vector<8x32xf32>
    %228 = vector.broadcast %c2_i32 : i32 to vector<8x1xi32>
    %229 = arith.cmpi slt, %228, %21 : vector<8x1xi32>
    %230 = vector.broadcast %181 : i32 to vector<8x1xi32>
    %231 = arith.cmpi slt, %230, %21 : vector<8x1xi32>
    %232 = vector.extract_strided_slice %182 {offsets = [0, 0], sizes = [8, 32], strides = [1, 1]} : vector<8x64xf32> to vector<8x32xf32>
    %233 = vector.shape_cast %229 : vector<8x1xi1> to vector<8x1xi1>
    %234 = vector.broadcast %233 : vector<8x1xi1> to vector<8x32xi1>
    %235 = arith.select %234, %211, %232 : vector<8x32xi1>, vector<8x32xf32>
    %236 = vector.extract_strided_slice %183 {offsets = [0, 0], sizes = [8, 32], strides = [1, 1]} : vector<8x64xf32> to vector<8x32xf32>
    %237 = vector.shape_cast %229 : vector<8x1xi1> to vector<8x1xi1>
    %238 = vector.broadcast %237 : vector<8x1xi1> to vector<8x32xi1>
    %239 = arith.select %238, %209, %236 : vector<8x32xi1>, vector<8x32xf32>
    %240 = vector.extract_strided_slice %182 {offsets = [0, 32], sizes = [8, 32], strides = [1, 1]} : vector<8x64xf32> to vector<8x32xf32>
    %241 = vector.shape_cast %231 : vector<8x1xi1> to vector<8x1xi1>
    %242 = vector.broadcast %241 : vector<8x1xi1> to vector<8x32xi1>
    %243 = arith.select %242, %227, %240 : vector<8x32xi1>, vector<8x32xf32>
    %244 = vector.extract_strided_slice %183 {offsets = [0, 32], sizes = [8, 32], strides = [1, 1]} : vector<8x64xf32> to vector<8x32xf32>
    %245 = vector.shape_cast %231 : vector<8x1xi1> to vector<8x1xi1>
    %246 = vector.broadcast %245 : vector<8x1xi1> to vector<8x32xi1>
    %247 = arith.select %246, %225, %244 : vector<8x32xi1>, vector<8x32xf32>
    %c0_87 = arith.constant 0 : index
    %c0_88 = arith.constant 0 : index
    %248 = vector.load %arg12[%c0_87, %c0_88] : memref<8x64xf32, #tpu.memory_space<vmem>>, vector<8x32xf32>
    tpu.vector_store %arg12[%c0_87, %c0_88], %235 {strides = array<i32>} : memref<8x64xf32, #tpu.memory_space<vmem>>, vector<8x32xf32>,
    %c0_89 = arith.constant 0 : index
    %c32_90 = arith.constant 32 : index
    %249 = vector.load %arg12[%c0_89, %c32_90] : memref<8x64xf32, #tpu.memory_space<vmem>>, vector<8x32xf32>
    tpu.vector_store %arg12[%c0_89, %c32_90], %243 {strides = array<i32>} : memref<8x64xf32, #tpu.memory_space<vmem>>, vector<8x32xf32>,
    %c0_91 = arith.constant 0 : index
    %c0_92 = arith.constant 0 : index
    %250 = vector.load %arg13[%c0_91, %c0_92] : memref<8x64xf32, #tpu.memory_space<vmem>>, vector<8x32xf32>
    tpu.vector_store %arg13[%c0_91, %c0_92], %239 {strides = array<i32>} : memref<8x64xf32, #tpu.memory_space<vmem>>, vector<8x32xf32>,
    %c0_93 = arith.constant 0 : index
    %c32_94 = arith.constant 32 : index
    %251 = vector.load %arg13[%c0_93, %c32_94] : memref<8x64xf32, #tpu.memory_space<vmem>>, vector<8x32xf32>
    tpu.vector_store %arg13[%c0_93, %c32_94], %247 {strides = array<i32>} : memref<8x64xf32, #tpu.memory_space<vmem>>, vector<8x32xf32>,
    %252 = arith.index_cast %c2_i32 : i32 to index
    %c0_95 = arith.constant 0 : index
    %c0_96 = arith.constant 0 : index
    %253 = vector.load %arg9[%252, %c0_95, %c0_96] : memref<8x8x64xf32, #tpu.memory_space<vmem>>, vector<1x8x32xf32>
    %254 = vector.shape_cast %253 : vector<1x8x32xf32> to vector<8x32xf32>
    %255 = vector.shape_cast %235 : vector<8x32xf32> to vector<1x8x32xf32>
    tpu.vector_store %arg9[%252, %c0_95, %c0_96], %255 {strides = array<i32>} : memref<8x8x64xf32, #tpu.memory_space<vmem>>, vector<1x8x32xf32>,
    %256 = arith.index_cast %181 : i32 to index
    %c0_97 = arith.constant 0 : index
    %c32_98 = arith.constant 32 : index
    %257 = vector.load %arg9[%256, %c0_97, %c32_98] : memref<8x8x64xf32, #tpu.memory_space<vmem>>, vector<1x8x32xf32>
    %258 = vector.shape_cast %257 : vector<1x8x32xf32> to vector<8x32xf32>
    %259 = vector.shape_cast %243 : vector<8x32xf32> to vector<1x8x32xf32>
    tpu.vector_store %arg9[%256, %c0_97, %c32_98], %259 {strides = array<i32>} : memref<8x8x64xf32, #tpu.memory_space<vmem>>, vector<1x8x32xf32>,
    %c3_i32 = arith.constant 3 : i32
    %c7_i32_99 = arith.constant 7 : i32
    %260 = arith.subi %c7_i32_99, %c3_i32 : i32
    %c0_100 = arith.constant 0 : index
    %c0_101 = arith.constant 0 : index
    %261 = vector.load %arg12[%c0_100, %c0_101] : memref<8x64xf32, #tpu.memory_space<vmem>>, vector<8x64xf32>
    %c0_102 = arith.constant 0 : index
    %c0_103 = arith.constant 0 : index
    %262 = vector.load %arg13[%c0_102, %c0_103] : memref<8x64xf32, #tpu.memory_space<vmem>>, vector<8x64xf32>
    %263 = arith.truncf %261 : vector<8x64xf32> to vector<8x64xbf16>
    %cst_104 = arith.constant dense<0.000000e+00> : vector<8x256xf32>
    %264 = tpu.matmul %263, %22, %cst_104 {dimension_numbers = #tpu.dot_dimension_numbers<[1], [0], [0], [1], [0, 0, 1, 1], [], []>} : vector<8x64xbf16>, vector<64x256xbf16>, vector<8x256xf32> -> vector<8x256xf32>
    %265 = vector.extract_strided_slice %264 {offsets = [0, 0], sizes = [8, 128], strides = [1, 1]} : vector<8x256xf32> to vector<8x128xf32>
    %266 = arith.index_cast %c3_i32 : i32 to index
    %c0_105 = arith.constant 0 : index
    %c0_106 = arith.constant 0 : index
    %267 = vector.load %arg10[%266, %c0_105, %c0_106] : memref<8x8x128xf32, #tpu.memory_space<vmem>>, vector<1x8x128xf32>
    %268 = vector.shape_cast %267 : vector<1x8x128xf32> to vector<8x128xf32>
    %269 = arith.addf %265, %268 : vector<8x128xf32>
    %270 = vector.extract_strided_slice %264 {offsets = [0, 128], sizes = [8, 128], strides = [1, 1]} : vector<8x256xf32> to vector<8x128xf32>
    %271 = arith.index_cast %260 : i32 to index
    %c0_107 = arith.constant 0 : index
    %c0_108 = arith.constant 0 : index
    %272 = vector.load %arg11[%271, %c0_107, %c0_108] : memref<8x8x128xf32, #tpu.memory_space<vmem>>, vector<1x8x128xf32>
    %273 = vector.shape_cast %272 : vector<1x8x128xf32> to vector<8x128xf32>
    %274 = arith.addf %270, %273 : vector<8x128xf32>
    %275 = vector.extract_strided_slice %262 {offsets = [0, 0], sizes = [8, 32], strides = [1, 1]} : vector<8x64xf32> to vector<8x32xf32>
    %276 = arith.negf %269 : vector<8x128xf32>
    %277 = math.exp %276 : vector<8x128xf32>
    %cst_109 = arith.constant 1.000000e+00 : f32
    %278 = vector.broadcast %cst_109 : f32 to vector<8x128xf32>
    %279 = arith.addf %278, %277 : vector<8x128xf32>
    %280 = arith.divf %278, %279 : vector<8x128xf32>
    %281 = math.tanh %269 : vector<8x128xf32>
    %282 = vector.extract_strided_slice %280 {offsets = [0, 0], sizes = [8, 32], strides = [1, 1]} : vector<8x128xf32> to vector<8x32xf32>
    %283 = vector.extract_strided_slice %280 {offsets = [0, 32], sizes = [8, 32], strides = [1, 1]} : vector<8x128xf32> to vector<8x32xf32>
    %284 = vector.extract_strided_slice %281 {offsets = [0, 64], sizes = [8, 32], strides = [1, 1]} : vector<8x128xf32> to vector<8x32xf32>
    %285 = vector.extract_strided_slice %280 {offsets = [0, 96], sizes = [8, 32], strides = [1, 1]} : vector<8x128xf32> to vector<8x32xf32>
    %286 = arith.mulf %283, %275 : vector<8x32xf32>
    %287 = arith.mulf %282, %284 : vector<8x32xf32>
    %288 = arith.addf %286, %287 : vector<8x32xf32>
    %289 = math.tanh %288 : vector<8x32xf32>
    %290 = arith.mulf %285, %289 : vector<8x32xf32>
    %291 = vector.extract_strided_slice %262 {offsets = [0, 32], sizes = [8, 32], strides = [1, 1]} : vector<8x64xf32> to vector<8x32xf32>
    %292 = arith.negf %274 : vector<8x128xf32>
    %293 = math.exp %292 : vector<8x128xf32>
    %cst_110 = arith.constant 1.000000e+00 : f32
    %294 = vector.broadcast %cst_110 : f32 to vector<8x128xf32>
    %295 = arith.addf %294, %293 : vector<8x128xf32>
    %296 = arith.divf %294, %295 : vector<8x128xf32>
    %297 = math.tanh %274 : vector<8x128xf32>
    %298 = vector.extract_strided_slice %296 {offsets = [0, 0], sizes = [8, 32], strides = [1, 1]} : vector<8x128xf32> to vector<8x32xf32>
    %299 = vector.extract_strided_slice %296 {offsets = [0, 32], sizes = [8, 32], strides = [1, 1]} : vector<8x128xf32> to vector<8x32xf32>
    %300 = vector.extract_strided_slice %297 {offsets = [0, 64], sizes = [8, 32], strides = [1, 1]} : vector<8x128xf32> to vector<8x32xf32>
    %301 = vector.extract_strided_slice %296 {offsets = [0, 96], sizes = [8, 32], strides = [1, 1]} : vector<8x128xf32> to vector<8x32xf32>
    %302 = arith.mulf %299, %291 : vector<8x32xf32>
    %303 = arith.mulf %298, %300 : vector<8x32xf32>
    %304 = arith.addf %302, %303 : vector<8x32xf32>
    %305 = math.tanh %304 : vector<8x32xf32>
    %306 = arith.mulf %301, %305 : vector<8x32xf32>
    %307 = vector.broadcast %c3_i32 : i32 to vector<8x1xi32>
    %308 = arith.cmpi slt, %307, %21 : vector<8x1xi32>
    %309 = vector.broadcast %260 : i32 to vector<8x1xi32>
    %310 = arith.cmpi slt, %309, %21 : vector<8x1xi32>
    %311 = vector.extract_strided_slice %261 {offsets = [0, 0], sizes = [8, 32], strides = [1, 1]} : vector<8x64xf32> to vector<8x32xf32>
    %312 = vector.shape_cast %308 : vector<8x1xi1> to vector<8x1xi1>
    %313 = vector.broadcast %312 : vector<8x1xi1> to vector<8x32xi1>
    %314 = arith.select %313, %290, %311 : vector<8x32xi1>, vector<8x32xf32>
    %315 = vector.extract_strided_slice %262 {offsets = [0, 0], sizes = [8, 32], strides = [1, 1]} : vector<8x64xf32> to vector<8x32xf32>
    %316 = vector.shape_cast %308 : vector<8x1xi1> to vector<8x1xi1>
    %317 = vector.broadcast %316 : vector<8x1xi1> to vector<8x32xi1>
    %318 = arith.select %317, %288, %315 : vector<8x32xi1>, vector<8x32xf32>
    %319 = vector.extract_strided_slice %261 {offsets = [0, 32], sizes = [8, 32], strides = [1, 1]} : vector<8x64xf32> to vector<8x32xf32>
    %320 = vector.shape_cast %310 : vector<8x1xi1> to vector<8x1xi1>
    %321 = vector.broadcast %320 : vector<8x1xi1> to vector<8x32xi1>
    %322 = arith.select %321, %306, %319 : vector<8x32xi1>, vector<8x32xf32>
    %323 = vector.extract_strided_slice %262 {offsets = [0, 32], sizes = [8, 32], strides = [1, 1]} : vector<8x64xf32> to vector<8x32xf32>
    %324 = vector.shape_cast %310 : vector<8x1xi1> to vector<8x1xi1>
    %325 = vector.broadcast %324 : vector<8x1xi1> to vector<8x32xi1>
    %326 = arith.select %325, %304, %323 : vector<8x32xi1>, vector<8x32xf32>
    %c0_111 = arith.constant 0 : index
    %c0_112 = arith.constant 0 : index
    %327 = vector.load %arg12[%c0_111, %c0_112] : memref<8x64xf32, #tpu.memory_space<vmem>>, vector<8x32xf32>
    tpu.vector_store %arg12[%c0_111, %c0_112], %314 {strides = array<i32>} : memref<8x64xf32, #tpu.memory_space<vmem>>, vector<8x32xf32>,
    %c0_113 = arith.constant 0 : index
    %c32_114 = arith.constant 32 : index
    %328 = vector.load %arg12[%c0_113, %c32_114] : memref<8x64xf32, #tpu.memory_space<vmem>>, vector<8x32xf32>
    tpu.vector_store %arg12[%c0_113, %c32_114], %322 {strides = array<i32>} : memref<8x64xf32, #tpu.memory_space<vmem>>, vector<8x32xf32>,
    %c0_115 = arith.constant 0 : index
    %c0_116 = arith.constant 0 : index
    %329 = vector.load %arg13[%c0_115, %c0_116] : memref<8x64xf32, #tpu.memory_space<vmem>>, vector<8x32xf32>
    tpu.vector_store %arg13[%c0_115, %c0_116], %318 {strides = array<i32>} : memref<8x64xf32, #tpu.memory_space<vmem>>, vector<8x32xf32>,
    %c0_117 = arith.constant 0 : index
    %c32_118 = arith.constant 32 : index
    %330 = vector.load %arg13[%c0_117, %c32_118] : memref<8x64xf32, #tpu.memory_space<vmem>>, vector<8x32xf32>
    tpu.vector_store %arg13[%c0_117, %c32_118], %326 {strides = array<i32>} : memref<8x64xf32, #tpu.memory_space<vmem>>, vector<8x32xf32>,
    %331 = arith.index_cast %c3_i32 : i32 to index
    %c0_119 = arith.constant 0 : index
    %c0_120 = arith.constant 0 : index
    %332 = vector.load %arg9[%331, %c0_119, %c0_120] : memref<8x8x64xf32, #tpu.memory_space<vmem>>, vector<1x8x32xf32>
    %333 = vector.shape_cast %332 : vector<1x8x32xf32> to vector<8x32xf32>
    %334 = vector.shape_cast %314 : vector<8x32xf32> to vector<1x8x32xf32>
    tpu.vector_store %arg9[%331, %c0_119, %c0_120], %334 {strides = array<i32>} : memref<8x8x64xf32, #tpu.memory_space<vmem>>, vector<1x8x32xf32>,
    %335 = arith.index_cast %260 : i32 to index
    %c0_121 = arith.constant 0 : index
    %c32_122 = arith.constant 32 : index
    %336 = vector.load %arg9[%335, %c0_121, %c32_122] : memref<8x8x64xf32, #tpu.memory_space<vmem>>, vector<1x8x32xf32>
    %337 = vector.shape_cast %336 : vector<1x8x32xf32> to vector<8x32xf32>
    %338 = vector.shape_cast %322 : vector<8x32xf32> to vector<1x8x32xf32>
    tpu.vector_store %arg9[%335, %c0_121, %c32_122], %338 {strides = array<i32>} : memref<8x8x64xf32, #tpu.memory_space<vmem>>, vector<1x8x32xf32>,
    %c4_i32 = arith.constant 4 : i32
    %c7_i32_123 = arith.constant 7 : i32
    %339 = arith.subi %c7_i32_123, %c4_i32 : i32
    %c0_124 = arith.constant 0 : index
    %c0_125 = arith.constant 0 : index
    %340 = vector.load %arg12[%c0_124, %c0_125] : memref<8x64xf32, #tpu.memory_space<vmem>>, vector<8x64xf32>
    %c0_126 = arith.constant 0 : index
    %c0_127 = arith.constant 0 : index
    %341 = vector.load %arg13[%c0_126, %c0_127] : memref<8x64xf32, #tpu.memory_space<vmem>>, vector<8x64xf32>
    %342 = arith.truncf %340 : vector<8x64xf32> to vector<8x64xbf16>
    %cst_128 = arith.constant dense<0.000000e+00> : vector<8x256xf32>
    %343 = tpu.matmul %342, %22, %cst_128 {dimension_numbers = #tpu.dot_dimension_numbers<[1], [0], [0], [1], [0, 0, 1, 1], [], []>} : vector<8x64xbf16>, vector<64x256xbf16>, vector<8x256xf32> -> vector<8x256xf32>
    %344 = vector.extract_strided_slice %343 {offsets = [0, 0], sizes = [8, 128], strides = [1, 1]} : vector<8x256xf32> to vector<8x128xf32>
    %345 = arith.index_cast %c4_i32 : i32 to index
    %c0_129 = arith.constant 0 : index
    %c0_130 = arith.constant 0 : index
    %346 = vector.load %arg10[%345, %c0_129, %c0_130] : memref<8x8x128xf32, #tpu.memory_space<vmem>>, vector<1x8x128xf32>
    %347 = vector.shape_cast %346 : vector<1x8x128xf32> to vector<8x128xf32>
    %348 = arith.addf %344, %347 : vector<8x128xf32>
    %349 = vector.extract_strided_slice %343 {offsets = [0, 128], sizes = [8, 128], strides = [1, 1]} : vector<8x256xf32> to vector<8x128xf32>
    %350 = arith.index_cast %339 : i32 to index
    %c0_131 = arith.constant 0 : index
    %c0_132 = arith.constant 0 : index
    %351 = vector.load %arg11[%350, %c0_131, %c0_132] : memref<8x8x128xf32, #tpu.memory_space<vmem>>, vector<1x8x128xf32>
    %352 = vector.shape_cast %351 : vector<1x8x128xf32> to vector<8x128xf32>
    %353 = arith.addf %349, %352 : vector<8x128xf32>
    %354 = vector.extract_strided_slice %341 {offsets = [0, 0], sizes = [8, 32], strides = [1, 1]} : vector<8x64xf32> to vector<8x32xf32>
    %355 = arith.negf %348 : vector<8x128xf32>
    %356 = math.exp %355 : vector<8x128xf32>
    %cst_133 = arith.constant 1.000000e+00 : f32
    %357 = vector.broadcast %cst_133 : f32 to vector<8x128xf32>
    %358 = arith.addf %357, %356 : vector<8x128xf32>
    %359 = arith.divf %357, %358 : vector<8x128xf32>
    %360 = math.tanh %348 : vector<8x128xf32>
    %361 = vector.extract_strided_slice %359 {offsets = [0, 0], sizes = [8, 32], strides = [1, 1]} : vector<8x128xf32> to vector<8x32xf32>
    %362 = vector.extract_strided_slice %359 {offsets = [0, 32], sizes = [8, 32], strides = [1, 1]} : vector<8x128xf32> to vector<8x32xf32>
    %363 = vector.extract_strided_slice %360 {offsets = [0, 64], sizes = [8, 32], strides = [1, 1]} : vector<8x128xf32> to vector<8x32xf32>
    %364 = vector.extract_strided_slice %359 {offsets = [0, 96], sizes = [8, 32], strides = [1, 1]} : vector<8x128xf32> to vector<8x32xf32>
    %365 = arith.mulf %362, %354 : vector<8x32xf32>
    %366 = arith.mulf %361, %363 : vector<8x32xf32>
    %367 = arith.addf %365, %366 : vector<8x32xf32>
    %368 = math.tanh %367 : vector<8x32xf32>
    %369 = arith.mulf %364, %368 : vector<8x32xf32>
    %370 = vector.extract_strided_slice %341 {offsets = [0, 32], sizes = [8, 32], strides = [1, 1]} : vector<8x64xf32> to vector<8x32xf32>
    %371 = arith.negf %353 : vector<8x128xf32>
    %372 = math.exp %371 : vector<8x128xf32>
    %cst_134 = arith.constant 1.000000e+00 : f32
    %373 = vector.broadcast %cst_134 : f32 to vector<8x128xf32>
    %374 = arith.addf %373, %372 : vector<8x128xf32>
    %375 = arith.divf %373, %374 : vector<8x128xf32>
    %376 = math.tanh %353 : vector<8x128xf32>
    %377 = vector.extract_strided_slice %375 {offsets = [0, 0], sizes = [8, 32], strides = [1, 1]} : vector<8x128xf32> to vector<8x32xf32>
    %378 = vector.extract_strided_slice %375 {offsets = [0, 32], sizes = [8, 32], strides = [1, 1]} : vector<8x128xf32> to vector<8x32xf32>
    %379 = vector.extract_strided_slice %376 {offsets = [0, 64], sizes = [8, 32], strides = [1, 1]} : vector<8x128xf32> to vector<8x32xf32>
    %380 = vector.extract_strided_slice %375 {offsets = [0, 96], sizes = [8, 32], strides = [1, 1]} : vector<8x128xf32> to vector<8x32xf32>
    %381 = arith.mulf %378, %370 : vector<8x32xf32>
    %382 = arith.mulf %377, %379 : vector<8x32xf32>
    %383 = arith.addf %381, %382 : vector<8x32xf32>
    %384 = math.tanh %383 : vector<8x32xf32>
    %385 = arith.mulf %380, %384 : vector<8x32xf32>
    %386 = vector.broadcast %c4_i32 : i32 to vector<8x1xi32>
    %387 = arith.cmpi slt, %386, %21 : vector<8x1xi32>
    %388 = vector.broadcast %339 : i32 to vector<8x1xi32>
    %389 = arith.cmpi slt, %388, %21 : vector<8x1xi32>
    %390 = vector.extract_strided_slice %340 {offsets = [0, 0], sizes = [8, 32], strides = [1, 1]} : vector<8x64xf32> to vector<8x32xf32>
    %391 = vector.shape_cast %387 : vector<8x1xi1> to vector<8x1xi1>
    %392 = vector.broadcast %391 : vector<8x1xi1> to vector<8x32xi1>
    %393 = arith.select %392, %369, %390 : vector<8x32xi1>, vector<8x32xf32>
    %394 = vector.extract_strided_slice %341 {offsets = [0, 0], sizes = [8, 32], strides = [1, 1]} : vector<8x64xf32> to vector<8x32xf32>
    %395 = vector.shape_cast %387 : vector<8x1xi1> to vector<8x1xi1>
    %396 = vector.broadcast %395 : vector<8x1xi1> to vector<8x32xi1>
    %397 = arith.select %396, %367, %394 : vector<8x32xi1>, vector<8x32xf32>
    %398 = vector.extract_strided_slice %340 {offsets = [0, 32], sizes = [8, 32], strides = [1, 1]} : vector<8x64xf32> to vector<8x32xf32>
    %399 = vector.shape_cast %389 : vector<8x1xi1> to vector<8x1xi1>
    %400 = vector.broadcast %399 : vector<8x1xi1> to vector<8x32xi1>
    %401 = arith.select %400, %385, %398 : vector<8x32xi1>, vector<8x32xf32>
    %402 = vector.extract_strided_slice %341 {offsets = [0, 32], sizes = [8, 32], strides = [1, 1]} : vector<8x64xf32> to vector<8x32xf32>
    %403 = vector.shape_cast %389 : vector<8x1xi1> to vector<8x1xi1>
    %404 = vector.broadcast %403 : vector<8x1xi1> to vector<8x32xi1>
    %405 = arith.select %404, %383, %402 : vector<8x32xi1>, vector<8x32xf32>
    %c0_135 = arith.constant 0 : index
    %c0_136 = arith.constant 0 : index
    %406 = vector.load %arg12[%c0_135, %c0_136] : memref<8x64xf32, #tpu.memory_space<vmem>>, vector<8x32xf32>
    tpu.vector_store %arg12[%c0_135, %c0_136], %393 {strides = array<i32>} : memref<8x64xf32, #tpu.memory_space<vmem>>, vector<8x32xf32>,
    %c0_137 = arith.constant 0 : index
    %c32_138 = arith.constant 32 : index
    %407 = vector.load %arg12[%c0_137, %c32_138] : memref<8x64xf32, #tpu.memory_space<vmem>>, vector<8x32xf32>
    tpu.vector_store %arg12[%c0_137, %c32_138], %401 {strides = array<i32>} : memref<8x64xf32, #tpu.memory_space<vmem>>, vector<8x32xf32>,
    %c0_139 = arith.constant 0 : index
    %c0_140 = arith.constant 0 : index
    %408 = vector.load %arg13[%c0_139, %c0_140] : memref<8x64xf32, #tpu.memory_space<vmem>>, vector<8x32xf32>
    tpu.vector_store %arg13[%c0_139, %c0_140], %397 {strides = array<i32>} : memref<8x64xf32, #tpu.memory_space<vmem>>, vector<8x32xf32>,
    %c0_141 = arith.constant 0 : index
    %c32_142 = arith.constant 32 : index
    %409 = vector.load %arg13[%c0_141, %c32_142] : memref<8x64xf32, #tpu.memory_space<vmem>>, vector<8x32xf32>
    tpu.vector_store %arg13[%c0_141, %c32_142], %405 {strides = array<i32>} : memref<8x64xf32, #tpu.memory_space<vmem>>, vector<8x32xf32>,
    %410 = arith.index_cast %c4_i32 : i32 to index
    %c0_143 = arith.constant 0 : index
    %c0_144 = arith.constant 0 : index
    %411 = vector.load %arg9[%410, %c0_143, %c0_144] : memref<8x8x64xf32, #tpu.memory_space<vmem>>, vector<1x8x32xf32>
    %412 = vector.shape_cast %411 : vector<1x8x32xf32> to vector<8x32xf32>
    %413 = vector.shape_cast %393 : vector<8x32xf32> to vector<1x8x32xf32>
    tpu.vector_store %arg9[%410, %c0_143, %c0_144], %413 {strides = array<i32>} : memref<8x8x64xf32, #tpu.memory_space<vmem>>, vector<1x8x32xf32>,
    %414 = arith.index_cast %339 : i32 to index
    %c0_145 = arith.constant 0 : index
    %c32_146 = arith.constant 32 : index
    %415 = vector.load %arg9[%414, %c0_145, %c32_146] : memref<8x8x64xf32, #tpu.memory_space<vmem>>, vector<1x8x32xf32>
    %416 = vector.shape_cast %415 : vector<1x8x32xf32> to vector<8x32xf32>
    %417 = vector.shape_cast %401 : vector<8x32xf32> to vector<1x8x32xf32>
    tpu.vector_store %arg9[%414, %c0_145, %c32_146], %417 {strides = array<i32>} : memref<8x8x64xf32, #tpu.memory_space<vmem>>, vector<1x8x32xf32>,
    %c5_i32 = arith.constant 5 : i32
    %c7_i32_147 = arith.constant 7 : i32
    %418 = arith.subi %c7_i32_147, %c5_i32 : i32
    %c0_148 = arith.constant 0 : index
    %c0_149 = arith.constant 0 : index
    %419 = vector.load %arg12[%c0_148, %c0_149] : memref<8x64xf32, #tpu.memory_space<vmem>>, vector<8x64xf32>
    %c0_150 = arith.constant 0 : index
    %c0_151 = arith.constant 0 : index
    %420 = vector.load %arg13[%c0_150, %c0_151] : memref<8x64xf32, #tpu.memory_space<vmem>>, vector<8x64xf32>
    %421 = arith.truncf %419 : vector<8x64xf32> to vector<8x64xbf16>
    %cst_152 = arith.constant dense<0.000000e+00> : vector<8x256xf32>
    %422 = tpu.matmul %421, %22, %cst_152 {dimension_numbers = #tpu.dot_dimension_numbers<[1], [0], [0], [1], [0, 0, 1, 1], [], []>} : vector<8x64xbf16>, vector<64x256xbf16>, vector<8x256xf32> -> vector<8x256xf32>
    %423 = vector.extract_strided_slice %422 {offsets = [0, 0], sizes = [8, 128], strides = [1, 1]} : vector<8x256xf32> to vector<8x128xf32>
    %424 = arith.index_cast %c5_i32 : i32 to index
    %c0_153 = arith.constant 0 : index
    %c0_154 = arith.constant 0 : index
    %425 = vector.load %arg10[%424, %c0_153, %c0_154] : memref<8x8x128xf32, #tpu.memory_space<vmem>>, vector<1x8x128xf32>
    %426 = vector.shape_cast %425 : vector<1x8x128xf32> to vector<8x128xf32>
    %427 = arith.addf %423, %426 : vector<8x128xf32>
    %428 = vector.extract_strided_slice %422 {offsets = [0, 128], sizes = [8, 128], strides = [1, 1]} : vector<8x256xf32> to vector<8x128xf32>
    %429 = arith.index_cast %418 : i32 to index
    %c0_155 = arith.constant 0 : index
    %c0_156 = arith.constant 0 : index
    %430 = vector.load %arg11[%429, %c0_155, %c0_156] : memref<8x8x128xf32, #tpu.memory_space<vmem>>, vector<1x8x128xf32>
    %431 = vector.shape_cast %430 : vector<1x8x128xf32> to vector<8x128xf32>
    %432 = arith.addf %428, %431 : vector<8x128xf32>
    %433 = vector.extract_strided_slice %420 {offsets = [0, 0], sizes = [8, 32], strides = [1, 1]} : vector<8x64xf32> to vector<8x32xf32>
    %434 = arith.negf %427 : vector<8x128xf32>
    %435 = math.exp %434 : vector<8x128xf32>
    %cst_157 = arith.constant 1.000000e+00 : f32
    %436 = vector.broadcast %cst_157 : f32 to vector<8x128xf32>
    %437 = arith.addf %436, %435 : vector<8x128xf32>
    %438 = arith.divf %436, %437 : vector<8x128xf32>
    %439 = math.tanh %427 : vector<8x128xf32>
    %440 = vector.extract_strided_slice %438 {offsets = [0, 0], sizes = [8, 32], strides = [1, 1]} : vector<8x128xf32> to vector<8x32xf32>
    %441 = vector.extract_strided_slice %438 {offsets = [0, 32], sizes = [8, 32], strides = [1, 1]} : vector<8x128xf32> to vector<8x32xf32>
    %442 = vector.extract_strided_slice %439 {offsets = [0, 64], sizes = [8, 32], strides = [1, 1]} : vector<8x128xf32> to vector<8x32xf32>
    %443 = vector.extract_strided_slice %438 {offsets = [0, 96], sizes = [8, 32], strides = [1, 1]} : vector<8x128xf32> to vector<8x32xf32>
    %444 = arith.mulf %441, %433 : vector<8x32xf32>
    %445 = arith.mulf %440, %442 : vector<8x32xf32>
    %446 = arith.addf %444, %445 : vector<8x32xf32>
    %447 = math.tanh %446 : vector<8x32xf32>
    %448 = arith.mulf %443, %447 : vector<8x32xf32>
    %449 = vector.extract_strided_slice %420 {offsets = [0, 32], sizes = [8, 32], strides = [1, 1]} : vector<8x64xf32> to vector<8x32xf32>
    %450 = arith.negf %432 : vector<8x128xf32>
    %451 = math.exp %450 : vector<8x128xf32>
    %cst_158 = arith.constant 1.000000e+00 : f32
    %452 = vector.broadcast %cst_158 : f32 to vector<8x128xf32>
    %453 = arith.addf %452, %451 : vector<8x128xf32>
    %454 = arith.divf %452, %453 : vector<8x128xf32>
    %455 = math.tanh %432 : vector<8x128xf32>
    %456 = vector.extract_strided_slice %454 {offsets = [0, 0], sizes = [8, 32], strides = [1, 1]} : vector<8x128xf32> to vector<8x32xf32>
    %457 = vector.extract_strided_slice %454 {offsets = [0, 32], sizes = [8, 32], strides = [1, 1]} : vector<8x128xf32> to vector<8x32xf32>
    %458 = vector.extract_strided_slice %455 {offsets = [0, 64], sizes = [8, 32], strides = [1, 1]} : vector<8x128xf32> to vector<8x32xf32>
    %459 = vector.extract_strided_slice %454 {offsets = [0, 96], sizes = [8, 32], strides = [1, 1]} : vector<8x128xf32> to vector<8x32xf32>
    %460 = arith.mulf %457, %449 : vector<8x32xf32>
    %461 = arith.mulf %456, %458 : vector<8x32xf32>
    %462 = arith.addf %460, %461 : vector<8x32xf32>
    %463 = math.tanh %462 : vector<8x32xf32>
    %464 = arith.mulf %459, %463 : vector<8x32xf32>
    %465 = vector.broadcast %c5_i32 : i32 to vector<8x1xi32>
    %466 = arith.cmpi slt, %465, %21 : vector<8x1xi32>
    %467 = vector.broadcast %418 : i32 to vector<8x1xi32>
    %468 = arith.cmpi slt, %467, %21 : vector<8x1xi32>
    %469 = vector.extract_strided_slice %419 {offsets = [0, 0], sizes = [8, 32], strides = [1, 1]} : vector<8x64xf32> to vector<8x32xf32>
    %470 = vector.shape_cast %466 : vector<8x1xi1> to vector<8x1xi1>
    %471 = vector.broadcast %470 : vector<8x1xi1> to vector<8x32xi1>
    %472 = arith.select %471, %448, %469 : vector<8x32xi1>, vector<8x32xf32>
    %473 = vector.extract_strided_slice %420 {offsets = [0, 0], sizes = [8, 32], strides = [1, 1]} : vector<8x64xf32> to vector<8x32xf32>
    %474 = vector.shape_cast %466 : vector<8x1xi1> to vector<8x1xi1>
    %475 = vector.broadcast %474 : vector<8x1xi1> to vector<8x32xi1>
    %476 = arith.select %475, %446, %473 : vector<8x32xi1>, vector<8x32xf32>
    %477 = vector.extract_strided_slice %419 {offsets = [0, 32], sizes = [8, 32], strides = [1, 1]} : vector<8x64xf32> to vector<8x32xf32>
    %478 = vector.shape_cast %468 : vector<8x1xi1> to vector<8x1xi1>
    %479 = vector.broadcast %478 : vector<8x1xi1> to vector<8x32xi1>
    %480 = arith.select %479, %464, %477 : vector<8x32xi1>, vector<8x32xf32>
    %481 = vector.extract_strided_slice %420 {offsets = [0, 32], sizes = [8, 32], strides = [1, 1]} : vector<8x64xf32> to vector<8x32xf32>
    %482 = vector.shape_cast %468 : vector<8x1xi1> to vector<8x1xi1>
    %483 = vector.broadcast %482 : vector<8x1xi1> to vector<8x32xi1>
    %484 = arith.select %483, %462, %481 : vector<8x32xi1>, vector<8x32xf32>
    %c0_159 = arith.constant 0 : index
    %c0_160 = arith.constant 0 : index
    %485 = vector.load %arg12[%c0_159, %c0_160] : memref<8x64xf32, #tpu.memory_space<vmem>>, vector<8x32xf32>
    tpu.vector_store %arg12[%c0_159, %c0_160], %472 {strides = array<i32>} : memref<8x64xf32, #tpu.memory_space<vmem>>, vector<8x32xf32>,
    %c0_161 = arith.constant 0 : index
    %c32_162 = arith.constant 32 : index
    %486 = vector.load %arg12[%c0_161, %c32_162] : memref<8x64xf32, #tpu.memory_space<vmem>>, vector<8x32xf32>
    tpu.vector_store %arg12[%c0_161, %c32_162], %480 {strides = array<i32>} : memref<8x64xf32, #tpu.memory_space<vmem>>, vector<8x32xf32>,
    %c0_163 = arith.constant 0 : index
    %c0_164 = arith.constant 0 : index
    %487 = vector.load %arg13[%c0_163, %c0_164] : memref<8x64xf32, #tpu.memory_space<vmem>>, vector<8x32xf32>
    tpu.vector_store %arg13[%c0_163, %c0_164], %476 {strides = array<i32>} : memref<8x64xf32, #tpu.memory_space<vmem>>, vector<8x32xf32>,
    %c0_165 = arith.constant 0 : index
    %c32_166 = arith.constant 32 : index
    %488 = vector.load %arg13[%c0_165, %c32_166] : memref<8x64xf32, #tpu.memory_space<vmem>>, vector<8x32xf32>
    tpu.vector_store %arg13[%c0_165, %c32_166], %484 {strides = array<i32>} : memref<8x64xf32, #tpu.memory_space<vmem>>, vector<8x32xf32>,
    %489 = arith.index_cast %c5_i32 : i32 to index
    %c0_167 = arith.constant 0 : index
    %c0_168 = arith.constant 0 : index
    %490 = vector.load %arg9[%489, %c0_167, %c0_168] : memref<8x8x64xf32, #tpu.memory_space<vmem>>, vector<1x8x32xf32>
    %491 = vector.shape_cast %490 : vector<1x8x32xf32> to vector<8x32xf32>
    %492 = vector.shape_cast %472 : vector<8x32xf32> to vector<1x8x32xf32>
    tpu.vector_store %arg9[%489, %c0_167, %c0_168], %492 {strides = array<i32>} : memref<8x8x64xf32, #tpu.memory_space<vmem>>, vector<1x8x32xf32>,
    %493 = arith.index_cast %418 : i32 to index
    %c0_169 = arith.constant 0 : index
    %c32_170 = arith.constant 32 : index
    %494 = vector.load %arg9[%493, %c0_169, %c32_170] : memref<8x8x64xf32, #tpu.memory_space<vmem>>, vector<1x8x32xf32>
    %495 = vector.shape_cast %494 : vector<1x8x32xf32> to vector<8x32xf32>
    %496 = vector.shape_cast %480 : vector<8x32xf32> to vector<1x8x32xf32>
    tpu.vector_store %arg9[%493, %c0_169, %c32_170], %496 {strides = array<i32>} : memref<8x8x64xf32, #tpu.memory_space<vmem>>, vector<1x8x32xf32>,
    %c6_i32 = arith.constant 6 : i32
    %c7_i32_171 = arith.constant 7 : i32
    %497 = arith.subi %c7_i32_171, %c6_i32 : i32
    %c0_172 = arith.constant 0 : index
    %c0_173 = arith.constant 0 : index
    %498 = vector.load %arg12[%c0_172, %c0_173] : memref<8x64xf32, #tpu.memory_space<vmem>>, vector<8x64xf32>
    %c0_174 = arith.constant 0 : index
    %c0_175 = arith.constant 0 : index
    %499 = vector.load %arg13[%c0_174, %c0_175] : memref<8x64xf32, #tpu.memory_space<vmem>>, vector<8x64xf32>
    %500 = arith.truncf %498 : vector<8x64xf32> to vector<8x64xbf16>
    %cst_176 = arith.constant dense<0.000000e+00> : vector<8x256xf32>
    %501 = tpu.matmul %500, %22, %cst_176 {dimension_numbers = #tpu.dot_dimension_numbers<[1], [0], [0], [1], [0, 0, 1, 1], [], []>} : vector<8x64xbf16>, vector<64x256xbf16>, vector<8x256xf32> -> vector<8x256xf32>
    %502 = vector.extract_strided_slice %501 {offsets = [0, 0], sizes = [8, 128], strides = [1, 1]} : vector<8x256xf32> to vector<8x128xf32>
    %503 = arith.index_cast %c6_i32 : i32 to index
    %c0_177 = arith.constant 0 : index
    %c0_178 = arith.constant 0 : index
    %504 = vector.load %arg10[%503, %c0_177, %c0_178] : memref<8x8x128xf32, #tpu.memory_space<vmem>>, vector<1x8x128xf32>
    %505 = vector.shape_cast %504 : vector<1x8x128xf32> to vector<8x128xf32>
    %506 = arith.addf %502, %505 : vector<8x128xf32>
    %507 = vector.extract_strided_slice %501 {offsets = [0, 128], sizes = [8, 128], strides = [1, 1]} : vector<8x256xf32> to vector<8x128xf32>
    %508 = arith.index_cast %497 : i32 to index
    %c0_179 = arith.constant 0 : index
    %c0_180 = arith.constant 0 : index
    %509 = vector.load %arg11[%508, %c0_179, %c0_180] : memref<8x8x128xf32, #tpu.memory_space<vmem>>, vector<1x8x128xf32>
    %510 = vector.shape_cast %509 : vector<1x8x128xf32> to vector<8x128xf32>
    %511 = arith.addf %507, %510 : vector<8x128xf32>
    %512 = vector.extract_strided_slice %499 {offsets = [0, 0], sizes = [8, 32], strides = [1, 1]} : vector<8x64xf32> to vector<8x32xf32>
    %513 = arith.negf %506 : vector<8x128xf32>
    %514 = math.exp %513 : vector<8x128xf32>
    %cst_181 = arith.constant 1.000000e+00 : f32
    %515 = vector.broadcast %cst_181 : f32 to vector<8x128xf32>
    %516 = arith.addf %515, %514 : vector<8x128xf32>
    %517 = arith.divf %515, %516 : vector<8x128xf32>
    %518 = math.tanh %506 : vector<8x128xf32>
    %519 = vector.extract_strided_slice %517 {offsets = [0, 0], sizes = [8, 32], strides = [1, 1]} : vector<8x128xf32> to vector<8x32xf32>
    %520 = vector.extract_strided_slice %517 {offsets = [0, 32], sizes = [8, 32], strides = [1, 1]} : vector<8x128xf32> to vector<8x32xf32>
    %521 = vector.extract_strided_slice %518 {offsets = [0, 64], sizes = [8, 32], strides = [1, 1]} : vector<8x128xf32> to vector<8x32xf32>
    %522 = vector.extract_strided_slice %517 {offsets = [0, 96], sizes = [8, 32], strides = [1, 1]} : vector<8x128xf32> to vector<8x32xf32>
    %523 = arith.mulf %520, %512 : vector<8x32xf32>
    %524 = arith.mulf %519, %521 : vector<8x32xf32>
    %525 = arith.addf %523, %524 : vector<8x32xf32>
    %526 = math.tanh %525 : vector<8x32xf32>
    %527 = arith.mulf %522, %526 : vector<8x32xf32>
    %528 = vector.extract_strided_slice %499 {offsets = [0, 32], sizes = [8, 32], strides = [1, 1]} : vector<8x64xf32> to vector<8x32xf32>
    %529 = arith.negf %511 : vector<8x128xf32>
    %530 = math.exp %529 : vector<8x128xf32>
    %cst_182 = arith.constant 1.000000e+00 : f32
    %531 = vector.broadcast %cst_182 : f32 to vector<8x128xf32>
    %532 = arith.addf %531, %530 : vector<8x128xf32>
    %533 = arith.divf %531, %532 : vector<8x128xf32>
    %534 = math.tanh %511 : vector<8x128xf32>
    %535 = vector.extract_strided_slice %533 {offsets = [0, 0], sizes = [8, 32], strides = [1, 1]} : vector<8x128xf32> to vector<8x32xf32>
    %536 = vector.extract_strided_slice %533 {offsets = [0, 32], sizes = [8, 32], strides = [1, 1]} : vector<8x128xf32> to vector<8x32xf32>
    %537 = vector.extract_strided_slice %534 {offsets = [0, 64], sizes = [8, 32], strides = [1, 1]} : vector<8x128xf32> to vector<8x32xf32>
    %538 = vector.extract_strided_slice %533 {offsets = [0, 96], sizes = [8, 32], strides = [1, 1]} : vector<8x128xf32> to vector<8x32xf32>
    %539 = arith.mulf %536, %528 : vector<8x32xf32>
    %540 = arith.mulf %535, %537 : vector<8x32xf32>
    %541 = arith.addf %539, %540 : vector<8x32xf32>
    %542 = math.tanh %541 : vector<8x32xf32>
    %543 = arith.mulf %538, %542 : vector<8x32xf32>
    %544 = vector.broadcast %c6_i32 : i32 to vector<8x1xi32>
    %545 = arith.cmpi slt, %544, %21 : vector<8x1xi32>
    %546 = vector.broadcast %497 : i32 to vector<8x1xi32>
    %547 = arith.cmpi slt, %546, %21 : vector<8x1xi32>
    %548 = vector.extract_strided_slice %498 {offsets = [0, 0], sizes = [8, 32], strides = [1, 1]} : vector<8x64xf32> to vector<8x32xf32>
    %549 = vector.shape_cast %545 : vector<8x1xi1> to vector<8x1xi1>
    %550 = vector.broadcast %549 : vector<8x1xi1> to vector<8x32xi1>
    %551 = arith.select %550, %527, %548 : vector<8x32xi1>, vector<8x32xf32>
    %552 = vector.extract_strided_slice %499 {offsets = [0, 0], sizes = [8, 32], strides = [1, 1]} : vector<8x64xf32> to vector<8x32xf32>
    %553 = vector.shape_cast %545 : vector<8x1xi1> to vector<8x1xi1>
    %554 = vector.broadcast %553 : vector<8x1xi1> to vector<8x32xi1>
    %555 = arith.select %554, %525, %552 : vector<8x32xi1>, vector<8x32xf32>
    %556 = vector.extract_strided_slice %498 {offsets = [0, 32], sizes = [8, 32], strides = [1, 1]} : vector<8x64xf32> to vector<8x32xf32>
    %557 = vector.shape_cast %547 : vector<8x1xi1> to vector<8x1xi1>
    %558 = vector.broadcast %557 : vector<8x1xi1> to vector<8x32xi1>
    %559 = arith.select %558, %543, %556 : vector<8x32xi1>, vector<8x32xf32>
    %560 = vector.extract_strided_slice %499 {offsets = [0, 32], sizes = [8, 32], strides = [1, 1]} : vector<8x64xf32> to vector<8x32xf32>
    %561 = vector.shape_cast %547 : vector<8x1xi1> to vector<8x1xi1>
    %562 = vector.broadcast %561 : vector<8x1xi1> to vector<8x32xi1>
    %563 = arith.select %562, %541, %560 : vector<8x32xi1>, vector<8x32xf32>
    %c0_183 = arith.constant 0 : index
    %c0_184 = arith.constant 0 : index
    %564 = vector.load %arg12[%c0_183, %c0_184] : memref<8x64xf32, #tpu.memory_space<vmem>>, vector<8x32xf32>
    tpu.vector_store %arg12[%c0_183, %c0_184], %551 {strides = array<i32>} : memref<8x64xf32, #tpu.memory_space<vmem>>, vector<8x32xf32>,
    %c0_185 = arith.constant 0 : index
    %c32_186 = arith.constant 32 : index
    %565 = vector.load %arg12[%c0_185, %c32_186] : memref<8x64xf32, #tpu.memory_space<vmem>>, vector<8x32xf32>
    tpu.vector_store %arg12[%c0_185, %c32_186], %559 {strides = array<i32>} : memref<8x64xf32, #tpu.memory_space<vmem>>, vector<8x32xf32>,
    %c0_187 = arith.constant 0 : index
    %c0_188 = arith.constant 0 : index
    %566 = vector.load %arg13[%c0_187, %c0_188] : memref<8x64xf32, #tpu.memory_space<vmem>>, vector<8x32xf32>
    tpu.vector_store %arg13[%c0_187, %c0_188], %555 {strides = array<i32>} : memref<8x64xf32, #tpu.memory_space<vmem>>, vector<8x32xf32>,
    %c0_189 = arith.constant 0 : index
    %c32_190 = arith.constant 32 : index
    %567 = vector.load %arg13[%c0_189, %c32_190] : memref<8x64xf32, #tpu.memory_space<vmem>>, vector<8x32xf32>
    tpu.vector_store %arg13[%c0_189, %c32_190], %563 {strides = array<i32>} : memref<8x64xf32, #tpu.memory_space<vmem>>, vector<8x32xf32>,
    %568 = arith.index_cast %c6_i32 : i32 to index
    %c0_191 = arith.constant 0 : index
    %c0_192 = arith.constant 0 : index
    %569 = vector.load %arg9[%568, %c0_191, %c0_192] : memref<8x8x64xf32, #tpu.memory_space<vmem>>, vector<1x8x32xf32>
    %570 = vector.shape_cast %569 : vector<1x8x32xf32> to vector<8x32xf32>
    %571 = vector.shape_cast %551 : vector<8x32xf32> to vector<1x8x32xf32>
    tpu.vector_store %arg9[%568, %c0_191, %c0_192], %571 {strides = array<i32>} : memref<8x8x64xf32, #tpu.memory_space<vmem>>, vector<1x8x32xf32>,
    %572 = arith.index_cast %497 : i32 to index
    %c0_193 = arith.constant 0 : index
    %c32_194 = arith.constant 32 : index
    %573 = vector.load %arg9[%572, %c0_193, %c32_194] : memref<8x8x64xf32, #tpu.memory_space<vmem>>, vector<1x8x32xf32>
    %574 = vector.shape_cast %573 : vector<1x8x32xf32> to vector<8x32xf32>
    %575 = vector.shape_cast %559 : vector<8x32xf32> to vector<1x8x32xf32>
    tpu.vector_store %arg9[%572, %c0_193, %c32_194], %575 {strides = array<i32>} : memref<8x8x64xf32, #tpu.memory_space<vmem>>, vector<1x8x32xf32>,
    %c7_i32_195 = arith.constant 7 : i32
    %c7_i32_196 = arith.constant 7 : i32
    %576 = arith.subi %c7_i32_196, %c7_i32_195 : i32
    %c0_197 = arith.constant 0 : index
    %c0_198 = arith.constant 0 : index
    %577 = vector.load %arg12[%c0_197, %c0_198] : memref<8x64xf32, #tpu.memory_space<vmem>>, vector<8x64xf32>
    %c0_199 = arith.constant 0 : index
    %c0_200 = arith.constant 0 : index
    %578 = vector.load %arg13[%c0_199, %c0_200] : memref<8x64xf32, #tpu.memory_space<vmem>>, vector<8x64xf32>
    %579 = arith.truncf %577 : vector<8x64xf32> to vector<8x64xbf16>
    %cst_201 = arith.constant dense<0.000000e+00> : vector<8x256xf32>
    %580 = tpu.matmul %579, %22, %cst_201 {dimension_numbers = #tpu.dot_dimension_numbers<[1], [0], [0], [1], [0, 0, 1, 1], [], []>} : vector<8x64xbf16>, vector<64x256xbf16>, vector<8x256xf32> -> vector<8x256xf32>
    %581 = vector.extract_strided_slice %580 {offsets = [0, 0], sizes = [8, 128], strides = [1, 1]} : vector<8x256xf32> to vector<8x128xf32>
    %582 = arith.index_cast %c7_i32_195 : i32 to index
    %c0_202 = arith.constant 0 : index
    %c0_203 = arith.constant 0 : index
    %583 = vector.load %arg10[%582, %c0_202, %c0_203] : memref<8x8x128xf32, #tpu.memory_space<vmem>>, vector<1x8x128xf32>
    %584 = vector.shape_cast %583 : vector<1x8x128xf32> to vector<8x128xf32>
    %585 = arith.addf %581, %584 : vector<8x128xf32>
    %586 = vector.extract_strided_slice %580 {offsets = [0, 128], sizes = [8, 128], strides = [1, 1]} : vector<8x256xf32> to vector<8x128xf32>
    %587 = arith.index_cast %576 : i32 to index
    %c0_204 = arith.constant 0 : index
    %c0_205 = arith.constant 0 : index
    %588 = vector.load %arg11[%587, %c0_204, %c0_205] : memref<8x8x128xf32, #tpu.memory_space<vmem>>, vector<1x8x128xf32>
    %589 = vector.shape_cast %588 : vector<1x8x128xf32> to vector<8x128xf32>
    %590 = arith.addf %586, %589 : vector<8x128xf32>
    %591 = vector.extract_strided_slice %578 {offsets = [0, 0], sizes = [8, 32], strides = [1, 1]} : vector<8x64xf32> to vector<8x32xf32>
    %592 = arith.negf %585 : vector<8x128xf32>
    %593 = math.exp %592 : vector<8x128xf32>
    %cst_206 = arith.constant 1.000000e+00 : f32
    %594 = vector.broadcast %cst_206 : f32 to vector<8x128xf32>
    %595 = arith.addf %594, %593 : vector<8x128xf32>
    %596 = arith.divf %594, %595 : vector<8x128xf32>
    %597 = math.tanh %585 : vector<8x128xf32>
    %598 = vector.extract_strided_slice %596 {offsets = [0, 0], sizes = [8, 32], strides = [1, 1]} : vector<8x128xf32> to vector<8x32xf32>
    %599 = vector.extract_strided_slice %596 {offsets = [0, 32], sizes = [8, 32], strides = [1, 1]} : vector<8x128xf32> to vector<8x32xf32>
    %600 = vector.extract_strided_slice %597 {offsets = [0, 64], sizes = [8, 32], strides = [1, 1]} : vector<8x128xf32> to vector<8x32xf32>
    %601 = vector.extract_strided_slice %596 {offsets = [0, 96], sizes = [8, 32], strides = [1, 1]} : vector<8x128xf32> to vector<8x32xf32>
    %602 = arith.mulf %599, %591 : vector<8x32xf32>
    %603 = arith.mulf %598, %600 : vector<8x32xf32>
    %604 = arith.addf %602, %603 : vector<8x32xf32>
    %605 = math.tanh %604 : vector<8x32xf32>
    %606 = arith.mulf %601, %605 : vector<8x32xf32>
    %607 = vector.extract_strided_slice %578 {offsets = [0, 32], sizes = [8, 32], strides = [1, 1]} : vector<8x64xf32> to vector<8x32xf32>
    %608 = arith.negf %590 : vector<8x128xf32>
    %609 = math.exp %608 : vector<8x128xf32>
    %cst_207 = arith.constant 1.000000e+00 : f32
    %610 = vector.broadcast %cst_207 : f32 to vector<8x128xf32>
    %611 = arith.addf %610, %609 : vector<8x128xf32>
    %612 = arith.divf %610, %611 : vector<8x128xf32>
    %613 = math.tanh %590 : vector<8x128xf32>
    %614 = vector.extract_strided_slice %612 {offsets = [0, 0], sizes = [8, 32], strides = [1, 1]} : vector<8x128xf32> to vector<8x32xf32>
    %615 = vector.extract_strided_slice %612 {offsets = [0, 32], sizes = [8, 32], strides = [1, 1]} : vector<8x128xf32> to vector<8x32xf32>
    %616 = vector.extract_strided_slice %613 {offsets = [0, 64], sizes = [8, 32], strides = [1, 1]} : vector<8x128xf32> to vector<8x32xf32>
    %617 = vector.extract_strided_slice %612 {offsets = [0, 96], sizes = [8, 32], strides = [1, 1]} : vector<8x128xf32> to vector<8x32xf32>
    %618 = arith.mulf %615, %607 : vector<8x32xf32>
    %619 = arith.mulf %614, %616 : vector<8x32xf32>
    %620 = arith.addf %618, %619 : vector<8x32xf32>
    %621 = math.tanh %620 : vector<8x32xf32>
    %622 = arith.mulf %617, %621 : vector<8x32xf32>
    %623 = vector.broadcast %c7_i32_195 : i32 to vector<8x1xi32>
    %624 = arith.cmpi slt, %623, %21 : vector<8x1xi32>
    %625 = vector.broadcast %576 : i32 to vector<8x1xi32>
    %626 = arith.cmpi slt, %625, %21 : vector<8x1xi32>
    %627 = vector.extract_strided_slice %577 {offsets = [0, 0], sizes = [8, 32], strides = [1, 1]} : vector<8x64xf32> to vector<8x32xf32>
    %628 = vector.shape_cast %624 : vector<8x1xi1> to vector<8x1xi1>
    %629 = vector.broadcast %628 : vector<8x1xi1> to vector<8x32xi1>
    %630 = arith.select %629, %606, %627 : vector<8x32xi1>, vector<8x32xf32>
    %631 = vector.extract_strided_slice %578 {offsets = [0, 0], sizes = [8, 32], strides = [1, 1]} : vector<8x64xf32> to vector<8x32xf32>
    %632 = vector.shape_cast %624 : vector<8x1xi1> to vector<8x1xi1>
    %633 = vector.broadcast %632 : vector<8x1xi1> to vector<8x32xi1>
    %634 = arith.select %633, %604, %631 : vector<8x32xi1>, vector<8x32xf32>
    %635 = vector.extract_strided_slice %577 {offsets = [0, 32], sizes = [8, 32], strides = [1, 1]} : vector<8x64xf32> to vector<8x32xf32>
    %636 = vector.shape_cast %626 : vector<8x1xi1> to vector<8x1xi1>
    %637 = vector.broadcast %636 : vector<8x1xi1> to vector<8x32xi1>
    %638 = arith.select %637, %622, %635 : vector<8x32xi1>, vector<8x32xf32>
    %639 = vector.extract_strided_slice %578 {offsets = [0, 32], sizes = [8, 32], strides = [1, 1]} : vector<8x64xf32> to vector<8x32xf32>
    %640 = vector.shape_cast %626 : vector<8x1xi1> to vector<8x1xi1>
    %641 = vector.broadcast %640 : vector<8x1xi1> to vector<8x32xi1>
    %642 = arith.select %641, %620, %639 : vector<8x32xi1>, vector<8x32xf32>
    %c0_208 = arith.constant 0 : index
    %c0_209 = arith.constant 0 : index
    %643 = vector.load %arg12[%c0_208, %c0_209] : memref<8x64xf32, #tpu.memory_space<vmem>>, vector<8x32xf32>
    tpu.vector_store %arg12[%c0_208, %c0_209], %630 {strides = array<i32>} : memref<8x64xf32, #tpu.memory_space<vmem>>, vector<8x32xf32>,
    %c0_210 = arith.constant 0 : index
    %c32_211 = arith.constant 32 : index
    %644 = vector.load %arg12[%c0_210, %c32_211] : memref<8x64xf32, #tpu.memory_space<vmem>>, vector<8x32xf32>
    tpu.vector_store %arg12[%c0_210, %c32_211], %638 {strides = array<i32>} : memref<8x64xf32, #tpu.memory_space<vmem>>, vector<8x32xf32>,
    %c0_212 = arith.constant 0 : index
    %c0_213 = arith.constant 0 : index
    %645 = vector.load %arg13[%c0_212, %c0_213] : memref<8x64xf32, #tpu.memory_space<vmem>>, vector<8x32xf32>
    tpu.vector_store %arg13[%c0_212, %c0_213], %634 {strides = array<i32>} : memref<8x64xf32, #tpu.memory_space<vmem>>, vector<8x32xf32>,
    %c0_214 = arith.constant 0 : index
    %c32_215 = arith.constant 32 : index
    %646 = vector.load %arg13[%c0_214, %c32_215] : memref<8x64xf32, #tpu.memory_space<vmem>>, vector<8x32xf32>
    tpu.vector_store %arg13[%c0_214, %c32_215], %642 {strides = array<i32>} : memref<8x64xf32, #tpu.memory_space<vmem>>, vector<8x32xf32>,
    %647 = arith.index_cast %c7_i32_195 : i32 to index
    %c0_216 = arith.constant 0 : index
    %c0_217 = arith.constant 0 : index
    %648 = vector.load %arg9[%647, %c0_216, %c0_217] : memref<8x8x64xf32, #tpu.memory_space<vmem>>, vector<1x8x32xf32>
    %649 = vector.shape_cast %648 : vector<1x8x32xf32> to vector<8x32xf32>
    %650 = vector.shape_cast %630 : vector<8x32xf32> to vector<1x8x32xf32>
    tpu.vector_store %arg9[%647, %c0_216, %c0_217], %650 {strides = array<i32>} : memref<8x8x64xf32, #tpu.memory_space<vmem>>, vector<1x8x32xf32>,
    %651 = arith.index_cast %576 : i32 to index
    %c0_218 = arith.constant 0 : index
    %c32_219 = arith.constant 32 : index
    %652 = vector.load %arg9[%651, %c0_218, %c32_219] : memref<8x8x64xf32, #tpu.memory_space<vmem>>, vector<1x8x32xf32>
    %653 = vector.shape_cast %652 : vector<1x8x32xf32> to vector<8x32xf32>
    %654 = vector.shape_cast %638 : vector<8x32xf32> to vector<1x8x32xf32>
    tpu.vector_store %arg9[%651, %c0_218, %c32_219], %654 {strides = array<i32>} : memref<8x8x64xf32, #tpu.memory_space<vmem>>, vector<1x8x32xf32>,
    %c8_i32 = arith.constant 8 : i32
    return
  }
}

module attributes {stable_mosaic.version = 11 : i64} {
  func.func @_bilstm_head_kernel(%arg0: memref<8x8x64xf32, #tpu.memory_space<vmem>>, %arg1: memref<8x1xi32, #tpu.memory_space<vmem>>, %arg2: memref<8x64xf32, #tpu.memory_space<vmem>>, %arg3: memref<8x64xf32, #tpu.memory_space<vmem>>, %arg4: memref<64x128xbf16, #tpu.memory_space<vmem>>, %arg5: memref<64x128xbf16, #tpu.memory_space<vmem>>, %arg6: memref<64x256xbf16, #tpu.memory_space<vmem>>, %arg7: memref<1x128xf32, #tpu.memory_space<vmem>>, %arg8: memref<1x128xf32, #tpu.memory_space<vmem>>, %arg9: memref<64x4xf32, #tpu.memory_space<vmem>>, %arg10: memref<1x4xf32, #tpu.memory_space<vmem>>, %arg11: memref<8x4xf32, #tpu.memory_space<vmem>>, %arg12: memref<8x8x128xf32, #tpu.memory_space<vmem>>, %arg13: memref<8x8x128xf32, #tpu.memory_space<vmem>>, %arg14: memref<8x64xf32, #tpu.memory_space<vmem>>, %arg15: memref<8x64xf32, #tpu.memory_space<vmem>>, %arg16: memref<8x32xf32, #tpu.memory_space<vmem>>) attributes {dimension_semantics = [], scalar_prefetch = 0 : i64, scratch_operands = 5 : i64, tpu.core_type = #tpu.core_type<tc>} {
    %c0 = arith.constant 0 : index
    %c0_0 = arith.constant 0 : index
    %0 = vector.load %arg2[%c0, %c0_0] : memref<8x64xf32, #tpu.memory_space<vmem>>, vector<8x64xf32>
    %c0_1 = arith.constant 0 : index
    %c0_2 = arith.constant 0 : index
    %1 = vector.load %arg14[%c0_1, %c0_2] : memref<8x64xf32, #tpu.memory_space<vmem>>, vector<8x64xf32>
    tpu.vector_store %arg14[%c0_1, %c0_2], %0 {strides = array<i32>} : memref<8x64xf32, #tpu.memory_space<vmem>>, vector<8x64xf32>,
    %c0_3 = arith.constant 0 : index
    %c0_4 = arith.constant 0 : index
    %2 = vector.load %arg3[%c0_3, %c0_4] : memref<8x64xf32, #tpu.memory_space<vmem>>, vector<8x64xf32>
    %c0_5 = arith.constant 0 : index
    %c0_6 = arith.constant 0 : index
    %3 = vector.load %arg15[%c0_5, %c0_6] : memref<8x64xf32, #tpu.memory_space<vmem>>, vector<8x64xf32>
    tpu.vector_store %arg15[%c0_5, %c0_6], %2 {strides = array<i32>} : memref<8x64xf32, #tpu.memory_space<vmem>>, vector<8x64xf32>,
    %cst = arith.constant 0.000000e+00 : f32
    %4 = vector.broadcast %cst : f32 to vector<8x32xf32>
    %c0_7 = arith.constant 0 : index
    %c0_8 = arith.constant 0 : index
    %5 = vector.load %arg16[%c0_7, %c0_8] : memref<8x32xf32, #tpu.memory_space<vmem>>, vector<8x32xf32>
    tpu.vector_store %arg16[%c0_7, %c0_8], %4 {strides = array<i32>} : memref<8x32xf32, #tpu.memory_space<vmem>>, vector<8x32xf32>,
    %c0_9 = arith.constant 0 : index
    %c0_10 = arith.constant 0 : index
    %c0_11 = arith.constant 0 : index
    %6 = vector.load %arg0[%c0_9, %c0_10, %c0_11] : memref<8x8x64xf32, #tpu.memory_space<vmem>>, vector<8x8x64xf32>
    %7 = vector.shape_cast %6 : vector<8x8x64xf32> to vector<64x64xf32>
    %8 = arith.truncf %7 : vector<64x64xf32> to vector<64x64xbf16>
    %c0_12 = arith.constant 0 : index
    %c0_13 = arith.constant 0 : index
    %9 = vector.load %arg4[%c0_12, %c0_13] : memref<64x128xbf16, #tpu.memory_space<vmem>>, vector<64x128xbf16>
    %cst_14 = arith.constant dense<0.000000e+00> : vector<64x128xf32>
    %10 = tpu.matmul %8, %9, %cst_14 {dimension_numbers = #tpu.dot_dimension_numbers<[1], [0], [0], [1], [0, 0, 1, 1], [], []>} : vector<64x64xbf16>, vector<64x128xbf16>, vector<64x128xf32> -> vector<64x128xf32>
    %c0_15 = arith.constant 0 : index
    %c0_16 = arith.constant 0 : index
    %11 = vector.load %arg7[%c0_15, %c0_16] : memref<1x128xf32, #tpu.memory_space<vmem>>, vector<1x128xf32>
    %12 = vector.broadcast %11 : vector<1x128xf32> to vector<64x128xf32>
    %13 = arith.addf %10, %12 : vector<64x128xf32>
    %14 = vector.shape_cast %13 : vector<64x128xf32> to vector<8x8x128xf32>
    %c0_17 = arith.constant 0 : index
    %c0_18 = arith.constant 0 : index
    %c0_19 = arith.constant 0 : index
    %15 = vector.load %arg12[%c0_17, %c0_18, %c0_19] : memref<8x8x128xf32, #tpu.memory_space<vmem>>, vector<8x8x128xf32>
    tpu.vector_store %arg12[%c0_17, %c0_18, %c0_19], %14 {strides = array<i32>} : memref<8x8x128xf32, #tpu.memory_space<vmem>>, vector<8x8x128xf32>,
    %c0_20 = arith.constant 0 : index
    %c0_21 = arith.constant 0 : index
    %16 = vector.load %arg5[%c0_20, %c0_21] : memref<64x128xbf16, #tpu.memory_space<vmem>>, vector<64x128xbf16>
    %cst_22 = arith.constant dense<0.000000e+00> : vector<64x128xf32>
    %17 = tpu.matmul %8, %16, %cst_22 {dimension_numbers = #tpu.dot_dimension_numbers<[1], [0], [0], [1], [0, 0, 1, 1], [], []>} : vector<64x64xbf16>, vector<64x128xbf16>, vector<64x128xf32> -> vector<64x128xf32>
    %c0_23 = arith.constant 0 : index
    %c0_24 = arith.constant 0 : index
    %18 = vector.load %arg8[%c0_23, %c0_24] : memref<1x128xf32, #tpu.memory_space<vmem>>, vector<1x128xf32>
    %19 = vector.broadcast %18 : vector<1x128xf32> to vector<64x128xf32>
    %20 = arith.addf %17, %19 : vector<64x128xf32>
    %21 = vector.shape_cast %20 : vector<64x128xf32> to vector<8x8x128xf32>
    %c0_25 = arith.constant 0 : index
    %c0_26 = arith.constant 0 : index
    %c0_27 = arith.constant 0 : index
    %22 = vector.load %arg13[%c0_25, %c0_26, %c0_27] : memref<8x8x128xf32, #tpu.memory_space<vmem>>, vector<8x8x128xf32>
    tpu.vector_store %arg13[%c0_25, %c0_26, %c0_27], %21 {strides = array<i32>} : memref<8x8x128xf32, #tpu.memory_space<vmem>>, vector<8x8x128xf32>,
    %c0_28 = arith.constant 0 : index
    %c0_29 = arith.constant 0 : index
    %23 = vector.load %arg1[%c0_28, %c0_29] : memref<8x1xi32, #tpu.memory_space<vmem>>, vector<8x1xi32>
    %c0_30 = arith.constant 0 : index
    %c0_31 = arith.constant 0 : index
    %24 = vector.load %arg6[%c0_30, %c0_31] : memref<64x256xbf16, #tpu.memory_space<vmem>>, vector<64x256xbf16>
    %c0_i32 = arith.constant 0 : i32
    %c7_i32 = arith.constant 7 : i32
    %25 = arith.subi %c7_i32, %c0_i32 : i32
    %c0_32 = arith.constant 0 : index
    %c0_33 = arith.constant 0 : index
    %26 = vector.load %arg14[%c0_32, %c0_33] : memref<8x64xf32, #tpu.memory_space<vmem>>, vector<8x64xf32>
    %c0_34 = arith.constant 0 : index
    %c0_35 = arith.constant 0 : index
    %27 = vector.load %arg15[%c0_34, %c0_35] : memref<8x64xf32, #tpu.memory_space<vmem>>, vector<8x64xf32>
    %28 = arith.truncf %26 : vector<8x64xf32> to vector<8x64xbf16>
    %cst_36 = arith.constant dense<0.000000e+00> : vector<8x256xf32>
    %29 = tpu.matmul %28, %24, %cst_36 {dimension_numbers = #tpu.dot_dimension_numbers<[1], [0], [0], [1], [0, 0, 1, 1], [], []>} : vector<8x64xbf16>, vector<64x256xbf16>, vector<8x256xf32> -> vector<8x256xf32>
    %30 = vector.extract_strided_slice %29 {offsets = [0, 0], sizes = [8, 128], strides = [1, 1]} : vector<8x256xf32> to vector<8x128xf32>
    %31 = arith.index_cast %c0_i32 : i32 to index
    %c0_37 = arith.constant 0 : index
    %c0_38 = arith.constant 0 : index
    %32 = vector.load %arg12[%31, %c0_37, %c0_38] : memref<8x8x128xf32, #tpu.memory_space<vmem>>, vector<1x8x128xf32>
    %33 = vector.shape_cast %32 : vector<1x8x128xf32> to vector<8x128xf32>
    %34 = arith.addf %30, %33 : vector<8x128xf32>
    %35 = vector.extract_strided_slice %29 {offsets = [0, 128], sizes = [8, 128], strides = [1, 1]} : vector<8x256xf32> to vector<8x128xf32>
    %36 = arith.index_cast %25 : i32 to index
    %c0_39 = arith.constant 0 : index
    %c0_40 = arith.constant 0 : index
    %37 = vector.load %arg13[%36, %c0_39, %c0_40] : memref<8x8x128xf32, #tpu.memory_space<vmem>>, vector<1x8x128xf32>
    %38 = vector.shape_cast %37 : vector<1x8x128xf32> to vector<8x128xf32>
    %39 = arith.addf %35, %38 : vector<8x128xf32>
    %40 = vector.extract_strided_slice %27 {offsets = [0, 0], sizes = [8, 32], strides = [1, 1]} : vector<8x64xf32> to vector<8x32xf32>
    %41 = arith.negf %34 : vector<8x128xf32>
    %42 = math.exp %41 : vector<8x128xf32>
    %cst_41 = arith.constant 1.000000e+00 : f32
    %43 = vector.broadcast %cst_41 : f32 to vector<8x128xf32>
    %44 = arith.addf %43, %42 : vector<8x128xf32>
    %45 = arith.divf %43, %44 : vector<8x128xf32>
    %46 = math.tanh %34 : vector<8x128xf32>
    %47 = vector.extract_strided_slice %45 {offsets = [0, 0], sizes = [8, 32], strides = [1, 1]} : vector<8x128xf32> to vector<8x32xf32>
    %48 = vector.extract_strided_slice %45 {offsets = [0, 32], sizes = [8, 32], strides = [1, 1]} : vector<8x128xf32> to vector<8x32xf32>
    %49 = vector.extract_strided_slice %46 {offsets = [0, 64], sizes = [8, 32], strides = [1, 1]} : vector<8x128xf32> to vector<8x32xf32>
    %50 = vector.extract_strided_slice %45 {offsets = [0, 96], sizes = [8, 32], strides = [1, 1]} : vector<8x128xf32> to vector<8x32xf32>
    %51 = arith.mulf %48, %40 : vector<8x32xf32>
    %52 = arith.mulf %47, %49 : vector<8x32xf32>
    %53 = arith.addf %51, %52 : vector<8x32xf32>
    %54 = math.tanh %53 : vector<8x32xf32>
    %55 = arith.mulf %50, %54 : vector<8x32xf32>
    %56 = vector.extract_strided_slice %27 {offsets = [0, 32], sizes = [8, 32], strides = [1, 1]} : vector<8x64xf32> to vector<8x32xf32>
    %57 = arith.negf %39 : vector<8x128xf32>
    %58 = math.exp %57 : vector<8x128xf32>
    %cst_42 = arith.constant 1.000000e+00 : f32
    %59 = vector.broadcast %cst_42 : f32 to vector<8x128xf32>
    %60 = arith.addf %59, %58 : vector<8x128xf32>
    %61 = arith.divf %59, %60 : vector<8x128xf32>
    %62 = math.tanh %39 : vector<8x128xf32>
    %63 = vector.extract_strided_slice %61 {offsets = [0, 0], sizes = [8, 32], strides = [1, 1]} : vector<8x128xf32> to vector<8x32xf32>
    %64 = vector.extract_strided_slice %61 {offsets = [0, 32], sizes = [8, 32], strides = [1, 1]} : vector<8x128xf32> to vector<8x32xf32>
    %65 = vector.extract_strided_slice %62 {offsets = [0, 64], sizes = [8, 32], strides = [1, 1]} : vector<8x128xf32> to vector<8x32xf32>
    %66 = vector.extract_strided_slice %61 {offsets = [0, 96], sizes = [8, 32], strides = [1, 1]} : vector<8x128xf32> to vector<8x32xf32>
    %67 = arith.mulf %64, %56 : vector<8x32xf32>
    %68 = arith.mulf %63, %65 : vector<8x32xf32>
    %69 = arith.addf %67, %68 : vector<8x32xf32>
    %70 = math.tanh %69 : vector<8x32xf32>
    %71 = arith.mulf %66, %70 : vector<8x32xf32>
    %72 = vector.broadcast %c0_i32 : i32 to vector<8x1xi32>
    %73 = arith.cmpi slt, %72, %23 : vector<8x1xi32>
    %74 = vector.broadcast %25 : i32 to vector<8x1xi32>
    %75 = arith.cmpi slt, %74, %23 : vector<8x1xi32>
    %76 = vector.extract_strided_slice %26 {offsets = [0, 0], sizes = [8, 32], strides = [1, 1]} : vector<8x64xf32> to vector<8x32xf32>
    %77 = vector.shape_cast %73 : vector<8x1xi1> to vector<8x1xi1>
    %78 = vector.broadcast %77 : vector<8x1xi1> to vector<8x32xi1>
    %79 = arith.select %78, %55, %76 : vector<8x32xi1>, vector<8x32xf32>
    %80 = vector.extract_strided_slice %27 {offsets = [0, 0], sizes = [8, 32], strides = [1, 1]} : vector<8x64xf32> to vector<8x32xf32>
    %81 = vector.shape_cast %73 : vector<8x1xi1> to vector<8x1xi1>
    %82 = vector.broadcast %81 : vector<8x1xi1> to vector<8x32xi1>
    %83 = arith.select %82, %53, %80 : vector<8x32xi1>, vector<8x32xf32>
    %84 = vector.extract_strided_slice %26 {offsets = [0, 32], sizes = [8, 32], strides = [1, 1]} : vector<8x64xf32> to vector<8x32xf32>
    %85 = vector.shape_cast %75 : vector<8x1xi1> to vector<8x1xi1>
    %86 = vector.broadcast %85 : vector<8x1xi1> to vector<8x32xi1>
    %87 = arith.select %86, %71, %84 : vector<8x32xi1>, vector<8x32xf32>
    %88 = vector.extract_strided_slice %27 {offsets = [0, 32], sizes = [8, 32], strides = [1, 1]} : vector<8x64xf32> to vector<8x32xf32>
    %89 = vector.shape_cast %75 : vector<8x1xi1> to vector<8x1xi1>
    %90 = vector.broadcast %89 : vector<8x1xi1> to vector<8x32xi1>
    %91 = arith.select %90, %69, %88 : vector<8x32xi1>, vector<8x32xf32>
    %c0_43 = arith.constant 0 : index
    %c0_44 = arith.constant 0 : index
    %92 = vector.load %arg14[%c0_43, %c0_44] : memref<8x64xf32, #tpu.memory_space<vmem>>, vector<8x32xf32>
    tpu.vector_store %arg14[%c0_43, %c0_44], %79 {strides = array<i32>} : memref<8x64xf32, #tpu.memory_space<vmem>>, vector<8x32xf32>,
    %c0_45 = arith.constant 0 : index
    %c32 = arith.constant 32 : index
    %93 = vector.load %arg14[%c0_45, %c32] : memref<8x64xf32, #tpu.memory_space<vmem>>, vector<8x32xf32>
    tpu.vector_store %arg14[%c0_45, %c32], %87 {strides = array<i32>} : memref<8x64xf32, #tpu.memory_space<vmem>>, vector<8x32xf32>,
    %c0_46 = arith.constant 0 : index
    %c0_47 = arith.constant 0 : index
    %94 = vector.load %arg15[%c0_46, %c0_47] : memref<8x64xf32, #tpu.memory_space<vmem>>, vector<8x32xf32>
    tpu.vector_store %arg15[%c0_46, %c0_47], %83 {strides = array<i32>} : memref<8x64xf32, #tpu.memory_space<vmem>>, vector<8x32xf32>,
    %c0_48 = arith.constant 0 : index
    %c32_49 = arith.constant 32 : index
    %95 = vector.load %arg15[%c0_48, %c32_49] : memref<8x64xf32, #tpu.memory_space<vmem>>, vector<8x32xf32>
    tpu.vector_store %arg15[%c0_48, %c32_49], %91 {strides = array<i32>} : memref<8x64xf32, #tpu.memory_space<vmem>>, vector<8x32xf32>,
    %c1_i32 = arith.constant 1 : i32
    %96 = vector.broadcast %c1_i32 : i32 to vector<8x1xi32>
    %97 = arith.subi %23, %96 : vector<8x1xi32>
    %98 = vector.broadcast %25 : i32 to vector<8x1xi32>
    %99 = arith.cmpi eq, %98, %97 : vector<8x1xi32>
    %c0_50 = arith.constant 0 : index
    %c0_51 = arith.constant 0 : index
    %100 = vector.load %arg16[%c0_50, %c0_51] : memref<8x32xf32, #tpu.memory_space<vmem>>, vector<8x32xf32>
    %101 = vector.shape_cast %99 : vector<8x1xi1> to vector<8x1xi1>
    %102 = vector.broadcast %101 : vector<8x1xi1> to vector<8x32xi1>
    %103 = arith.select %102, %87, %100 : vector<8x32xi1>, vector<8x32xf32>
    %c0_52 = arith.constant 0 : index
    %c0_53 = arith.constant 0 : index
    %104 = vector.load %arg16[%c0_52, %c0_53] : memref<8x32xf32, #tpu.memory_space<vmem>>, vector<8x32xf32>
    tpu.vector_store %arg16[%c0_52, %c0_53], %103 {strides = array<i32>} : memref<8x32xf32, #tpu.memory_space<vmem>>, vector<8x32xf32>,
    %c1_i32_54 = arith.constant 1 : i32
    %c7_i32_55 = arith.constant 7 : i32
    %105 = arith.subi %c7_i32_55, %c1_i32_54 : i32
    %c0_56 = arith.constant 0 : index
    %c0_57 = arith.constant 0 : index
    %106 = vector.load %arg14[%c0_56, %c0_57] : memref<8x64xf32, #tpu.memory_space<vmem>>, vector<8x64xf32>
    %c0_58 = arith.constant 0 : index
    %c0_59 = arith.constant 0 : index
    %107 = vector.load %arg15[%c0_58, %c0_59] : memref<8x64xf32, #tpu.memory_space<vmem>>, vector<8x64xf32>
    %108 = arith.truncf %106 : vector<8x64xf32> to vector<8x64xbf16>
    %cst_60 = arith.constant dense<0.000000e+00> : vector<8x256xf32>
    %109 = tpu.matmul %108, %24, %cst_60 {dimension_numbers = #tpu.dot_dimension_numbers<[1], [0], [0], [1], [0, 0, 1, 1], [], []>} : vector<8x64xbf16>, vector<64x256xbf16>, vector<8x256xf32> -> vector<8x256xf32>
    %110 = vector.extract_strided_slice %109 {offsets = [0, 0], sizes = [8, 128], strides = [1, 1]} : vector<8x256xf32> to vector<8x128xf32>
    %111 = arith.index_cast %c1_i32_54 : i32 to index
    %c0_61 = arith.constant 0 : index
    %c0_62 = arith.constant 0 : index
    %112 = vector.load %arg12[%111, %c0_61, %c0_62] : memref<8x8x128xf32, #tpu.memory_space<vmem>>, vector<1x8x128xf32>
    %113 = vector.shape_cast %112 : vector<1x8x128xf32> to vector<8x128xf32>
    %114 = arith.addf %110, %113 : vector<8x128xf32>
    %115 = vector.extract_strided_slice %109 {offsets = [0, 128], sizes = [8, 128], strides = [1, 1]} : vector<8x256xf32> to vector<8x128xf32>
    %116 = arith.index_cast %105 : i32 to index
    %c0_63 = arith.constant 0 : index
    %c0_64 = arith.constant 0 : index
    %117 = vector.load %arg13[%116, %c0_63, %c0_64] : memref<8x8x128xf32, #tpu.memory_space<vmem>>, vector<1x8x128xf32>
    %118 = vector.shape_cast %117 : vector<1x8x128xf32> to vector<8x128xf32>
    %119 = arith.addf %115, %118 : vector<8x128xf32>
    %120 = vector.extract_strided_slice %107 {offsets = [0, 0], sizes = [8, 32], strides = [1, 1]} : vector<8x64xf32> to vector<8x32xf32>
    %121 = arith.negf %114 : vector<8x128xf32>
    %122 = math.exp %121 : vector<8x128xf32>
    %cst_65 = arith.constant 1.000000e+00 : f32
    %123 = vector.broadcast %cst_65 : f32 to vector<8x128xf32>
    %124 = arith.addf %123, %122 : vector<8x128xf32>
    %125 = arith.divf %123, %124 : vector<8x128xf32>
    %126 = math.tanh %114 : vector<8x128xf32>
    %127 = vector.extract_strided_slice %125 {offsets = [0, 0], sizes = [8, 32], strides = [1, 1]} : vector<8x128xf32> to vector<8x32xf32>
    %128 = vector.extract_strided_slice %125 {offsets = [0, 32], sizes = [8, 32], strides = [1, 1]} : vector<8x128xf32> to vector<8x32xf32>
    %129 = vector.extract_strided_slice %126 {offsets = [0, 64], sizes = [8, 32], strides = [1, 1]} : vector<8x128xf32> to vector<8x32xf32>
    %130 = vector.extract_strided_slice %125 {offsets = [0, 96], sizes = [8, 32], strides = [1, 1]} : vector<8x128xf32> to vector<8x32xf32>
    %131 = arith.mulf %128, %120 : vector<8x32xf32>
    %132 = arith.mulf %127, %129 : vector<8x32xf32>
    %133 = arith.addf %131, %132 : vector<8x32xf32>
    %134 = math.tanh %133 : vector<8x32xf32>
    %135 = arith.mulf %130, %134 : vector<8x32xf32>
    %136 = vector.extract_strided_slice %107 {offsets = [0, 32], sizes = [8, 32], strides = [1, 1]} : vector<8x64xf32> to vector<8x32xf32>
    %137 = arith.negf %119 : vector<8x128xf32>
    %138 = math.exp %137 : vector<8x128xf32>
    %cst_66 = arith.constant 1.000000e+00 : f32
    %139 = vector.broadcast %cst_66 : f32 to vector<8x128xf32>
    %140 = arith.addf %139, %138 : vector<8x128xf32>
    %141 = arith.divf %139, %140 : vector<8x128xf32>
    %142 = math.tanh %119 : vector<8x128xf32>
    %143 = vector.extract_strided_slice %141 {offsets = [0, 0], sizes = [8, 32], strides = [1, 1]} : vector<8x128xf32> to vector<8x32xf32>
    %144 = vector.extract_strided_slice %141 {offsets = [0, 32], sizes = [8, 32], strides = [1, 1]} : vector<8x128xf32> to vector<8x32xf32>
    %145 = vector.extract_strided_slice %142 {offsets = [0, 64], sizes = [8, 32], strides = [1, 1]} : vector<8x128xf32> to vector<8x32xf32>
    %146 = vector.extract_strided_slice %141 {offsets = [0, 96], sizes = [8, 32], strides = [1, 1]} : vector<8x128xf32> to vector<8x32xf32>
    %147 = arith.mulf %144, %136 : vector<8x32xf32>
    %148 = arith.mulf %143, %145 : vector<8x32xf32>
    %149 = arith.addf %147, %148 : vector<8x32xf32>
    %150 = math.tanh %149 : vector<8x32xf32>
    %151 = arith.mulf %146, %150 : vector<8x32xf32>
    %152 = vector.broadcast %c1_i32_54 : i32 to vector<8x1xi32>
    %153 = arith.cmpi slt, %152, %23 : vector<8x1xi32>
    %154 = vector.broadcast %105 : i32 to vector<8x1xi32>
    %155 = arith.cmpi slt, %154, %23 : vector<8x1xi32>
    %156 = vector.extract_strided_slice %106 {offsets = [0, 0], sizes = [8, 32], strides = [1, 1]} : vector<8x64xf32> to vector<8x32xf32>
    %157 = vector.shape_cast %153 : vector<8x1xi1> to vector<8x1xi1>
    %158 = vector.broadcast %157 : vector<8x1xi1> to vector<8x32xi1>
    %159 = arith.select %158, %135, %156 : vector<8x32xi1>, vector<8x32xf32>
    %160 = vector.extract_strided_slice %107 {offsets = [0, 0], sizes = [8, 32], strides = [1, 1]} : vector<8x64xf32> to vector<8x32xf32>
    %161 = vector.shape_cast %153 : vector<8x1xi1> to vector<8x1xi1>
    %162 = vector.broadcast %161 : vector<8x1xi1> to vector<8x32xi1>
    %163 = arith.select %162, %133, %160 : vector<8x32xi1>, vector<8x32xf32>
    %164 = vector.extract_strided_slice %106 {offsets = [0, 32], sizes = [8, 32], strides = [1, 1]} : vector<8x64xf32> to vector<8x32xf32>
    %165 = vector.shape_cast %155 : vector<8x1xi1> to vector<8x1xi1>
    %166 = vector.broadcast %165 : vector<8x1xi1> to vector<8x32xi1>
    %167 = arith.select %166, %151, %164 : vector<8x32xi1>, vector<8x32xf32>
    %168 = vector.extract_strided_slice %107 {offsets = [0, 32], sizes = [8, 32], strides = [1, 1]} : vector<8x64xf32> to vector<8x32xf32>
    %169 = vector.shape_cast %155 : vector<8x1xi1> to vector<8x1xi1>
    %170 = vector.broadcast %169 : vector<8x1xi1> to vector<8x32xi1>
    %171 = arith.select %170, %149, %168 : vector<8x32xi1>, vector<8x32xf32>
    %c0_67 = arith.constant 0 : index
    %c0_68 = arith.constant 0 : index
    %172 = vector.load %arg14[%c0_67, %c0_68] : memref<8x64xf32, #tpu.memory_space<vmem>>, vector<8x32xf32>
    tpu.vector_store %arg14[%c0_67, %c0_68], %159 {strides = array<i32>} : memref<8x64xf32, #tpu.memory_space<vmem>>, vector<8x32xf32>,
    %c0_69 = arith.constant 0 : index
    %c32_70 = arith.constant 32 : index
    %173 = vector.load %arg14[%c0_69, %c32_70] : memref<8x64xf32, #tpu.memory_space<vmem>>, vector<8x32xf32>
    tpu.vector_store %arg14[%c0_69, %c32_70], %167 {strides = array<i32>} : memref<8x64xf32, #tpu.memory_space<vmem>>, vector<8x32xf32>,
    %c0_71 = arith.constant 0 : index
    %c0_72 = arith.constant 0 : index
    %174 = vector.load %arg15[%c0_71, %c0_72] : memref<8x64xf32, #tpu.memory_space<vmem>>, vector<8x32xf32>
    tpu.vector_store %arg15[%c0_71, %c0_72], %163 {strides = array<i32>} : memref<8x64xf32, #tpu.memory_space<vmem>>, vector<8x32xf32>,
    %c0_73 = arith.constant 0 : index
    %c32_74 = arith.constant 32 : index
    %175 = vector.load %arg15[%c0_73, %c32_74] : memref<8x64xf32, #tpu.memory_space<vmem>>, vector<8x32xf32>
    tpu.vector_store %arg15[%c0_73, %c32_74], %171 {strides = array<i32>} : memref<8x64xf32, #tpu.memory_space<vmem>>, vector<8x32xf32>,
    %c1_i32_75 = arith.constant 1 : i32
    %176 = vector.broadcast %c1_i32_75 : i32 to vector<8x1xi32>
    %177 = arith.subi %23, %176 : vector<8x1xi32>
    %178 = vector.broadcast %105 : i32 to vector<8x1xi32>
    %179 = arith.cmpi eq, %178, %177 : vector<8x1xi32>
    %c0_76 = arith.constant 0 : index
    %c0_77 = arith.constant 0 : index
    %180 = vector.load %arg16[%c0_76, %c0_77] : memref<8x32xf32, #tpu.memory_space<vmem>>, vector<8x32xf32>
    %181 = vector.shape_cast %179 : vector<8x1xi1> to vector<8x1xi1>
    %182 = vector.broadcast %181 : vector<8x1xi1> to vector<8x32xi1>
    %183 = arith.select %182, %167, %180 : vector<8x32xi1>, vector<8x32xf32>
    %c0_78 = arith.constant 0 : index
    %c0_79 = arith.constant 0 : index
    %184 = vector.load %arg16[%c0_78, %c0_79] : memref<8x32xf32, #tpu.memory_space<vmem>>, vector<8x32xf32>
    tpu.vector_store %arg16[%c0_78, %c0_79], %183 {strides = array<i32>} : memref<8x32xf32, #tpu.memory_space<vmem>>, vector<8x32xf32>,
    %c2_i32 = arith.constant 2 : i32
    %c7_i32_80 = arith.constant 7 : i32
    %185 = arith.subi %c7_i32_80, %c2_i32 : i32
    %c0_81 = arith.constant 0 : index
    %c0_82 = arith.constant 0 : index
    %186 = vector.load %arg14[%c0_81, %c0_82] : memref<8x64xf32, #tpu.memory_space<vmem>>, vector<8x64xf32>
    %c0_83 = arith.constant 0 : index
    %c0_84 = arith.constant 0 : index
    %187 = vector.load %arg15[%c0_83, %c0_84] : memref<8x64xf32, #tpu.memory_space<vmem>>, vector<8x64xf32>
    %188 = arith.truncf %186 : vector<8x64xf32> to vector<8x64xbf16>
    %cst_85 = arith.constant dense<0.000000e+00> : vector<8x256xf32>
    %189 = tpu.matmul %188, %24, %cst_85 {dimension_numbers = #tpu.dot_dimension_numbers<[1], [0], [0], [1], [0, 0, 1, 1], [], []>} : vector<8x64xbf16>, vector<64x256xbf16>, vector<8x256xf32> -> vector<8x256xf32>
    %190 = vector.extract_strided_slice %189 {offsets = [0, 0], sizes = [8, 128], strides = [1, 1]} : vector<8x256xf32> to vector<8x128xf32>
    %191 = arith.index_cast %c2_i32 : i32 to index
    %c0_86 = arith.constant 0 : index
    %c0_87 = arith.constant 0 : index
    %192 = vector.load %arg12[%191, %c0_86, %c0_87] : memref<8x8x128xf32, #tpu.memory_space<vmem>>, vector<1x8x128xf32>
    %193 = vector.shape_cast %192 : vector<1x8x128xf32> to vector<8x128xf32>
    %194 = arith.addf %190, %193 : vector<8x128xf32>
    %195 = vector.extract_strided_slice %189 {offsets = [0, 128], sizes = [8, 128], strides = [1, 1]} : vector<8x256xf32> to vector<8x128xf32>
    %196 = arith.index_cast %185 : i32 to index
    %c0_88 = arith.constant 0 : index
    %c0_89 = arith.constant 0 : index
    %197 = vector.load %arg13[%196, %c0_88, %c0_89] : memref<8x8x128xf32, #tpu.memory_space<vmem>>, vector<1x8x128xf32>
    %198 = vector.shape_cast %197 : vector<1x8x128xf32> to vector<8x128xf32>
    %199 = arith.addf %195, %198 : vector<8x128xf32>
    %200 = vector.extract_strided_slice %187 {offsets = [0, 0], sizes = [8, 32], strides = [1, 1]} : vector<8x64xf32> to vector<8x32xf32>
    %201 = arith.negf %194 : vector<8x128xf32>
    %202 = math.exp %201 : vector<8x128xf32>
    %cst_90 = arith.constant 1.000000e+00 : f32
    %203 = vector.broadcast %cst_90 : f32 to vector<8x128xf32>
    %204 = arith.addf %203, %202 : vector<8x128xf32>
    %205 = arith.divf %203, %204 : vector<8x128xf32>
    %206 = math.tanh %194 : vector<8x128xf32>
    %207 = vector.extract_strided_slice %205 {offsets = [0, 0], sizes = [8, 32], strides = [1, 1]} : vector<8x128xf32> to vector<8x32xf32>
    %208 = vector.extract_strided_slice %205 {offsets = [0, 32], sizes = [8, 32], strides = [1, 1]} : vector<8x128xf32> to vector<8x32xf32>
    %209 = vector.extract_strided_slice %206 {offsets = [0, 64], sizes = [8, 32], strides = [1, 1]} : vector<8x128xf32> to vector<8x32xf32>
    %210 = vector.extract_strided_slice %205 {offsets = [0, 96], sizes = [8, 32], strides = [1, 1]} : vector<8x128xf32> to vector<8x32xf32>
    %211 = arith.mulf %208, %200 : vector<8x32xf32>
    %212 = arith.mulf %207, %209 : vector<8x32xf32>
    %213 = arith.addf %211, %212 : vector<8x32xf32>
    %214 = math.tanh %213 : vector<8x32xf32>
    %215 = arith.mulf %210, %214 : vector<8x32xf32>
    %216 = vector.extract_strided_slice %187 {offsets = [0, 32], sizes = [8, 32], strides = [1, 1]} : vector<8x64xf32> to vector<8x32xf32>
    %217 = arith.negf %199 : vector<8x128xf32>
    %218 = math.exp %217 : vector<8x128xf32>
    %cst_91 = arith.constant 1.000000e+00 : f32
    %219 = vector.broadcast %cst_91 : f32 to vector<8x128xf32>
    %220 = arith.addf %219, %218 : vector<8x128xf32>
    %221 = arith.divf %219, %220 : vector<8x128xf32>
    %222 = math.tanh %199 : vector<8x128xf32>
    %223 = vector.extract_strided_slice %221 {offsets = [0, 0], sizes = [8, 32], strides = [1, 1]} : vector<8x128xf32> to vector<8x32xf32>
    %224 = vector.extract_strided_slice %221 {offsets = [0, 32], sizes = [8, 32], strides = [1, 1]} : vector<8x128xf32> to vector<8x32xf32>
    %225 = vector.extract_strided_slice %222 {offsets = [0, 64], sizes = [8, 32], strides = [1, 1]} : vector<8x128xf32> to vector<8x32xf32>
    %226 = vector.extract_strided_slice %221 {offsets = [0, 96], sizes = [8, 32], strides = [1, 1]} : vector<8x128xf32> to vector<8x32xf32>
    %227 = arith.mulf %224, %216 : vector<8x32xf32>
    %228 = arith.mulf %223, %225 : vector<8x32xf32>
    %229 = arith.addf %227, %228 : vector<8x32xf32>
    %230 = math.tanh %229 : vector<8x32xf32>
    %231 = arith.mulf %226, %230 : vector<8x32xf32>
    %232 = vector.broadcast %c2_i32 : i32 to vector<8x1xi32>
    %233 = arith.cmpi slt, %232, %23 : vector<8x1xi32>
    %234 = vector.broadcast %185 : i32 to vector<8x1xi32>
    %235 = arith.cmpi slt, %234, %23 : vector<8x1xi32>
    %236 = vector.extract_strided_slice %186 {offsets = [0, 0], sizes = [8, 32], strides = [1, 1]} : vector<8x64xf32> to vector<8x32xf32>
    %237 = vector.shape_cast %233 : vector<8x1xi1> to vector<8x1xi1>
    %238 = vector.broadcast %237 : vector<8x1xi1> to vector<8x32xi1>
    %239 = arith.select %238, %215, %236 : vector<8x32xi1>, vector<8x32xf32>
    %240 = vector.extract_strided_slice %187 {offsets = [0, 0], sizes = [8, 32], strides = [1, 1]} : vector<8x64xf32> to vector<8x32xf32>
    %241 = vector.shape_cast %233 : vector<8x1xi1> to vector<8x1xi1>
    %242 = vector.broadcast %241 : vector<8x1xi1> to vector<8x32xi1>
    %243 = arith.select %242, %213, %240 : vector<8x32xi1>, vector<8x32xf32>
    %244 = vector.extract_strided_slice %186 {offsets = [0, 32], sizes = [8, 32], strides = [1, 1]} : vector<8x64xf32> to vector<8x32xf32>
    %245 = vector.shape_cast %235 : vector<8x1xi1> to vector<8x1xi1>
    %246 = vector.broadcast %245 : vector<8x1xi1> to vector<8x32xi1>
    %247 = arith.select %246, %231, %244 : vector<8x32xi1>, vector<8x32xf32>
    %248 = vector.extract_strided_slice %187 {offsets = [0, 32], sizes = [8, 32], strides = [1, 1]} : vector<8x64xf32> to vector<8x32xf32>
    %249 = vector.shape_cast %235 : vector<8x1xi1> to vector<8x1xi1>
    %250 = vector.broadcast %249 : vector<8x1xi1> to vector<8x32xi1>
    %251 = arith.select %250, %229, %248 : vector<8x32xi1>, vector<8x32xf32>
    %c0_92 = arith.constant 0 : index
    %c0_93 = arith.constant 0 : index
    %252 = vector.load %arg14[%c0_92, %c0_93] : memref<8x64xf32, #tpu.memory_space<vmem>>, vector<8x32xf32>
    tpu.vector_store %arg14[%c0_92, %c0_93], %239 {strides = array<i32>} : memref<8x64xf32, #tpu.memory_space<vmem>>, vector<8x32xf32>,
    %c0_94 = arith.constant 0 : index
    %c32_95 = arith.constant 32 : index
    %253 = vector.load %arg14[%c0_94, %c32_95] : memref<8x64xf32, #tpu.memory_space<vmem>>, vector<8x32xf32>
    tpu.vector_store %arg14[%c0_94, %c32_95], %247 {strides = array<i32>} : memref<8x64xf32, #tpu.memory_space<vmem>>, vector<8x32xf32>,
    %c0_96 = arith.constant 0 : index
    %c0_97 = arith.constant 0 : index
    %254 = vector.load %arg15[%c0_96, %c0_97] : memref<8x64xf32, #tpu.memory_space<vmem>>, vector<8x32xf32>
    tpu.vector_store %arg15[%c0_96, %c0_97], %243 {strides = array<i32>} : memref<8x64xf32, #tpu.memory_space<vmem>>, vector<8x32xf32>,
    %c0_98 = arith.constant 0 : index
    %c32_99 = arith.constant 32 : index
    %255 = vector.load %arg15[%c0_98, %c32_99] : memref<8x64xf32, #tpu.memory_space<vmem>>, vector<8x32xf32>
    tpu.vector_store %arg15[%c0_98, %c32_99], %251 {strides = array<i32>} : memref<8x64xf32, #tpu.memory_space<vmem>>, vector<8x32xf32>,
    %c1_i32_100 = arith.constant 1 : i32
    %256 = vector.broadcast %c1_i32_100 : i32 to vector<8x1xi32>
    %257 = arith.subi %23, %256 : vector<8x1xi32>
    %258 = vector.broadcast %185 : i32 to vector<8x1xi32>
    %259 = arith.cmpi eq, %258, %257 : vector<8x1xi32>
    %c0_101 = arith.constant 0 : index
    %c0_102 = arith.constant 0 : index
    %260 = vector.load %arg16[%c0_101, %c0_102] : memref<8x32xf32, #tpu.memory_space<vmem>>, vector<8x32xf32>
    %261 = vector.shape_cast %259 : vector<8x1xi1> to vector<8x1xi1>
    %262 = vector.broadcast %261 : vector<8x1xi1> to vector<8x32xi1>
    %263 = arith.select %262, %247, %260 : vector<8x32xi1>, vector<8x32xf32>
    %c0_103 = arith.constant 0 : index
    %c0_104 = arith.constant 0 : index
    %264 = vector.load %arg16[%c0_103, %c0_104] : memref<8x32xf32, #tpu.memory_space<vmem>>, vector<8x32xf32>
    tpu.vector_store %arg16[%c0_103, %c0_104], %263 {strides = array<i32>} : memref<8x32xf32, #tpu.memory_space<vmem>>, vector<8x32xf32>,
    %c3_i32 = arith.constant 3 : i32
    %c7_i32_105 = arith.constant 7 : i32
    %265 = arith.subi %c7_i32_105, %c3_i32 : i32
    %c0_106 = arith.constant 0 : index
    %c0_107 = arith.constant 0 : index
    %266 = vector.load %arg14[%c0_106, %c0_107] : memref<8x64xf32, #tpu.memory_space<vmem>>, vector<8x64xf32>
    %c0_108 = arith.constant 0 : index
    %c0_109 = arith.constant 0 : index
    %267 = vector.load %arg15[%c0_108, %c0_109] : memref<8x64xf32, #tpu.memory_space<vmem>>, vector<8x64xf32>
    %268 = arith.truncf %266 : vector<8x64xf32> to vector<8x64xbf16>
    %cst_110 = arith.constant dense<0.000000e+00> : vector<8x256xf32>
    %269 = tpu.matmul %268, %24, %cst_110 {dimension_numbers = #tpu.dot_dimension_numbers<[1], [0], [0], [1], [0, 0, 1, 1], [], []>} : vector<8x64xbf16>, vector<64x256xbf16>, vector<8x256xf32> -> vector<8x256xf32>
    %270 = vector.extract_strided_slice %269 {offsets = [0, 0], sizes = [8, 128], strides = [1, 1]} : vector<8x256xf32> to vector<8x128xf32>
    %271 = arith.index_cast %c3_i32 : i32 to index
    %c0_111 = arith.constant 0 : index
    %c0_112 = arith.constant 0 : index
    %272 = vector.load %arg12[%271, %c0_111, %c0_112] : memref<8x8x128xf32, #tpu.memory_space<vmem>>, vector<1x8x128xf32>
    %273 = vector.shape_cast %272 : vector<1x8x128xf32> to vector<8x128xf32>
    %274 = arith.addf %270, %273 : vector<8x128xf32>
    %275 = vector.extract_strided_slice %269 {offsets = [0, 128], sizes = [8, 128], strides = [1, 1]} : vector<8x256xf32> to vector<8x128xf32>
    %276 = arith.index_cast %265 : i32 to index
    %c0_113 = arith.constant 0 : index
    %c0_114 = arith.constant 0 : index
    %277 = vector.load %arg13[%276, %c0_113, %c0_114] : memref<8x8x128xf32, #tpu.memory_space<vmem>>, vector<1x8x128xf32>
    %278 = vector.shape_cast %277 : vector<1x8x128xf32> to vector<8x128xf32>
    %279 = arith.addf %275, %278 : vector<8x128xf32>
    %280 = vector.extract_strided_slice %267 {offsets = [0, 0], sizes = [8, 32], strides = [1, 1]} : vector<8x64xf32> to vector<8x32xf32>
    %281 = arith.negf %274 : vector<8x128xf32>
    %282 = math.exp %281 : vector<8x128xf32>
    %cst_115 = arith.constant 1.000000e+00 : f32
    %283 = vector.broadcast %cst_115 : f32 to vector<8x128xf32>
    %284 = arith.addf %283, %282 : vector<8x128xf32>
    %285 = arith.divf %283, %284 : vector<8x128xf32>
    %286 = math.tanh %274 : vector<8x128xf32>
    %287 = vector.extract_strided_slice %285 {offsets = [0, 0], sizes = [8, 32], strides = [1, 1]} : vector<8x128xf32> to vector<8x32xf32>
    %288 = vector.extract_strided_slice %285 {offsets = [0, 32], sizes = [8, 32], strides = [1, 1]} : vector<8x128xf32> to vector<8x32xf32>
    %289 = vector.extract_strided_slice %286 {offsets = [0, 64], sizes = [8, 32], strides = [1, 1]} : vector<8x128xf32> to vector<8x32xf32>
    %290 = vector.extract_strided_slice %285 {offsets = [0, 96], sizes = [8, 32], strides = [1, 1]} : vector<8x128xf32> to vector<8x32xf32>
    %291 = arith.mulf %288, %280 : vector<8x32xf32>
    %292 = arith.mulf %287, %289 : vector<8x32xf32>
    %293 = arith.addf %291, %292 : vector<8x32xf32>
    %294 = math.tanh %293 : vector<8x32xf32>
    %295 = arith.mulf %290, %294 : vector<8x32xf32>
    %296 = vector.extract_strided_slice %267 {offsets = [0, 32], sizes = [8, 32], strides = [1, 1]} : vector<8x64xf32> to vector<8x32xf32>
    %297 = arith.negf %279 : vector<8x128xf32>
    %298 = math.exp %297 : vector<8x128xf32>
    %cst_116 = arith.constant 1.000000e+00 : f32
    %299 = vector.broadcast %cst_116 : f32 to vector<8x128xf32>
    %300 = arith.addf %299, %298 : vector<8x128xf32>
    %301 = arith.divf %299, %300 : vector<8x128xf32>
    %302 = math.tanh %279 : vector<8x128xf32>
    %303 = vector.extract_strided_slice %301 {offsets = [0, 0], sizes = [8, 32], strides = [1, 1]} : vector<8x128xf32> to vector<8x32xf32>
    %304 = vector.extract_strided_slice %301 {offsets = [0, 32], sizes = [8, 32], strides = [1, 1]} : vector<8x128xf32> to vector<8x32xf32>
    %305 = vector.extract_strided_slice %302 {offsets = [0, 64], sizes = [8, 32], strides = [1, 1]} : vector<8x128xf32> to vector<8x32xf32>
    %306 = vector.extract_strided_slice %301 {offsets = [0, 96], sizes = [8, 32], strides = [1, 1]} : vector<8x128xf32> to vector<8x32xf32>
    %307 = arith.mulf %304, %296 : vector<8x32xf32>
    %308 = arith.mulf %303, %305 : vector<8x32xf32>
    %309 = arith.addf %307, %308 : vector<8x32xf32>
    %310 = math.tanh %309 : vector<8x32xf32>
    %311 = arith.mulf %306, %310 : vector<8x32xf32>
    %312 = vector.broadcast %c3_i32 : i32 to vector<8x1xi32>
    %313 = arith.cmpi slt, %312, %23 : vector<8x1xi32>
    %314 = vector.broadcast %265 : i32 to vector<8x1xi32>
    %315 = arith.cmpi slt, %314, %23 : vector<8x1xi32>
    %316 = vector.extract_strided_slice %266 {offsets = [0, 0], sizes = [8, 32], strides = [1, 1]} : vector<8x64xf32> to vector<8x32xf32>
    %317 = vector.shape_cast %313 : vector<8x1xi1> to vector<8x1xi1>
    %318 = vector.broadcast %317 : vector<8x1xi1> to vector<8x32xi1>
    %319 = arith.select %318, %295, %316 : vector<8x32xi1>, vector<8x32xf32>
    %320 = vector.extract_strided_slice %267 {offsets = [0, 0], sizes = [8, 32], strides = [1, 1]} : vector<8x64xf32> to vector<8x32xf32>
    %321 = vector.shape_cast %313 : vector<8x1xi1> to vector<8x1xi1>
    %322 = vector.broadcast %321 : vector<8x1xi1> to vector<8x32xi1>
    %323 = arith.select %322, %293, %320 : vector<8x32xi1>, vector<8x32xf32>
    %324 = vector.extract_strided_slice %266 {offsets = [0, 32], sizes = [8, 32], strides = [1, 1]} : vector<8x64xf32> to vector<8x32xf32>
    %325 = vector.shape_cast %315 : vector<8x1xi1> to vector<8x1xi1>
    %326 = vector.broadcast %325 : vector<8x1xi1> to vector<8x32xi1>
    %327 = arith.select %326, %311, %324 : vector<8x32xi1>, vector<8x32xf32>
    %328 = vector.extract_strided_slice %267 {offsets = [0, 32], sizes = [8, 32], strides = [1, 1]} : vector<8x64xf32> to vector<8x32xf32>
    %329 = vector.shape_cast %315 : vector<8x1xi1> to vector<8x1xi1>
    %330 = vector.broadcast %329 : vector<8x1xi1> to vector<8x32xi1>
    %331 = arith.select %330, %309, %328 : vector<8x32xi1>, vector<8x32xf32>
    %c0_117 = arith.constant 0 : index
    %c0_118 = arith.constant 0 : index
    %332 = vector.load %arg14[%c0_117, %c0_118] : memref<8x64xf32, #tpu.memory_space<vmem>>, vector<8x32xf32>
    tpu.vector_store %arg14[%c0_117, %c0_118], %319 {strides = array<i32>} : memref<8x64xf32, #tpu.memory_space<vmem>>, vector<8x32xf32>,
    %c0_119 = arith.constant 0 : index
    %c32_120 = arith.constant 32 : index
    %333 = vector.load %arg14[%c0_119, %c32_120] : memref<8x64xf32, #tpu.memory_space<vmem>>, vector<8x32xf32>
    tpu.vector_store %arg14[%c0_119, %c32_120], %327 {strides = array<i32>} : memref<8x64xf32, #tpu.memory_space<vmem>>, vector<8x32xf32>,
    %c0_121 = arith.constant 0 : index
    %c0_122 = arith.constant 0 : index
    %334 = vector.load %arg15[%c0_121, %c0_122] : memref<8x64xf32, #tpu.memory_space<vmem>>, vector<8x32xf32>
    tpu.vector_store %arg15[%c0_121, %c0_122], %323 {strides = array<i32>} : memref<8x64xf32, #tpu.memory_space<vmem>>, vector<8x32xf32>,
    %c0_123 = arith.constant 0 : index
    %c32_124 = arith.constant 32 : index
    %335 = vector.load %arg15[%c0_123, %c32_124] : memref<8x64xf32, #tpu.memory_space<vmem>>, vector<8x32xf32>
    tpu.vector_store %arg15[%c0_123, %c32_124], %331 {strides = array<i32>} : memref<8x64xf32, #tpu.memory_space<vmem>>, vector<8x32xf32>,
    %c1_i32_125 = arith.constant 1 : i32
    %336 = vector.broadcast %c1_i32_125 : i32 to vector<8x1xi32>
    %337 = arith.subi %23, %336 : vector<8x1xi32>
    %338 = vector.broadcast %265 : i32 to vector<8x1xi32>
    %339 = arith.cmpi eq, %338, %337 : vector<8x1xi32>
    %c0_126 = arith.constant 0 : index
    %c0_127 = arith.constant 0 : index
    %340 = vector.load %arg16[%c0_126, %c0_127] : memref<8x32xf32, #tpu.memory_space<vmem>>, vector<8x32xf32>
    %341 = vector.shape_cast %339 : vector<8x1xi1> to vector<8x1xi1>
    %342 = vector.broadcast %341 : vector<8x1xi1> to vector<8x32xi1>
    %343 = arith.select %342, %327, %340 : vector<8x32xi1>, vector<8x32xf32>
    %c0_128 = arith.constant 0 : index
    %c0_129 = arith.constant 0 : index
    %344 = vector.load %arg16[%c0_128, %c0_129] : memref<8x32xf32, #tpu.memory_space<vmem>>, vector<8x32xf32>
    tpu.vector_store %arg16[%c0_128, %c0_129], %343 {strides = array<i32>} : memref<8x32xf32, #tpu.memory_space<vmem>>, vector<8x32xf32>,
    %c4_i32 = arith.constant 4 : i32
    %c7_i32_130 = arith.constant 7 : i32
    %345 = arith.subi %c7_i32_130, %c4_i32 : i32
    %c0_131 = arith.constant 0 : index
    %c0_132 = arith.constant 0 : index
    %346 = vector.load %arg14[%c0_131, %c0_132] : memref<8x64xf32, #tpu.memory_space<vmem>>, vector<8x64xf32>
    %c0_133 = arith.constant 0 : index
    %c0_134 = arith.constant 0 : index
    %347 = vector.load %arg15[%c0_133, %c0_134] : memref<8x64xf32, #tpu.memory_space<vmem>>, vector<8x64xf32>
    %348 = arith.truncf %346 : vector<8x64xf32> to vector<8x64xbf16>
    %cst_135 = arith.constant dense<0.000000e+00> : vector<8x256xf32>
    %349 = tpu.matmul %348, %24, %cst_135 {dimension_numbers = #tpu.dot_dimension_numbers<[1], [0], [0], [1], [0, 0, 1, 1], [], []>} : vector<8x64xbf16>, vector<64x256xbf16>, vector<8x256xf32> -> vector<8x256xf32>
    %350 = vector.extract_strided_slice %349 {offsets = [0, 0], sizes = [8, 128], strides = [1, 1]} : vector<8x256xf32> to vector<8x128xf32>
    %351 = arith.index_cast %c4_i32 : i32 to index
    %c0_136 = arith.constant 0 : index
    %c0_137 = arith.constant 0 : index
    %352 = vector.load %arg12[%351, %c0_136, %c0_137] : memref<8x8x128xf32, #tpu.memory_space<vmem>>, vector<1x8x128xf32>
    %353 = vector.shape_cast %352 : vector<1x8x128xf32> to vector<8x128xf32>
    %354 = arith.addf %350, %353 : vector<8x128xf32>
    %355 = vector.extract_strided_slice %349 {offsets = [0, 128], sizes = [8, 128], strides = [1, 1]} : vector<8x256xf32> to vector<8x128xf32>
    %356 = arith.index_cast %345 : i32 to index
    %c0_138 = arith.constant 0 : index
    %c0_139 = arith.constant 0 : index
    %357 = vector.load %arg13[%356, %c0_138, %c0_139] : memref<8x8x128xf32, #tpu.memory_space<vmem>>, vector<1x8x128xf32>
    %358 = vector.shape_cast %357 : vector<1x8x128xf32> to vector<8x128xf32>
    %359 = arith.addf %355, %358 : vector<8x128xf32>
    %360 = vector.extract_strided_slice %347 {offsets = [0, 0], sizes = [8, 32], strides = [1, 1]} : vector<8x64xf32> to vector<8x32xf32>
    %361 = arith.negf %354 : vector<8x128xf32>
    %362 = math.exp %361 : vector<8x128xf32>
    %cst_140 = arith.constant 1.000000e+00 : f32
    %363 = vector.broadcast %cst_140 : f32 to vector<8x128xf32>
    %364 = arith.addf %363, %362 : vector<8x128xf32>
    %365 = arith.divf %363, %364 : vector<8x128xf32>
    %366 = math.tanh %354 : vector<8x128xf32>
    %367 = vector.extract_strided_slice %365 {offsets = [0, 0], sizes = [8, 32], strides = [1, 1]} : vector<8x128xf32> to vector<8x32xf32>
    %368 = vector.extract_strided_slice %365 {offsets = [0, 32], sizes = [8, 32], strides = [1, 1]} : vector<8x128xf32> to vector<8x32xf32>
    %369 = vector.extract_strided_slice %366 {offsets = [0, 64], sizes = [8, 32], strides = [1, 1]} : vector<8x128xf32> to vector<8x32xf32>
    %370 = vector.extract_strided_slice %365 {offsets = [0, 96], sizes = [8, 32], strides = [1, 1]} : vector<8x128xf32> to vector<8x32xf32>
    %371 = arith.mulf %368, %360 : vector<8x32xf32>
    %372 = arith.mulf %367, %369 : vector<8x32xf32>
    %373 = arith.addf %371, %372 : vector<8x32xf32>
    %374 = math.tanh %373 : vector<8x32xf32>
    %375 = arith.mulf %370, %374 : vector<8x32xf32>
    %376 = vector.extract_strided_slice %347 {offsets = [0, 32], sizes = [8, 32], strides = [1, 1]} : vector<8x64xf32> to vector<8x32xf32>
    %377 = arith.negf %359 : vector<8x128xf32>
    %378 = math.exp %377 : vector<8x128xf32>
    %cst_141 = arith.constant 1.000000e+00 : f32
    %379 = vector.broadcast %cst_141 : f32 to vector<8x128xf32>
    %380 = arith.addf %379, %378 : vector<8x128xf32>
    %381 = arith.divf %379, %380 : vector<8x128xf32>
    %382 = math.tanh %359 : vector<8x128xf32>
    %383 = vector.extract_strided_slice %381 {offsets = [0, 0], sizes = [8, 32], strides = [1, 1]} : vector<8x128xf32> to vector<8x32xf32>
    %384 = vector.extract_strided_slice %381 {offsets = [0, 32], sizes = [8, 32], strides = [1, 1]} : vector<8x128xf32> to vector<8x32xf32>
    %385 = vector.extract_strided_slice %382 {offsets = [0, 64], sizes = [8, 32], strides = [1, 1]} : vector<8x128xf32> to vector<8x32xf32>
    %386 = vector.extract_strided_slice %381 {offsets = [0, 96], sizes = [8, 32], strides = [1, 1]} : vector<8x128xf32> to vector<8x32xf32>
    %387 = arith.mulf %384, %376 : vector<8x32xf32>
    %388 = arith.mulf %383, %385 : vector<8x32xf32>
    %389 = arith.addf %387, %388 : vector<8x32xf32>
    %390 = math.tanh %389 : vector<8x32xf32>
    %391 = arith.mulf %386, %390 : vector<8x32xf32>
    %392 = vector.broadcast %c4_i32 : i32 to vector<8x1xi32>
    %393 = arith.cmpi slt, %392, %23 : vector<8x1xi32>
    %394 = vector.broadcast %345 : i32 to vector<8x1xi32>
    %395 = arith.cmpi slt, %394, %23 : vector<8x1xi32>
    %396 = vector.extract_strided_slice %346 {offsets = [0, 0], sizes = [8, 32], strides = [1, 1]} : vector<8x64xf32> to vector<8x32xf32>
    %397 = vector.shape_cast %393 : vector<8x1xi1> to vector<8x1xi1>
    %398 = vector.broadcast %397 : vector<8x1xi1> to vector<8x32xi1>
    %399 = arith.select %398, %375, %396 : vector<8x32xi1>, vector<8x32xf32>
    %400 = vector.extract_strided_slice %347 {offsets = [0, 0], sizes = [8, 32], strides = [1, 1]} : vector<8x64xf32> to vector<8x32xf32>
    %401 = vector.shape_cast %393 : vector<8x1xi1> to vector<8x1xi1>
    %402 = vector.broadcast %401 : vector<8x1xi1> to vector<8x32xi1>
    %403 = arith.select %402, %373, %400 : vector<8x32xi1>, vector<8x32xf32>
    %404 = vector.extract_strided_slice %346 {offsets = [0, 32], sizes = [8, 32], strides = [1, 1]} : vector<8x64xf32> to vector<8x32xf32>
    %405 = vector.shape_cast %395 : vector<8x1xi1> to vector<8x1xi1>
    %406 = vector.broadcast %405 : vector<8x1xi1> to vector<8x32xi1>
    %407 = arith.select %406, %391, %404 : vector<8x32xi1>, vector<8x32xf32>
    %408 = vector.extract_strided_slice %347 {offsets = [0, 32], sizes = [8, 32], strides = [1, 1]} : vector<8x64xf32> to vector<8x32xf32>
    %409 = vector.shape_cast %395 : vector<8x1xi1> to vector<8x1xi1>
    %410 = vector.broadcast %409 : vector<8x1xi1> to vector<8x32xi1>
    %411 = arith.select %410, %389, %408 : vector<8x32xi1>, vector<8x32xf32>
    %c0_142 = arith.constant 0 : index
    %c0_143 = arith.constant 0 : index
    %412 = vector.load %arg14[%c0_142, %c0_143] : memref<8x64xf32, #tpu.memory_space<vmem>>, vector<8x32xf32>
    tpu.vector_store %arg14[%c0_142, %c0_143], %399 {strides = array<i32>} : memref<8x64xf32, #tpu.memory_space<vmem>>, vector<8x32xf32>,
    %c0_144 = arith.constant 0 : index
    %c32_145 = arith.constant 32 : index
    %413 = vector.load %arg14[%c0_144, %c32_145] : memref<8x64xf32, #tpu.memory_space<vmem>>, vector<8x32xf32>
    tpu.vector_store %arg14[%c0_144, %c32_145], %407 {strides = array<i32>} : memref<8x64xf32, #tpu.memory_space<vmem>>, vector<8x32xf32>,
    %c0_146 = arith.constant 0 : index
    %c0_147 = arith.constant 0 : index
    %414 = vector.load %arg15[%c0_146, %c0_147] : memref<8x64xf32, #tpu.memory_space<vmem>>, vector<8x32xf32>
    tpu.vector_store %arg15[%c0_146, %c0_147], %403 {strides = array<i32>} : memref<8x64xf32, #tpu.memory_space<vmem>>, vector<8x32xf32>,
    %c0_148 = arith.constant 0 : index
    %c32_149 = arith.constant 32 : index
    %415 = vector.load %arg15[%c0_148, %c32_149] : memref<8x64xf32, #tpu.memory_space<vmem>>, vector<8x32xf32>
    tpu.vector_store %arg15[%c0_148, %c32_149], %411 {strides = array<i32>} : memref<8x64xf32, #tpu.memory_space<vmem>>, vector<8x32xf32>,
    %c1_i32_150 = arith.constant 1 : i32
    %416 = vector.broadcast %c1_i32_150 : i32 to vector<8x1xi32>
    %417 = arith.subi %23, %416 : vector<8x1xi32>
    %418 = vector.broadcast %345 : i32 to vector<8x1xi32>
    %419 = arith.cmpi eq, %418, %417 : vector<8x1xi32>
    %c0_151 = arith.constant 0 : index
    %c0_152 = arith.constant 0 : index
    %420 = vector.load %arg16[%c0_151, %c0_152] : memref<8x32xf32, #tpu.memory_space<vmem>>, vector<8x32xf32>
    %421 = vector.shape_cast %419 : vector<8x1xi1> to vector<8x1xi1>
    %422 = vector.broadcast %421 : vector<8x1xi1> to vector<8x32xi1>
    %423 = arith.select %422, %407, %420 : vector<8x32xi1>, vector<8x32xf32>
    %c0_153 = arith.constant 0 : index
    %c0_154 = arith.constant 0 : index
    %424 = vector.load %arg16[%c0_153, %c0_154] : memref<8x32xf32, #tpu.memory_space<vmem>>, vector<8x32xf32>
    tpu.vector_store %arg16[%c0_153, %c0_154], %423 {strides = array<i32>} : memref<8x32xf32, #tpu.memory_space<vmem>>, vector<8x32xf32>,
    %c5_i32 = arith.constant 5 : i32
    %c7_i32_155 = arith.constant 7 : i32
    %425 = arith.subi %c7_i32_155, %c5_i32 : i32
    %c0_156 = arith.constant 0 : index
    %c0_157 = arith.constant 0 : index
    %426 = vector.load %arg14[%c0_156, %c0_157] : memref<8x64xf32, #tpu.memory_space<vmem>>, vector<8x64xf32>
    %c0_158 = arith.constant 0 : index
    %c0_159 = arith.constant 0 : index
    %427 = vector.load %arg15[%c0_158, %c0_159] : memref<8x64xf32, #tpu.memory_space<vmem>>, vector<8x64xf32>
    %428 = arith.truncf %426 : vector<8x64xf32> to vector<8x64xbf16>
    %cst_160 = arith.constant dense<0.000000e+00> : vector<8x256xf32>
    %429 = tpu.matmul %428, %24, %cst_160 {dimension_numbers = #tpu.dot_dimension_numbers<[1], [0], [0], [1], [0, 0, 1, 1], [], []>} : vector<8x64xbf16>, vector<64x256xbf16>, vector<8x256xf32> -> vector<8x256xf32>
    %430 = vector.extract_strided_slice %429 {offsets = [0, 0], sizes = [8, 128], strides = [1, 1]} : vector<8x256xf32> to vector<8x128xf32>
    %431 = arith.index_cast %c5_i32 : i32 to index
    %c0_161 = arith.constant 0 : index
    %c0_162 = arith.constant 0 : index
    %432 = vector.load %arg12[%431, %c0_161, %c0_162] : memref<8x8x128xf32, #tpu.memory_space<vmem>>, vector<1x8x128xf32>
    %433 = vector.shape_cast %432 : vector<1x8x128xf32> to vector<8x128xf32>
    %434 = arith.addf %430, %433 : vector<8x128xf32>
    %435 = vector.extract_strided_slice %429 {offsets = [0, 128], sizes = [8, 128], strides = [1, 1]} : vector<8x256xf32> to vector<8x128xf32>
    %436 = arith.index_cast %425 : i32 to index
    %c0_163 = arith.constant 0 : index
    %c0_164 = arith.constant 0 : index
    %437 = vector.load %arg13[%436, %c0_163, %c0_164] : memref<8x8x128xf32, #tpu.memory_space<vmem>>, vector<1x8x128xf32>
    %438 = vector.shape_cast %437 : vector<1x8x128xf32> to vector<8x128xf32>
    %439 = arith.addf %435, %438 : vector<8x128xf32>
    %440 = vector.extract_strided_slice %427 {offsets = [0, 0], sizes = [8, 32], strides = [1, 1]} : vector<8x64xf32> to vector<8x32xf32>
    %441 = arith.negf %434 : vector<8x128xf32>
    %442 = math.exp %441 : vector<8x128xf32>
    %cst_165 = arith.constant 1.000000e+00 : f32
    %443 = vector.broadcast %cst_165 : f32 to vector<8x128xf32>
    %444 = arith.addf %443, %442 : vector<8x128xf32>
    %445 = arith.divf %443, %444 : vector<8x128xf32>
    %446 = math.tanh %434 : vector<8x128xf32>
    %447 = vector.extract_strided_slice %445 {offsets = [0, 0], sizes = [8, 32], strides = [1, 1]} : vector<8x128xf32> to vector<8x32xf32>
    %448 = vector.extract_strided_slice %445 {offsets = [0, 32], sizes = [8, 32], strides = [1, 1]} : vector<8x128xf32> to vector<8x32xf32>
    %449 = vector.extract_strided_slice %446 {offsets = [0, 64], sizes = [8, 32], strides = [1, 1]} : vector<8x128xf32> to vector<8x32xf32>
    %450 = vector.extract_strided_slice %445 {offsets = [0, 96], sizes = [8, 32], strides = [1, 1]} : vector<8x128xf32> to vector<8x32xf32>
    %451 = arith.mulf %448, %440 : vector<8x32xf32>
    %452 = arith.mulf %447, %449 : vector<8x32xf32>
    %453 = arith.addf %451, %452 : vector<8x32xf32>
    %454 = math.tanh %453 : vector<8x32xf32>
    %455 = arith.mulf %450, %454 : vector<8x32xf32>
    %456 = vector.extract_strided_slice %427 {offsets = [0, 32], sizes = [8, 32], strides = [1, 1]} : vector<8x64xf32> to vector<8x32xf32>
    %457 = arith.negf %439 : vector<8x128xf32>
    %458 = math.exp %457 : vector<8x128xf32>
    %cst_166 = arith.constant 1.000000e+00 : f32
    %459 = vector.broadcast %cst_166 : f32 to vector<8x128xf32>
    %460 = arith.addf %459, %458 : vector<8x128xf32>
    %461 = arith.divf %459, %460 : vector<8x128xf32>
    %462 = math.tanh %439 : vector<8x128xf32>
    %463 = vector.extract_strided_slice %461 {offsets = [0, 0], sizes = [8, 32], strides = [1, 1]} : vector<8x128xf32> to vector<8x32xf32>
    %464 = vector.extract_strided_slice %461 {offsets = [0, 32], sizes = [8, 32], strides = [1, 1]} : vector<8x128xf32> to vector<8x32xf32>
    %465 = vector.extract_strided_slice %462 {offsets = [0, 64], sizes = [8, 32], strides = [1, 1]} : vector<8x128xf32> to vector<8x32xf32>
    %466 = vector.extract_strided_slice %461 {offsets = [0, 96], sizes = [8, 32], strides = [1, 1]} : vector<8x128xf32> to vector<8x32xf32>
    %467 = arith.mulf %464, %456 : vector<8x32xf32>
    %468 = arith.mulf %463, %465 : vector<8x32xf32>
    %469 = arith.addf %467, %468 : vector<8x32xf32>
    %470 = math.tanh %469 : vector<8x32xf32>
    %471 = arith.mulf %466, %470 : vector<8x32xf32>
    %472 = vector.broadcast %c5_i32 : i32 to vector<8x1xi32>
    %473 = arith.cmpi slt, %472, %23 : vector<8x1xi32>
    %474 = vector.broadcast %425 : i32 to vector<8x1xi32>
    %475 = arith.cmpi slt, %474, %23 : vector<8x1xi32>
    %476 = vector.extract_strided_slice %426 {offsets = [0, 0], sizes = [8, 32], strides = [1, 1]} : vector<8x64xf32> to vector<8x32xf32>
    %477 = vector.shape_cast %473 : vector<8x1xi1> to vector<8x1xi1>
    %478 = vector.broadcast %477 : vector<8x1xi1> to vector<8x32xi1>
    %479 = arith.select %478, %455, %476 : vector<8x32xi1>, vector<8x32xf32>
    %480 = vector.extract_strided_slice %427 {offsets = [0, 0], sizes = [8, 32], strides = [1, 1]} : vector<8x64xf32> to vector<8x32xf32>
    %481 = vector.shape_cast %473 : vector<8x1xi1> to vector<8x1xi1>
    %482 = vector.broadcast %481 : vector<8x1xi1> to vector<8x32xi1>
    %483 = arith.select %482, %453, %480 : vector<8x32xi1>, vector<8x32xf32>
    %484 = vector.extract_strided_slice %426 {offsets = [0, 32], sizes = [8, 32], strides = [1, 1]} : vector<8x64xf32> to vector<8x32xf32>
    %485 = vector.shape_cast %475 : vector<8x1xi1> to vector<8x1xi1>
    %486 = vector.broadcast %485 : vector<8x1xi1> to vector<8x32xi1>
    %487 = arith.select %486, %471, %484 : vector<8x32xi1>, vector<8x32xf32>
    %488 = vector.extract_strided_slice %427 {offsets = [0, 32], sizes = [8, 32], strides = [1, 1]} : vector<8x64xf32> to vector<8x32xf32>
    %489 = vector.shape_cast %475 : vector<8x1xi1> to vector<8x1xi1>
    %490 = vector.broadcast %489 : vector<8x1xi1> to vector<8x32xi1>
    %491 = arith.select %490, %469, %488 : vector<8x32xi1>, vector<8x32xf32>
    %c0_167 = arith.constant 0 : index
    %c0_168 = arith.constant 0 : index
    %492 = vector.load %arg14[%c0_167, %c0_168] : memref<8x64xf32, #tpu.memory_space<vmem>>, vector<8x32xf32>
    tpu.vector_store %arg14[%c0_167, %c0_168], %479 {strides = array<i32>} : memref<8x64xf32, #tpu.memory_space<vmem>>, vector<8x32xf32>,
    %c0_169 = arith.constant 0 : index
    %c32_170 = arith.constant 32 : index
    %493 = vector.load %arg14[%c0_169, %c32_170] : memref<8x64xf32, #tpu.memory_space<vmem>>, vector<8x32xf32>
    tpu.vector_store %arg14[%c0_169, %c32_170], %487 {strides = array<i32>} : memref<8x64xf32, #tpu.memory_space<vmem>>, vector<8x32xf32>,
    %c0_171 = arith.constant 0 : index
    %c0_172 = arith.constant 0 : index
    %494 = vector.load %arg15[%c0_171, %c0_172] : memref<8x64xf32, #tpu.memory_space<vmem>>, vector<8x32xf32>
    tpu.vector_store %arg15[%c0_171, %c0_172], %483 {strides = array<i32>} : memref<8x64xf32, #tpu.memory_space<vmem>>, vector<8x32xf32>,
    %c0_173 = arith.constant 0 : index
    %c32_174 = arith.constant 32 : index
    %495 = vector.load %arg15[%c0_173, %c32_174] : memref<8x64xf32, #tpu.memory_space<vmem>>, vector<8x32xf32>
    tpu.vector_store %arg15[%c0_173, %c32_174], %491 {strides = array<i32>} : memref<8x64xf32, #tpu.memory_space<vmem>>, vector<8x32xf32>,
    %c1_i32_175 = arith.constant 1 : i32
    %496 = vector.broadcast %c1_i32_175 : i32 to vector<8x1xi32>
    %497 = arith.subi %23, %496 : vector<8x1xi32>
    %498 = vector.broadcast %425 : i32 to vector<8x1xi32>
    %499 = arith.cmpi eq, %498, %497 : vector<8x1xi32>
    %c0_176 = arith.constant 0 : index
    %c0_177 = arith.constant 0 : index
    %500 = vector.load %arg16[%c0_176, %c0_177] : memref<8x32xf32, #tpu.memory_space<vmem>>, vector<8x32xf32>
    %501 = vector.shape_cast %499 : vector<8x1xi1> to vector<8x1xi1>
    %502 = vector.broadcast %501 : vector<8x1xi1> to vector<8x32xi1>
    %503 = arith.select %502, %487, %500 : vector<8x32xi1>, vector<8x32xf32>
    %c0_178 = arith.constant 0 : index
    %c0_179 = arith.constant 0 : index
    %504 = vector.load %arg16[%c0_178, %c0_179] : memref<8x32xf32, #tpu.memory_space<vmem>>, vector<8x32xf32>
    tpu.vector_store %arg16[%c0_178, %c0_179], %503 {strides = array<i32>} : memref<8x32xf32, #tpu.memory_space<vmem>>, vector<8x32xf32>,
    %c6_i32 = arith.constant 6 : i32
    %c7_i32_180 = arith.constant 7 : i32
    %505 = arith.subi %c7_i32_180, %c6_i32 : i32
    %c0_181 = arith.constant 0 : index
    %c0_182 = arith.constant 0 : index
    %506 = vector.load %arg14[%c0_181, %c0_182] : memref<8x64xf32, #tpu.memory_space<vmem>>, vector<8x64xf32>
    %c0_183 = arith.constant 0 : index
    %c0_184 = arith.constant 0 : index
    %507 = vector.load %arg15[%c0_183, %c0_184] : memref<8x64xf32, #tpu.memory_space<vmem>>, vector<8x64xf32>
    %508 = arith.truncf %506 : vector<8x64xf32> to vector<8x64xbf16>
    %cst_185 = arith.constant dense<0.000000e+00> : vector<8x256xf32>
    %509 = tpu.matmul %508, %24, %cst_185 {dimension_numbers = #tpu.dot_dimension_numbers<[1], [0], [0], [1], [0, 0, 1, 1], [], []>} : vector<8x64xbf16>, vector<64x256xbf16>, vector<8x256xf32> -> vector<8x256xf32>
    %510 = vector.extract_strided_slice %509 {offsets = [0, 0], sizes = [8, 128], strides = [1, 1]} : vector<8x256xf32> to vector<8x128xf32>
    %511 = arith.index_cast %c6_i32 : i32 to index
    %c0_186 = arith.constant 0 : index
    %c0_187 = arith.constant 0 : index
    %512 = vector.load %arg12[%511, %c0_186, %c0_187] : memref<8x8x128xf32, #tpu.memory_space<vmem>>, vector<1x8x128xf32>
    %513 = vector.shape_cast %512 : vector<1x8x128xf32> to vector<8x128xf32>
    %514 = arith.addf %510, %513 : vector<8x128xf32>
    %515 = vector.extract_strided_slice %509 {offsets = [0, 128], sizes = [8, 128], strides = [1, 1]} : vector<8x256xf32> to vector<8x128xf32>
    %516 = arith.index_cast %505 : i32 to index
    %c0_188 = arith.constant 0 : index
    %c0_189 = arith.constant 0 : index
    %517 = vector.load %arg13[%516, %c0_188, %c0_189] : memref<8x8x128xf32, #tpu.memory_space<vmem>>, vector<1x8x128xf32>
    %518 = vector.shape_cast %517 : vector<1x8x128xf32> to vector<8x128xf32>
    %519 = arith.addf %515, %518 : vector<8x128xf32>
    %520 = vector.extract_strided_slice %507 {offsets = [0, 0], sizes = [8, 32], strides = [1, 1]} : vector<8x64xf32> to vector<8x32xf32>
    %521 = arith.negf %514 : vector<8x128xf32>
    %522 = math.exp %521 : vector<8x128xf32>
    %cst_190 = arith.constant 1.000000e+00 : f32
    %523 = vector.broadcast %cst_190 : f32 to vector<8x128xf32>
    %524 = arith.addf %523, %522 : vector<8x128xf32>
    %525 = arith.divf %523, %524 : vector<8x128xf32>
    %526 = math.tanh %514 : vector<8x128xf32>
    %527 = vector.extract_strided_slice %525 {offsets = [0, 0], sizes = [8, 32], strides = [1, 1]} : vector<8x128xf32> to vector<8x32xf32>
    %528 = vector.extract_strided_slice %525 {offsets = [0, 32], sizes = [8, 32], strides = [1, 1]} : vector<8x128xf32> to vector<8x32xf32>
    %529 = vector.extract_strided_slice %526 {offsets = [0, 64], sizes = [8, 32], strides = [1, 1]} : vector<8x128xf32> to vector<8x32xf32>
    %530 = vector.extract_strided_slice %525 {offsets = [0, 96], sizes = [8, 32], strides = [1, 1]} : vector<8x128xf32> to vector<8x32xf32>
    %531 = arith.mulf %528, %520 : vector<8x32xf32>
    %532 = arith.mulf %527, %529 : vector<8x32xf32>
    %533 = arith.addf %531, %532 : vector<8x32xf32>
    %534 = math.tanh %533 : vector<8x32xf32>
    %535 = arith.mulf %530, %534 : vector<8x32xf32>
    %536 = vector.extract_strided_slice %507 {offsets = [0, 32], sizes = [8, 32], strides = [1, 1]} : vector<8x64xf32> to vector<8x32xf32>
    %537 = arith.negf %519 : vector<8x128xf32>
    %538 = math.exp %537 : vector<8x128xf32>
    %cst_191 = arith.constant 1.000000e+00 : f32
    %539 = vector.broadcast %cst_191 : f32 to vector<8x128xf32>
    %540 = arith.addf %539, %538 : vector<8x128xf32>
    %541 = arith.divf %539, %540 : vector<8x128xf32>
    %542 = math.tanh %519 : vector<8x128xf32>
    %543 = vector.extract_strided_slice %541 {offsets = [0, 0], sizes = [8, 32], strides = [1, 1]} : vector<8x128xf32> to vector<8x32xf32>
    %544 = vector.extract_strided_slice %541 {offsets = [0, 32], sizes = [8, 32], strides = [1, 1]} : vector<8x128xf32> to vector<8x32xf32>
    %545 = vector.extract_strided_slice %542 {offsets = [0, 64], sizes = [8, 32], strides = [1, 1]} : vector<8x128xf32> to vector<8x32xf32>
    %546 = vector.extract_strided_slice %541 {offsets = [0, 96], sizes = [8, 32], strides = [1, 1]} : vector<8x128xf32> to vector<8x32xf32>
    %547 = arith.mulf %544, %536 : vector<8x32xf32>
    %548 = arith.mulf %543, %545 : vector<8x32xf32>
    %549 = arith.addf %547, %548 : vector<8x32xf32>
    %550 = math.tanh %549 : vector<8x32xf32>
    %551 = arith.mulf %546, %550 : vector<8x32xf32>
    %552 = vector.broadcast %c6_i32 : i32 to vector<8x1xi32>
    %553 = arith.cmpi slt, %552, %23 : vector<8x1xi32>
    %554 = vector.broadcast %505 : i32 to vector<8x1xi32>
    %555 = arith.cmpi slt, %554, %23 : vector<8x1xi32>
    %556 = vector.extract_strided_slice %506 {offsets = [0, 0], sizes = [8, 32], strides = [1, 1]} : vector<8x64xf32> to vector<8x32xf32>
    %557 = vector.shape_cast %553 : vector<8x1xi1> to vector<8x1xi1>
    %558 = vector.broadcast %557 : vector<8x1xi1> to vector<8x32xi1>
    %559 = arith.select %558, %535, %556 : vector<8x32xi1>, vector<8x32xf32>
    %560 = vector.extract_strided_slice %507 {offsets = [0, 0], sizes = [8, 32], strides = [1, 1]} : vector<8x64xf32> to vector<8x32xf32>
    %561 = vector.shape_cast %553 : vector<8x1xi1> to vector<8x1xi1>
    %562 = vector.broadcast %561 : vector<8x1xi1> to vector<8x32xi1>
    %563 = arith.select %562, %533, %560 : vector<8x32xi1>, vector<8x32xf32>
    %564 = vector.extract_strided_slice %506 {offsets = [0, 32], sizes = [8, 32], strides = [1, 1]} : vector<8x64xf32> to vector<8x32xf32>
    %565 = vector.shape_cast %555 : vector<8x1xi1> to vector<8x1xi1>
    %566 = vector.broadcast %565 : vector<8x1xi1> to vector<8x32xi1>
    %567 = arith.select %566, %551, %564 : vector<8x32xi1>, vector<8x32xf32>
    %568 = vector.extract_strided_slice %507 {offsets = [0, 32], sizes = [8, 32], strides = [1, 1]} : vector<8x64xf32> to vector<8x32xf32>
    %569 = vector.shape_cast %555 : vector<8x1xi1> to vector<8x1xi1>
    %570 = vector.broadcast %569 : vector<8x1xi1> to vector<8x32xi1>
    %571 = arith.select %570, %549, %568 : vector<8x32xi1>, vector<8x32xf32>
    %c0_192 = arith.constant 0 : index
    %c0_193 = arith.constant 0 : index
    %572 = vector.load %arg14[%c0_192, %c0_193] : memref<8x64xf32, #tpu.memory_space<vmem>>, vector<8x32xf32>
    tpu.vector_store %arg14[%c0_192, %c0_193], %559 {strides = array<i32>} : memref<8x64xf32, #tpu.memory_space<vmem>>, vector<8x32xf32>,
    %c0_194 = arith.constant 0 : index
    %c32_195 = arith.constant 32 : index
    %573 = vector.load %arg14[%c0_194, %c32_195] : memref<8x64xf32, #tpu.memory_space<vmem>>, vector<8x32xf32>
    tpu.vector_store %arg14[%c0_194, %c32_195], %567 {strides = array<i32>} : memref<8x64xf32, #tpu.memory_space<vmem>>, vector<8x32xf32>,
    %c0_196 = arith.constant 0 : index
    %c0_197 = arith.constant 0 : index
    %574 = vector.load %arg15[%c0_196, %c0_197] : memref<8x64xf32, #tpu.memory_space<vmem>>, vector<8x32xf32>
    tpu.vector_store %arg15[%c0_196, %c0_197], %563 {strides = array<i32>} : memref<8x64xf32, #tpu.memory_space<vmem>>, vector<8x32xf32>,
    %c0_198 = arith.constant 0 : index
    %c32_199 = arith.constant 32 : index
    %575 = vector.load %arg15[%c0_198, %c32_199] : memref<8x64xf32, #tpu.memory_space<vmem>>, vector<8x32xf32>
    tpu.vector_store %arg15[%c0_198, %c32_199], %571 {strides = array<i32>} : memref<8x64xf32, #tpu.memory_space<vmem>>, vector<8x32xf32>,
    %c1_i32_200 = arith.constant 1 : i32
    %576 = vector.broadcast %c1_i32_200 : i32 to vector<8x1xi32>
    %577 = arith.subi %23, %576 : vector<8x1xi32>
    %578 = vector.broadcast %505 : i32 to vector<8x1xi32>
    %579 = arith.cmpi eq, %578, %577 : vector<8x1xi32>
    %c0_201 = arith.constant 0 : index
    %c0_202 = arith.constant 0 : index
    %580 = vector.load %arg16[%c0_201, %c0_202] : memref<8x32xf32, #tpu.memory_space<vmem>>, vector<8x32xf32>
    %581 = vector.shape_cast %579 : vector<8x1xi1> to vector<8x1xi1>
    %582 = vector.broadcast %581 : vector<8x1xi1> to vector<8x32xi1>
    %583 = arith.select %582, %567, %580 : vector<8x32xi1>, vector<8x32xf32>
    %c0_203 = arith.constant 0 : index
    %c0_204 = arith.constant 0 : index
    %584 = vector.load %arg16[%c0_203, %c0_204] : memref<8x32xf32, #tpu.memory_space<vmem>>, vector<8x32xf32>
    tpu.vector_store %arg16[%c0_203, %c0_204], %583 {strides = array<i32>} : memref<8x32xf32, #tpu.memory_space<vmem>>, vector<8x32xf32>,
    %c7_i32_205 = arith.constant 7 : i32
    %c7_i32_206 = arith.constant 7 : i32
    %585 = arith.subi %c7_i32_206, %c7_i32_205 : i32
    %c0_207 = arith.constant 0 : index
    %c0_208 = arith.constant 0 : index
    %586 = vector.load %arg14[%c0_207, %c0_208] : memref<8x64xf32, #tpu.memory_space<vmem>>, vector<8x64xf32>
    %c0_209 = arith.constant 0 : index
    %c0_210 = arith.constant 0 : index
    %587 = vector.load %arg15[%c0_209, %c0_210] : memref<8x64xf32, #tpu.memory_space<vmem>>, vector<8x64xf32>
    %588 = arith.truncf %586 : vector<8x64xf32> to vector<8x64xbf16>
    %cst_211 = arith.constant dense<0.000000e+00> : vector<8x256xf32>
    %589 = tpu.matmul %588, %24, %cst_211 {dimension_numbers = #tpu.dot_dimension_numbers<[1], [0], [0], [1], [0, 0, 1, 1], [], []>} : vector<8x64xbf16>, vector<64x256xbf16>, vector<8x256xf32> -> vector<8x256xf32>
    %590 = vector.extract_strided_slice %589 {offsets = [0, 0], sizes = [8, 128], strides = [1, 1]} : vector<8x256xf32> to vector<8x128xf32>
    %591 = arith.index_cast %c7_i32_205 : i32 to index
    %c0_212 = arith.constant 0 : index
    %c0_213 = arith.constant 0 : index
    %592 = vector.load %arg12[%591, %c0_212, %c0_213] : memref<8x8x128xf32, #tpu.memory_space<vmem>>, vector<1x8x128xf32>
    %593 = vector.shape_cast %592 : vector<1x8x128xf32> to vector<8x128xf32>
    %594 = arith.addf %590, %593 : vector<8x128xf32>
    %595 = vector.extract_strided_slice %589 {offsets = [0, 128], sizes = [8, 128], strides = [1, 1]} : vector<8x256xf32> to vector<8x128xf32>
    %596 = arith.index_cast %585 : i32 to index
    %c0_214 = arith.constant 0 : index
    %c0_215 = arith.constant 0 : index
    %597 = vector.load %arg13[%596, %c0_214, %c0_215] : memref<8x8x128xf32, #tpu.memory_space<vmem>>, vector<1x8x128xf32>
    %598 = vector.shape_cast %597 : vector<1x8x128xf32> to vector<8x128xf32>
    %599 = arith.addf %595, %598 : vector<8x128xf32>
    %600 = vector.extract_strided_slice %587 {offsets = [0, 0], sizes = [8, 32], strides = [1, 1]} : vector<8x64xf32> to vector<8x32xf32>
    %601 = arith.negf %594 : vector<8x128xf32>
    %602 = math.exp %601 : vector<8x128xf32>
    %cst_216 = arith.constant 1.000000e+00 : f32
    %603 = vector.broadcast %cst_216 : f32 to vector<8x128xf32>
    %604 = arith.addf %603, %602 : vector<8x128xf32>
    %605 = arith.divf %603, %604 : vector<8x128xf32>
    %606 = math.tanh %594 : vector<8x128xf32>
    %607 = vector.extract_strided_slice %605 {offsets = [0, 0], sizes = [8, 32], strides = [1, 1]} : vector<8x128xf32> to vector<8x32xf32>
    %608 = vector.extract_strided_slice %605 {offsets = [0, 32], sizes = [8, 32], strides = [1, 1]} : vector<8x128xf32> to vector<8x32xf32>
    %609 = vector.extract_strided_slice %606 {offsets = [0, 64], sizes = [8, 32], strides = [1, 1]} : vector<8x128xf32> to vector<8x32xf32>
    %610 = vector.extract_strided_slice %605 {offsets = [0, 96], sizes = [8, 32], strides = [1, 1]} : vector<8x128xf32> to vector<8x32xf32>
    %611 = arith.mulf %608, %600 : vector<8x32xf32>
    %612 = arith.mulf %607, %609 : vector<8x32xf32>
    %613 = arith.addf %611, %612 : vector<8x32xf32>
    %614 = math.tanh %613 : vector<8x32xf32>
    %615 = arith.mulf %610, %614 : vector<8x32xf32>
    %616 = vector.extract_strided_slice %587 {offsets = [0, 32], sizes = [8, 32], strides = [1, 1]} : vector<8x64xf32> to vector<8x32xf32>
    %617 = arith.negf %599 : vector<8x128xf32>
    %618 = math.exp %617 : vector<8x128xf32>
    %cst_217 = arith.constant 1.000000e+00 : f32
    %619 = vector.broadcast %cst_217 : f32 to vector<8x128xf32>
    %620 = arith.addf %619, %618 : vector<8x128xf32>
    %621 = arith.divf %619, %620 : vector<8x128xf32>
    %622 = math.tanh %599 : vector<8x128xf32>
    %623 = vector.extract_strided_slice %621 {offsets = [0, 0], sizes = [8, 32], strides = [1, 1]} : vector<8x128xf32> to vector<8x32xf32>
    %624 = vector.extract_strided_slice %621 {offsets = [0, 32], sizes = [8, 32], strides = [1, 1]} : vector<8x128xf32> to vector<8x32xf32>
    %625 = vector.extract_strided_slice %622 {offsets = [0, 64], sizes = [8, 32], strides = [1, 1]} : vector<8x128xf32> to vector<8x32xf32>
    %626 = vector.extract_strided_slice %621 {offsets = [0, 96], sizes = [8, 32], strides = [1, 1]} : vector<8x128xf32> to vector<8x32xf32>
    %627 = arith.mulf %624, %616 : vector<8x32xf32>
    %628 = arith.mulf %623, %625 : vector<8x32xf32>
    %629 = arith.addf %627, %628 : vector<8x32xf32>
    %630 = math.tanh %629 : vector<8x32xf32>
    %631 = arith.mulf %626, %630 : vector<8x32xf32>
    %632 = vector.broadcast %c7_i32_205 : i32 to vector<8x1xi32>
    %633 = arith.cmpi slt, %632, %23 : vector<8x1xi32>
    %634 = vector.broadcast %585 : i32 to vector<8x1xi32>
    %635 = arith.cmpi slt, %634, %23 : vector<8x1xi32>
    %636 = vector.extract_strided_slice %586 {offsets = [0, 0], sizes = [8, 32], strides = [1, 1]} : vector<8x64xf32> to vector<8x32xf32>
    %637 = vector.shape_cast %633 : vector<8x1xi1> to vector<8x1xi1>
    %638 = vector.broadcast %637 : vector<8x1xi1> to vector<8x32xi1>
    %639 = arith.select %638, %615, %636 : vector<8x32xi1>, vector<8x32xf32>
    %640 = vector.extract_strided_slice %587 {offsets = [0, 0], sizes = [8, 32], strides = [1, 1]} : vector<8x64xf32> to vector<8x32xf32>
    %641 = vector.shape_cast %633 : vector<8x1xi1> to vector<8x1xi1>
    %642 = vector.broadcast %641 : vector<8x1xi1> to vector<8x32xi1>
    %643 = arith.select %642, %613, %640 : vector<8x32xi1>, vector<8x32xf32>
    %644 = vector.extract_strided_slice %586 {offsets = [0, 32], sizes = [8, 32], strides = [1, 1]} : vector<8x64xf32> to vector<8x32xf32>
    %645 = vector.shape_cast %635 : vector<8x1xi1> to vector<8x1xi1>
    %646 = vector.broadcast %645 : vector<8x1xi1> to vector<8x32xi1>
    %647 = arith.select %646, %631, %644 : vector<8x32xi1>, vector<8x32xf32>
    %648 = vector.extract_strided_slice %587 {offsets = [0, 32], sizes = [8, 32], strides = [1, 1]} : vector<8x64xf32> to vector<8x32xf32>
    %649 = vector.shape_cast %635 : vector<8x1xi1> to vector<8x1xi1>
    %650 = vector.broadcast %649 : vector<8x1xi1> to vector<8x32xi1>
    %651 = arith.select %650, %629, %648 : vector<8x32xi1>, vector<8x32xf32>
    %c0_218 = arith.constant 0 : index
    %c0_219 = arith.constant 0 : index
    %652 = vector.load %arg14[%c0_218, %c0_219] : memref<8x64xf32, #tpu.memory_space<vmem>>, vector<8x32xf32>
    tpu.vector_store %arg14[%c0_218, %c0_219], %639 {strides = array<i32>} : memref<8x64xf32, #tpu.memory_space<vmem>>, vector<8x32xf32>,
    %c0_220 = arith.constant 0 : index
    %c32_221 = arith.constant 32 : index
    %653 = vector.load %arg14[%c0_220, %c32_221] : memref<8x64xf32, #tpu.memory_space<vmem>>, vector<8x32xf32>
    tpu.vector_store %arg14[%c0_220, %c32_221], %647 {strides = array<i32>} : memref<8x64xf32, #tpu.memory_space<vmem>>, vector<8x32xf32>,
    %c0_222 = arith.constant 0 : index
    %c0_223 = arith.constant 0 : index
    %654 = vector.load %arg15[%c0_222, %c0_223] : memref<8x64xf32, #tpu.memory_space<vmem>>, vector<8x32xf32>
    tpu.vector_store %arg15[%c0_222, %c0_223], %643 {strides = array<i32>} : memref<8x64xf32, #tpu.memory_space<vmem>>, vector<8x32xf32>,
    %c0_224 = arith.constant 0 : index
    %c32_225 = arith.constant 32 : index
    %655 = vector.load %arg15[%c0_224, %c32_225] : memref<8x64xf32, #tpu.memory_space<vmem>>, vector<8x32xf32>
    tpu.vector_store %arg15[%c0_224, %c32_225], %651 {strides = array<i32>} : memref<8x64xf32, #tpu.memory_space<vmem>>, vector<8x32xf32>,
    %c1_i32_226 = arith.constant 1 : i32
    %656 = vector.broadcast %c1_i32_226 : i32 to vector<8x1xi32>
    %657 = arith.subi %23, %656 : vector<8x1xi32>
    %658 = vector.broadcast %585 : i32 to vector<8x1xi32>
    %659 = arith.cmpi eq, %658, %657 : vector<8x1xi32>
    %c0_227 = arith.constant 0 : index
    %c0_228 = arith.constant 0 : index
    %660 = vector.load %arg16[%c0_227, %c0_228] : memref<8x32xf32, #tpu.memory_space<vmem>>, vector<8x32xf32>
    %661 = vector.shape_cast %659 : vector<8x1xi1> to vector<8x1xi1>
    %662 = vector.broadcast %661 : vector<8x1xi1> to vector<8x32xi1>
    %663 = arith.select %662, %647, %660 : vector<8x32xi1>, vector<8x32xf32>
    %c0_229 = arith.constant 0 : index
    %c0_230 = arith.constant 0 : index
    %664 = vector.load %arg16[%c0_229, %c0_230] : memref<8x32xf32, #tpu.memory_space<vmem>>, vector<8x32xf32>
    tpu.vector_store %arg16[%c0_229, %c0_230], %663 {strides = array<i32>} : memref<8x32xf32, #tpu.memory_space<vmem>>, vector<8x32xf32>,
    %c8_i32 = arith.constant 8 : i32
    %c0_231 = arith.constant 0 : index
    %c0_232 = arith.constant 0 : index
    %665 = vector.load %arg14[%c0_231, %c0_232] : memref<8x64xf32, #tpu.memory_space<vmem>>, vector<8x64xf32>
    %666 = vector.extract_strided_slice %665 {offsets = [0, 0], sizes = [8, 32], strides = [1, 1]} : vector<8x64xf32> to vector<8x32xf32>
    %c0_233 = arith.constant 0 : index
    %c0_234 = arith.constant 0 : index
    %667 = vector.load %arg9[%c0_233, %c0_234] : memref<64x4xf32, #tpu.memory_space<vmem>>, vector<64x4xf32>
    %668 = vector.extract_strided_slice %667 {offsets = [0, 0], sizes = [32, 4], strides = [1, 1]} : vector<64x4xf32> to vector<32x4xf32>
    %cst_235 = arith.constant dense<0.000000e+00> : vector<8x4xf32>
    %669 = tpu.matmul %666, %668, %cst_235 {dimension_numbers = #tpu.dot_dimension_numbers<[1], [0], [0], [1], [0, 0, 1, 1], [], []>} : vector<8x32xf32>, vector<32x4xf32>, vector<8x4xf32> -> vector<8x4xf32>
    %c0_236 = arith.constant 0 : index
    %c0_237 = arith.constant 0 : index
    %670 = vector.load %arg16[%c0_236, %c0_237] : memref<8x32xf32, #tpu.memory_space<vmem>>, vector<8x32xf32>
    %671 = vector.extract_strided_slice %667 {offsets = [32, 0], sizes = [32, 4], strides = [1, 1]} : vector<64x4xf32> to vector<32x4xf32>
    %cst_238 = arith.constant dense<0.000000e+00> : vector<8x4xf32>
    %672 = tpu.matmul %670, %671, %cst_238 {dimension_numbers = #tpu.dot_dimension_numbers<[1], [0], [0], [1], [0, 0, 1, 1], [], []>} : vector<8x32xf32>, vector<32x4xf32>, vector<8x4xf32> -> vector<8x4xf32>
    %673 = arith.addf %669, %672 : vector<8x4xf32>
    %c0_239 = arith.constant 0 : index
    %c0_240 = arith.constant 0 : index
    %674 = vector.load %arg10[%c0_239, %c0_240] : memref<1x4xf32, #tpu.memory_space<vmem>>, vector<1x4xf32>
    %675 = vector.broadcast %674 : vector<1x4xf32> to vector<8x4xf32>
    %676 = arith.addf %673, %675 : vector<8x4xf32>
    %cst_241 = arith.constant dense<0xFF800000> : vector<8xf32>
    %677 = vector.multi_reduction <maximumf>, %676, %cst_241 [1] : vector<8x4xf32> to vector<8xf32>
    %678 = vector.shape_cast %677 : vector<8xf32> to vector<8x1xf32>
    %679 = vector.broadcast %678 : vector<8x1xf32> to vector<8x4xf32>
    %680 = arith.subf %676, %679 : vector<8x4xf32>
    %681 = math.exp %680 : vector<8x4xf32>
    %cst_242 = arith.constant dense<0.000000e+00> : vector<8xf32>
    %682 = vector.multi_reduction <add>, %681, %cst_242 [1] : vector<8x4xf32> to vector<8xf32>
    %683 = vector.shape_cast %682 : vector<8xf32> to vector<8x1xf32>
    %684 = vector.broadcast %683 : vector<8x1xf32> to vector<8x4xf32>
    %685 = arith.divf %681, %684 : vector<8x4xf32>
    %c0_243 = arith.constant 0 : index
    %c0_244 = arith.constant 0 : index
    %686 = vector.load %arg11[%c0_243, %c0_244] : memref<8x4xf32, #tpu.memory_space<vmem>>, vector<8x4xf32>
    tpu.vector_store %arg11[%c0_243, %c0_244], %685 {strides = array<i32>} : memref<8x4xf32, #tpu.memory_space<vmem>>, vector<8x4xf32>,
    return
  }
}

</mosaic_0001>

<bundles_post_ra>
// kernel: net_forward.2
= control target key start
LH: loop header
LB: loop body
LE: loop exit
PB: predicated region body
PF: predicated region fallthrough
CT: control target
= control target key end

     0   :  { %v1661_v1 = vmov 0   ;;  %vm65_vm0 = vcmask 130048   ;;  %vm34_vm1 = vcmask 523264   ;;  %s1662_s22 = smov 32   ;;  %vm419_vm6 = vcmask 261120   ;;  %s2288_s4 = inlined_call_operand.vmem [shape: bf16[16,128], index: 4, kind: input, shape index: {}]   ;;  %s2289_s0 = inlined_call_operand.vmem [shape: f32[8,8,16], index: 0, kind: input, shape index: {}]   ;;  %s2290_s6 = inlined_call_operand.vmem [shape: bf16[64,256], index: 6, kind: input, shape index: {}]   ;;  %s2291_s5 = inlined_call_operand.vmem [shape: bf16[16,128], index: 5, kind: input, shape index: {}]   ;;  %s2292_s2 = inlined_call_operand.vmem [shape: f32[8,64], index: 2, kind: input, shape index: {}]   ;;  %s2293_s3 = inlined_call_operand.vmem [shape: f32[8,64], index: 3, kind: input, shape index: {}]   ;;  %s2294_s7 = inlined_call_operand.vmem [shape: f32[1,128], index: 7, kind: input, shape index: {}]   ;;  %s2295_s8 = inlined_call_operand.vmem [shape: f32[1,128], index: 8, kind: input, shape index: {}]   ;;  %s2296_s1 = inlined_call_operand.vmem [shape: s32[8,1], index: 1, kind: input, shape index: {}]   ;;  %s2297_s9 = inlined_call_operand.vmem [shape: f32[8,8,64], index: 9, kind: output, shape index: {}]  }
   0x1   :  { %v1513_v0 = vld [vmem:[%s2288_s4] sm:$0xff]   ;;  %1511 = vset.pattern.permute.xlu1 %v1661_v1  ;;  %1512 = vset.pattern.permute.xlu0 %v1661_v1  ;;  %v39_v3 = vld [vmem:[%s2289_s0 + $0x8] sm:$0xff]  ;;  %v40_v4 = vld [vmem:[%s2289_s0 + $0x10] sm:$0xff]  ;;  %vm425_vm7 = vcmask 523520  }
   0x2   :  { %v38_v2 = vld [vmem:[%s2289_s0] sm:$0xff]  ;;  %1487 = vmatprep.subr.bf16.mxu0 %v1513_v0  ;;  %v41_v6 = vld [vmem:[%s2289_s0 + $0x18] sm:$0xff]  ;;  %v43_v14 = vld [vmem:[%s2289_s0 + $0x28] sm:$0xff] }
   0x3   :  { %v46_v5 = vpack.c.bf16 %v39_v3, %v38_v2  ;;  %1488 = vmatpush3.bf16.msra.mxu0 %v1513_v0  ;;  %v47_v7 = vpack.c.bf16 %v41_v6, %v40_v4  ;;  %v1735_v8 = vld [vmem:[%s2290_s6 + $0x4] ss:$8 sps:$4 sm:$0xff]   ;;  %v1744_v10 = vld [vmem:[%s2290_s6] ss:$8 sps:$4 sm:$0xff]   ;;  %v1751_v11 = vld [vmem:[%s2290_s6 + $0x14] ss:$8 sps:$4 sm:$0xff]  }
   0x4   :  { %v1516_v9 = vld [vmem:[%s2291_s5] sm:$0xff]   ;;  %294 = vmatprep.subr.bf16.mxu0 %v1735_v8  ;;  %v1756_v12 = vld [vmem:[%s2290_s6 + $0x10] ss:$8 sps:$4 sm:$0xff]   ;;  %v1800_v23 = vld [vmem:[%s2290_s6 + $0x34] ss:$8 sps:$4 sm:$0xff]  }
   0x5   :  { %1489 = vmatprep.mubr.msk.bf16.mxu0 %vm65_vm0, %v46_v5  ;;  %1499 = vmatprep.mubr.msk.bf16.mxu1 %vm65_vm0, %v46_v5  ;;  %v42_v13 = vld [vmem:[%s2289_s0 + $0x20] sm:$0xff]  ;;  %v44_v15 = vld [vmem:[%s2289_s0 + $0x30] sm:$0xff]  ;;  %v45_v17 = vld [vmem:[%s2289_s0 + $0x38] sm:$0xff] }
   0x6   :  { %1490 = vmatmul.mubr.msk.bf16.vlgmr.msra.gmra.mrb[0].mxu0 %vm65_vm0, %v47_v7  ;;  %1497 = vmatprep.subr.bf16.mxu1 %v1516_v9  ;;  %v48_v16 = vpack.c.bf16 %v43_v14, %v42_v13  ;;  %v1776_v18 = vld [vmem:[%s2290_s6 + $0x24] ss:$8 sps:$4 sm:$0xff]   ;;  %v49_v19 = vpack.c.bf16 %v45_v17, %v44_v15  ;;  %v1791_v22 = vld [vmem:[%s2290_s6 + $0x20] ss:$8 sps:$4 sm:$0xff]   ;;  %v1809_v24 = vld [vmem:[%s2290_s6 + $0x30] ss:$8 sps:$4 sm:$0xff]  }
   0x7   :  { %295 = vmatpush1.bf16.msra.mxu0 %v1744_v10  ;;  %1498 = vmatpush3.bf16.msra.mxu1 %v1516_v9  ;;  %v33_v20 = vld [vmem:[%s2292_s2] sm:$0xff] }
   0x8   :  { %296 = vmatprep.subr.bf16.mxu0 %v1751_v11  ;;  %442 = vmatprep.subr.bf16.mxu1 %v1735_v8  ;;  %v36_v21 = vld [vmem:[%s2293_s3] sm:$0xff]  ;;  %35 = vst.msk [vmem:[#allocation4] sm:$0xff] %vm34_vm1, %v33_v20 }
   0x9   :  { %1493 = vmatprep.mubr.msk.bf16.mxu0 %vm65_vm0, %v48_v16  ;;  %37 = vst.msk [vmem:[#allocation5] sm:$0xff] %vm34_vm1, %v36_v21  ;;  %v1419_v28 = vld [vmem:[%s2294_s7] ss:$0 sm:$0xff]  ;;  %s1663_s7 = smov 64  }
   0xa   :  { %1500 = vmatmul.mubr.msk.bf16.vlgmr.msra.gmra.mrb[0].mxu1 %vm65_vm0, %v47_v7  ;;  %v1425_v33 = vld [vmem:[%s2295_s8] ss:$0 sm:$0xff] }
   0xb   :  { %297 = vmatpush1.bf16.msra.mxu0 %v1756_v12  ;;  %1503 = vmatprep.mubr.msk.bf16.mxu1 %vm65_vm0, %v48_v16  ;;  %v1880_v17 = vld [vmem:[%s2296_s1] sm:$0xff]  ;;  %s1664_s1 = smov 96  }
   0xc   :  { %298 = vmatprep.subr.bf16.mxu0 %v1776_v18  ;;  %443 = vmatpush1.bf16.msra.mxu1 %v1744_v10  ;;  %vm392_vm2 = vcmp.gt.s32.totalorder %v1880_v17, 0  ;;  %vm393_vm3 = vcmp.gt.s32.totalorder %v1880_v17, 7  ;;  %vm541_vm8 = vcmp.gt.s32.totalorder %v1880_v17, 1  ;;  %vm542_vm9 = vcmp.gt.s32.totalorder %v1880_v17, 6 }
   0xd   :  { %444 = vmatprep.subr.bf16.mxu1 %v1751_v11  ;;  %vm689_vm12 = vcmp.gt.s32.totalorder %v1880_v17, 2  ;;  %vm690_vm13 = vcmp.gt.s32.totalorder %v1880_v17, 5 }
   0xe   :  { %1494 = vmatmul.mubr.msk.bf16.gmra.mrb[4].mxu0 %vm65_vm0, %v49_v19 }
   0xf   :  { %299 = vmatpush1.bf16.msra.mxu0 %v1791_v22  ;;  %326 = vmatprep.mubr.bf16.mxu0 %v1661_v1  ;;  %v1816_v25 = vld [vmem:[#allocation4] sm:$0xff] }
  0x10   :  { %300 = vmatprep.subr.bf16.mxu0 %v1800_v23  ;;  %445 = vmatpush1.bf16.msra.mxu1 %v1756_v12  ;;  %v1818_v26 = vld [vmem:[#allocation5] sm:$0xff]  ;;  %v250_v27 = vpack.c.bf16 %v1816_v25, %v1816_v25 }
  0x11   :  { %446 = vmatprep.subr.bf16.mxu1 %v1776_v18  ;;  %348 = vrot.lane.b32.xlu1 %v1818_v26, %s1662_s22 }
  0x12   :  { %1504 = vmatmul.mubr.msk.bf16.gmra.mrb[4].mxu1 %vm65_vm0, %v49_v19  ;;  %vm837_vm0 = vcmp.gt.s32.totalorder %v1880_v17, 3 }
  0x13   :  { %301 = vmatpush1.bf16.msra.mxu0 %v1809_v24  ;;  %474 = vmatprep.mubr.bf16.mxu1 %v1661_v1 }
  0x14   :  { %447 = vmatpush1.bf16.msra.mxu1 %v1791_v22  ;;  %590 = vmatprep.subr.bf16.mxu0 %v1735_v8 }
  0x15   :  { %448 = vmatprep.subr.bf16.mxu1 %v1800_v23 }
  0x16   :  { %1439 = vmatmul.mubr.msk.bf16.vlgmr.msra.gmra.mrb[8].mxu0 %vm34_vm1, %v250_v27 }
  0x17   :  { %591 = vmatpush1.bf16.msra.mxu0 %v1744_v10  ;;  %622 = vmatprep.mubr.bf16.mxu0 %v1661_v1 }
  0x18   :  { %449 = vmatpush1.bf16.msra.mxu1 %v1809_v24  ;;  %592 = vmatprep.subr.bf16.mxu0 %v1751_v11 }
  0x19   :  { %738 = vmatprep.subr.bf16.mxu1 %v1735_v8 }
  0x1b   :  { %593 = vmatpush1.bf16.msra.mxu0 %v1756_v12 }
  0x1c   :  { %594 = vmatprep.subr.bf16.mxu0 %v1776_v18 }
  0x1f   :  { %595 = vmatpush1.bf16.msra.mxu0 %v1791_v22 }
  0x20   :  { %596 = vmatprep.subr.bf16.mxu0 %v1800_v23 }
  0x23   :  { %597 = vmatpush1.bf16.msra.mxu0 %v1809_v24 }
  0x24   :  { %886 = vmatprep.subr.bf16.mxu0 %v1735_v8 }
  0xd9   :  { %v1491_v29 = vpop.f32.mrb[0].mxu0 }
  0xda   :  { %v1844_v30 = vadd.f32 %v1491_v29, %v1419_v28  ;;  %v112_v31 = vpop.f32.mrb[1].mxu0  ;;  %v394_v29 = vsel %vm392_vm2, 1, %v1661_v1  ;;  %vm838_vm2 = vcmp.gt.s32.totalorder %v1880_v17, 4 }
  0xdb   :  { %v1492_v32 = vpop.f32.mrb[2].mxu0  ;;  %v113_v58 = vadd.f32 %v1419_v28, %v112_v31 }
  0xdc   :  { %v1849_v34 = vadd.f32 %v1492_v32, %v1419_v28  ;;  %v115_v35 = vpop.f32.mrb[3].mxu0  ;;  %v405_v32 = vsel %vm393_vm3, 1, %v1661_v1 }
  0xdd   :  { %v1851_v36 = vadd.f32 %v1419_v28, %v115_v35  ;;  %v1501_v37 = vpop.f32.mrb[0].mxu1 }
  0xde   :  { %v1853_v38 = vadd.f32 %v1501_v37, %v1425_v33  ;;  %v200_v39 = vpop.f32.mrb[1].mxu1 }
  0xdf   :  { %v1855_v40 = vadd.f32 %v1425_v33, %v200_v39  ;;  %v1502_v41 = vpop.f32.mrb[2].mxu1 }
  0xe0   :  { %v1857_v42 = vadd.f32 %v1502_v41, %v1425_v33  ;;  %v203_v43 = vpop.f32.mrb[3].mxu1 }
  0xe1   :  { %v1495_v44 = vpop.f32.mrb[4].mxu0  ;;  %v1859_v45 = vadd.f32 %v1425_v33, %v203_v43 }
  0xe2   :  { %v1861_v46 = vadd.f32 %v1495_v44, %v1419_v28  ;;  %v128_v47 = vpop.f32.mrb[5].mxu0 }
  0xe3   :  { %v1863_v48 = vadd.f32 %v1419_v28, %v128_v47  ;;  %v1496_v49 = vpop.f32.mrb[6].mxu0 }
  0xe4   :  { %v1865_v50 = vadd.f32 %v1496_v49, %v1419_v28  ;;  %v131_v51 = vpop.f32.mrb[7].mxu0 }
  0xe5   :  { %v1867_v52 = vadd.f32 %v1419_v28, %v131_v51  ;;  %v1505_v53 = vpop.f32.mrb[4].mxu1 }
  0xe6   :  { %v1869_v54 = vadd.f32 %v1505_v53, %v1425_v33  ;;  %v216_v55 = vpop.f32.mrb[5].mxu1 }
  0xe7   :  { %v1871_v56 = vadd.f32 %v1425_v33, %v216_v55  ;;  %v1506_v57 = vpop.f32.mrb[6].mxu1 }
  0xe8   :  { %v228_v59 = vadd.f32 %v1506_v57, %v1425_v33  ;;  %v219_v60 = vpop.f32.mrb[7].mxu1 }
  0xe9   :  { %v328_v61 = vpop.f32.mrb[8].mxu0  ;;  %v1873_v62 = vadd.f32 %v1425_v33, %v219_v60  ;;  %v349_v33 = vpop.permute.xlu1 %348 }
  0xea   :  { %v336_v63 = vadd.f32 %v328_v61, %v113_v58  ;;  %v330_v0 = vpop.f32.mrb[9].mxu0 }
  0xeb   :  { %v339_v2 = vadd.f32 %v330_v0, %v228_v59  ;;  %v332_v3 = vpop.f32.mrb[10].mxu0 }
  0xec   :  { %1527 = vtanh.f32 %v336_v63  ;;  %v333_v4 = vpop.f32.mrb[11].mxu0  ;;  %v1440_v7 = vmul.f32 -1.442695, %v336_v63 }
  0xed   :  { %1529 = vtanh.f32 %v339_v2  ;;  %v1441_v9 = vmul.f32 -1.442695, %v339_v2 }
  0xee   :  { %1531 = vpow2.f32 %v1440_v7 }
  0xef   :  { %1533 = vpow2.f32 %v1441_v9 }
  0xf6   :  { %v1528_v5 = vpop.eup %1527 }
  0xf7   :  { %353 = vrot.lane.b32.xlu0 %v1528_v5, %s1663_s7  ;;  %v1530_v6 = vpop.eup %1529 }
  0xf8   :  { %v1532_v13 = vpop.eup %1531 }
  0xf9   :  { %v343_v14 = vadd.f32 1.0, %v1532_v13  ;;  %v1534_v15 = vpop.eup %1533 }
  0xfa   :  { %v371_v16 = vadd.f32 1.0, %v1534_v15 }
  0xfb   :  { %377 = vrot.lane.b32.xlu0 %v1530_v6, %s1663_s7  ;;  %1535 = vrcp.f32 %v343_v14 }
  0xfc   :  { %1537 = vrcp.f32 %v371_v16 }
 0x105   :  { %v1536_v19 = vpop.eup %1535 }
 0x106   :  { %v1538_v27 = vpop.eup %1537  ;;  %v351_v35 = vmul.f32 %v1536_v19, %v349_v33 }
 0x107   :  { %v375_v41 = vmul.f32 %v1538_v27, %v1818_v26 }
 0x169   :  { %v354_v20 = vpop.permute.xlu0 %353 }
 0x16a   :  { %v356_v21 = vmul.f32 %v1536_v19, %v354_v20 }
 0x16c   :  { %358 = vrot.lane.b32.xlu1 %v356_v21, %s1662_s22 }
 0x16d   :  { %v378_v28 = vpop.permute.xlu0 %377 }
 0x16e   :  { %v380_v31 = vmul.f32 %v1538_v27, %v378_v28 }
 0x170   :  { %382 = vrot.lane.b32.xlu0 %v380_v31, %s1662_s22  ;;  %396 = vperm.xlu1 %1511, %v394_v29  }
 0x174   :  { %407 = vperm.xlu0 %1512, %v405_v32  }
 0x178   :  { %400 = vrot.lane.b32.xlu0 %v1816_v25, %s1664_s1 }
 0x1de   :  { %v359_v37 = vpop.permute.xlu1 %358 }
 0x1df   :  { %v361_v39 = vadd.f32 %v359_v37, %v351_v35 }
 0x1e1   :  { %1539 = vtanh.f32 %v361_v39 }
 0x1e2   :  { %v383_v43 = vpop.permute.xlu0 %382 }
 0x1e3   :  { %v385_v44 = vadd.f32 %v383_v43, %v375_v41  ;;  %v543_v43 = vsel %vm541_vm8, 1, %v1661_v1 }
 0x1e5   :  { %1541 = vtanh.f32 %v385_v44 }
 0x1eb   :  { %v1540_v47 = vpop.eup %1539 }
 0x1ec   :  { %364 = vrot.lane.b32.xlu1 %v1540_v47, %s1663_s7 }
 0x1ef   :  { %v1542_v49 = vpop.eup %1541  ;;  %v1895_v51 = vpop.permute.xlu1 %396 }
 0x1f0   :  { %388 = vrot.lane.b32.xlu1 %v1542_v49, %s1663_s7  ;;  %vm398_vm4 = vcmp.eq.s32.totalorder %v1895_v51, 1 }
 0x1f1   :  { %v404_v63 = vsel %vm398_vm4, %v361_v39, %v349_v33 }
 0x1f3   :  { %v1897_v53 = vpop.permute.xlu0 %407 }
 0x1f4   :  { %410 = vrot.lane.b32.xlu1 %v1816_v25, %s1663_s7  ;;  %vm409_vm5 = vcmp.eq.s32.totalorder %v1897_v53, 1 }
 0x1f5   :  { %v414_v4 = vsel %vm409_vm5, %v385_v44, %v1818_v26  ;;  %v554_v44 = vsel %vm542_vm9, 1, %v1661_v1 }
 0x1f7   :  { %v401_v57 = vpop.permute.xlu0 %400 }
 0x25e   :  { %v365_v55 = vpop.permute.xlu1 %364 }
 0x25f   :  { %v367_v58 = vmul.f32 %v1536_v19, %v365_v55 }
 0x261   :  { %v403_v59 = vsel %vm398_vm4, %v367_v58, %v401_v57 }
 0x262   :  { %416 = vrot.lane.b32.xlu0 %v403_v59, %s1662_s22  ;;  %v389_v60 = vpop.permute.xlu1 %388 }
 0x263   :  { %v391_v61 = vmul.f32 %v1538_v27, %v389_v60 }
 0x266   :  { %428 = vrot.lane.b32.xlu0 %v404_v63, %s1664_s1  ;;  %v411_v25 = vpop.permute.xlu1 %410 }
 0x267   :  { %v413_v0 = vsel %vm409_vm5, %v391_v61, %v411_v25 }
 0x268   :  { %422 = vrot.lane.b32.xlu1 %v413_v0, %s1663_s7 }
 0x2d4   :  { %v417_v2 = vpop.permute.xlu0 %416 }
 0x2d5   :  { %420 = vst.msk [vmem:[#allocation4] sm:$0xff] %vm419_vm6, %v417_v2  ;;  %433 = vst.msk [vmem:[%s2297_s9] sm:$0xff] %vm419_vm6, %v417_v2 }
 0x2d8   :  { %v429_v3 = vpop.permute.xlu0 %428 }
 0x2d9   :  { %431 = vst.msk [vmem:[#allocation5] sm:$0xff] %vm419_vm6, %v429_v3 }
 0x2da   :  { %432 = vst.msk [vmem:[#allocation5] sm:$0xff] %vm425_vm7, %v414_v4  ;;  %v423_v5 = vpop.permute.xlu1 %422 }
 0x2db   :  { %426 = vst.msk [vmem:[#allocation4] sm:$0xff] %vm425_vm7, %v423_v5  ;;  %1442 = vst.msk [vmem:[%s2297_s9 + $0x38] sm:$0xff] %vm425_vm7, %v423_v5 }
 0x2e1   :  { %v1943_v21 = vld [vmem:[#allocation5] sm:$0xff] }
 0x2e2   :  { %v1925_v6 = vld [vmem:[#allocation4] sm:$0xff] }
 0x2e3   :  { %v438_v7 = vpack.c.bf16 %v1925_v6, %v1925_v6 }
 0x2e5   :  { %1443 = vmatmul.mubr.msk.bf16.vlgmr.msra.gmra.mrb[8].mxu1 %vm34_vm1, %v438_v7 }
 0x2e6   :  { %739 = vmatpush1.bf16.msra.mxu1 %v1744_v10  ;;  %770 = vmatprep.mubr.bf16.mxu1 %v1661_v1 }
 0x2e7   :  { %740 = vmatprep.subr.bf16.mxu1 %v1751_v11 }
 0x2ea   :  { %741 = vmatpush1.bf16.msra.mxu1 %v1756_v12 }
 0x2eb   :  { %742 = vmatprep.subr.bf16.mxu1 %v1776_v18 }
 0x2ee   :  { %743 = vmatpush1.bf16.msra.mxu1 %v1791_v22 }
 0x2ef   :  { %744 = vmatprep.subr.bf16.mxu1 %v1800_v23 }
 0x2f2   :  { %745 = vmatpush1.bf16.msra.mxu1 %v1809_v24 }
 0x2f3   :  { %1020 = vmatprep.subr.bf16.mxu1 %v1735_v8 }
 0x3b8   :  { %v476_v26 = vpop.f32.mrb[8].mxu1 }
 0x3b9   :  { %v485_v9 = vadd.f32 %v476_v26, %v1851_v36  ;;  %v478_v13 = vpop.f32.mrb[9].mxu1 }
 0x3ba   :  { %v488_v14 = vadd.f32 %v478_v13, %v1869_v54  ;;  %v480_v15 = vpop.f32.mrb[10].mxu1 }
 0x3bb   :  { %1543 = vtanh.f32 %v485_v9  ;;  %v481_v16 = vpop.f32.mrb[11].mxu1  ;;  %v1444_v27 = vmul.f32 -1.442695, %v485_v9 }
 0x3bc   :  { %1545 = vtanh.f32 %v488_v14  ;;  %v1445_v36 = vmul.f32 -1.442695, %v488_v14 }
 0x3bd   :  { %1547 = vpow2.f32 %v1444_v27 }
 0x3be   :  { %1549 = vpow2.f32 %v1445_v36 }
 0x3c5   :  { %v1544_v19 = vpop.eup %1543 }
 0x3c6   :  { %v1546_v20 = vpop.eup %1545  ;;  %502 = vrot.lane.b32.xlu1 %v1544_v19, %s1663_s7 }
 0x3c7   :  { %526 = vrot.lane.b32.xlu0 %v1546_v20, %s1663_s7  ;;  %v1548_v54 = vpop.eup %1547 }
 0x3c8   :  { %v1550_v28 = vpop.eup %1549  ;;  %v492_v29 = vadd.f32 1.0, %v1548_v54 }
 0x3c9   :  { %v520_v31 = vadd.f32 1.0, %v1550_v28 }
 0x3ca   :  { %497 = vrot.lane.b32.xlu1 %v1943_v21, %s1662_s22  ;;  %1551 = vrcp.f32 %v492_v29 }
 0x3cb   :  { %1553 = vrcp.f32 %v520_v31 }
 0x3d4   :  { %v1552_v32 = vpop.eup %1551 }
 0x3d5   :  { %v1554_v35 = vpop.eup %1553 }
 0x3d6   :  { %v524_v57 = vmul.f32 %v1554_v35, %v1943_v21 }
 0x438   :  { %v503_v33 = vpop.permute.xlu1 %502 }
 0x439   :  { %v505_v37 = vmul.f32 %v1552_v32, %v503_v33  ;;  %v527_v39 = vpop.permute.xlu0 %526 }
 0x43a   :  { %v529_v41 = vmul.f32 %v1554_v35, %v527_v39 }
 0x43b   :  { %507 = vrot.lane.b32.xlu0 %v505_v37, %s1662_s22 }
 0x43c   :  { %531 = vrot.lane.b32.xlu1 %v529_v41, %s1662_s22  ;;  %v498_v47 = vpop.permute.xlu1 %497 }
 0x43d   :  { %v500_v49 = vmul.f32 %v1552_v32, %v498_v47 }
 0x43f   :  { %545 = vperm.xlu0 %1512, %v543_v43  }
 0x440   :  { %556 = vperm.xlu1 %1511, %v554_v44  }
 0x4ad   :  { %v508_v55 = vpop.permute.xlu0 %507 }
 0x4ae   :  { %v510_v58 = vadd.f32 %v508_v55, %v500_v49  ;;  %v532_v59 = vpop.permute.xlu1 %531 }
 0x4af   :  { %v534_v60 = vadd.f32 %v532_v59, %v524_v57  ;;  %v691_v59 = vsel %vm689_vm12, 1, %v1661_v1 }
 0x4b0   :  { %1555 = vtanh.f32 %v510_v58 }
 0x4b1   :  { %1557 = vtanh.f32 %v534_v60 }
 0x4ba   :  { %v1556_v61 = vpop.eup %1555 }
 0x4bb   :  { %v1558_v63 = vpop.eup %1557  ;;  %513 = vrot.lane.b32.xlu0 %v1556_v61, %s1663_s7 }
 0x4bc   :  { %537 = vrot.lane.b32.xlu1 %v1558_v63, %s1663_s7 }
 0x4be   :  { %v1960_v25 = vpop.permute.xlu0 %545 }
 0x4bf   :  { %549 = vrot.lane.b32.xlu0 %v1925_v6, %s1664_s1  ;;  %v1962_v0 = vpop.permute.xlu1 %556  ;;  %vm547_vm10 = vcmp.eq.s32.totalorder %v1960_v25, 1 }
 0x4c0   :  { %559 = vrot.lane.b32.xlu1 %v1925_v6, %s1663_s7  ;;  %vm558_vm11 = vcmp.eq.s32.totalorder %v1962_v0, 1  ;;  %v553_v13 = vsel %vm547_vm10, %v510_v58, %v498_v47 }
 0x4c1   :  { %v563_v19 = vsel %vm558_vm11, %v534_v60, %v1943_v21  ;;  %v702_v60 = vsel %vm690_vm13, 1, %v1661_v1 }
 0x52d   :  { %v514_v2 = vpop.permute.xlu0 %513 }
 0x52e   :  { %v538_v3 = vpop.permute.xlu1 %537  ;;  %v516_v4 = vmul.f32 %v1552_v32, %v514_v2 }
 0x52f   :  { %v540_v5 = vmul.f32 %v1554_v35, %v538_v3 }
 0x531   :  { %v550_v7 = vpop.permute.xlu0 %549 }
 0x532   :  { %v560_v26 = vpop.permute.xlu1 %559  ;;  %v552_v9 = vsel %vm547_vm10, %v516_v4, %v550_v7 }
 0x533   :  { %565 = vrot.lane.b32.xlu0 %v552_v9, %s1662_s22  ;;  %v562_v6 = vsel %vm558_vm11, %v540_v5, %v560_v26 }
 0x534   :  { %570 = vrot.lane.b32.xlu1 %v562_v6, %s1663_s7 }
 0x537   :  { %575 = vrot.lane.b32.xlu0 %v553_v13, %s1664_s1 }
 0x5a5   :  { %v566_v14 = vpop.permute.xlu0 %565 }
 0x5a6   :  { %568 = vst.msk [vmem:[#allocation4] sm:$0xff] %vm419_vm6, %v566_v14  ;;  %1446 = vst.msk [vmem:[%s2297_s9 + $0x8] sm:$0xff] %vm419_vm6, %v566_v14  ;;  %v571_v15 = vpop.permute.xlu1 %570 }
 0x5a7   :  { %573 = vst.msk [vmem:[#allocation4] sm:$0xff] %vm425_vm7, %v571_v15  ;;  %1447 = vst.msk [vmem:[%s2297_s9 + $0x30] sm:$0xff] %vm425_vm7, %v571_v15 }
 0x5a9   :  { %v576_v16 = vpop.permute.xlu0 %575 }
 0x5aa   :  { %578 = vst.msk [vmem:[#allocation5] sm:$0xff] %vm419_vm6, %v576_v16 }
 0x5ab   :  { %579 = vst.msk [vmem:[#allocation5] sm:$0xff] %vm425_vm7, %v563_v19 }
 0x5ae   :  { %v1990_v20 = vld [vmem:[#allocation4] sm:$0xff] }
 0x5af   :  { %v586_v27 = vpack.c.bf16 %v1990_v20, %v1990_v20 }
 0x5b1   :  { %1448 = vmatmul.mubr.msk.bf16.vlgmr.msra.gmra.mrb[12].mxu0 %vm34_vm1, %v586_v27 }
 0x5b2   :  { %887 = vmatpush1.bf16.msra.mxu0 %v1744_v10  ;;  %918 = vmatprep.mubr.bf16.mxu0 %v1661_v1  ;;  %v2008_v35 = vld [vmem:[#allocation5] sm:$0xff] }
 0x5b3   :  { %888 = vmatprep.subr.bf16.mxu0 %v1751_v11 }
 0x5b6   :  { %889 = vmatpush1.bf16.msra.mxu0 %v1756_v12 }
 0x5b7   :  { %890 = vmatprep.subr.bf16.mxu0 %v1776_v18 }
 0x5ba   :  { %891 = vmatpush1.bf16.msra.mxu0 %v1791_v22 }
 0x5bb   :  { %892 = vmatprep.subr.bf16.mxu0 %v1800_v23 }
 0x5be   :  { %893 = vmatpush1.bf16.msra.mxu0 %v1809_v24 }
 0x5bf   :  { %1154 = vmatprep.subr.bf16.mxu0 %v1735_v8 }
 0x684   :  { %v624_v21 = vpop.f32.mrb[12].mxu0 }
 0x685   :  { %v633_v36 = vadd.f32 %v624_v21, %v1844_v30  ;;  %v626_v54 = vpop.f32.mrb[13].mxu0 }
 0x686   :  { %v636_v28 = vadd.f32 %v626_v54, %v1873_v62  ;;  %v628_v29 = vpop.f32.mrb[14].mxu0 }
 0x687   :  { %1559 = vtanh.f32 %v633_v36  ;;  %v629_v31 = vpop.f32.mrb[15].mxu0  ;;  %v1449_v37 = vmul.f32 -1.442695, %v633_v36 }
 0x688   :  { %1561 = vtanh.f32 %v636_v28  ;;  %v1450_v30 = vmul.f32 -1.442695, %v636_v28 }
 0x689   :  { %1563 = vpow2.f32 %v1449_v37 }
 0x68a   :  { %1565 = vpow2.f32 %v1450_v30 }
 0x691   :  { %v1560_v32 = vpop.eup %1559 }
 0x692   :  { %v1562_v33 = vpop.eup %1561  ;;  %650 = vrot.lane.b32.xlu1 %v1560_v32, %s1663_s7 }
 0x693   :  { %674 = vrot.lane.b32.xlu0 %v1562_v33, %s1663_s7  ;;  %v1564_v62 = vpop.eup %1563 }
 0x694   :  { %v1566_v39 = vpop.eup %1565  ;;  %v640_v41 = vadd.f32 1.0, %v1564_v62 }
 0x695   :  { %v668_v43 = vadd.f32 1.0, %v1566_v39 }
 0x696   :  { %645 = vrot.lane.b32.xlu1 %v2008_v35, %s1662_s22  ;;  %1567 = vrcp.f32 %v640_v41 }
 0x697   :  { %1569 = vrcp.f32 %v668_v43 }
 0x6a0   :  { %v1568_v44 = vpop.eup %1567 }
 0x6a1   :  { %v1570_v49 = vpop.eup %1569 }
 0x6a2   :  { %v672_v3 = vmul.f32 %v1570_v49, %v2008_v35 }
 0x704   :  { %v651_v47 = vpop.permute.xlu1 %650 }
 0x705   :  { %v653_v55 = vmul.f32 %v1568_v44, %v651_v47  ;;  %v675_v57 = vpop.permute.xlu0 %674 }
 0x706   :  { %v677_v58 = vmul.f32 %v1570_v49, %v675_v57 }
 0x707   :  { %655 = vrot.lane.b32.xlu0 %v653_v55, %s1662_s22 }
 0x708   :  { %679 = vrot.lane.b32.xlu1 %v677_v58, %s1662_s22  ;;  %v646_v61 = vpop.permute.xlu1 %645 }
 0x709   :  { %v648_v63 = vmul.f32 %v1568_v44, %v646_v61 }
 0x70b   :  { %693 = vperm.xlu0 %1512, %v691_v59  }
 0x70c   :  { %704 = vperm.xlu1 %1511, %v702_v60  }
 0x779   :  { %v656_v2 = vpop.permute.xlu0 %655 }
 0x77a   :  { %v658_v4 = vadd.f32 %v656_v2, %v648_v63  ;;  %v680_v5 = vpop.permute.xlu1 %679 }
 0x77b   :  { %v682_v7 = vadd.f32 %v680_v5, %v672_v3  ;;  %v850_v5 = vsel %vm838_vm2, 1, %v1661_v1 }
 0x77c   :  { %1571 = vtanh.f32 %v658_v4 }
 0x77d   :  { %1573 = vtanh.f32 %v682_v7 }
 0x786   :  { %v1572_v26 = vpop.eup %1571 }
 0x787   :  { %v1574_v9 = vpop.eup %1573  ;;  %661 = vrot.lane.b32.xlu0 %v1572_v26, %s1663_s7 }
 0x788   :  { %685 = vrot.lane.b32.xlu1 %v1574_v9, %s1663_s7 }
 0x78a   :  { %v2025_v6 = vpop.permute.xlu0 %693 }
 0x78b   :  { %697 = vrot.lane.b32.xlu0 %v1990_v20, %s1664_s1  ;;  %v2027_v13 = vpop.permute.xlu1 %704  ;;  %vm695_vm14 = vcmp.eq.s32.totalorder %v2025_v6, 1 }
 0x78c   :  { %707 = vrot.lane.b32.xlu1 %v1990_v20, %s1663_s7  ;;  %vm706_vm15 = vcmp.eq.s32.totalorder %v2027_v13, 1  ;;  %v701_v54 = vsel %vm695_vm14, %v658_v4, %v646_v61  ;;  %v839_v4 = vsel %vm837_vm0, 1, %v1661_v1 }
 0x78d   :  { %v711_v32 = vsel %vm706_vm15, %v682_v7, %v2008_v35 }
 0x7f9   :  { %v662_v14 = vpop.permute.xlu0 %661 }
 0x7fa   :  { %v686_v15 = vpop.permute.xlu1 %685  ;;  %v664_v16 = vmul.f32 %v1568_v44, %v662_v14 }
 0x7fb   :  { %v688_v19 = vmul.f32 %v1570_v49, %v686_v15 }
 0x7fd   :  { %v698_v27 = vpop.permute.xlu0 %697 }
 0x7fe   :  { %v708_v21 = vpop.permute.xlu1 %707  ;;  %v700_v36 = vsel %vm695_vm14, %v664_v16, %v698_v27 }
 0x7ff   :  { %713 = vrot.lane.b32.xlu0 %v700_v36, %s1662_s22  ;;  %v710_v20 = vsel %vm706_vm15, %v688_v19, %v708_v21 }
 0x800   :  { %718 = vrot.lane.b32.xlu1 %v710_v20, %s1663_s7 }
 0x803   :  { %723 = vrot.lane.b32.xlu0 %v701_v54, %s1664_s1 }
 0x871   :  { %v714_v28 = vpop.permute.xlu0 %713 }
 0x872   :  { %716 = vst.msk [vmem:[#allocation4] sm:$0xff] %vm419_vm6, %v714_v28  ;;  %1451 = vst.msk [vmem:[%s2297_s9 + $0x10] sm:$0xff] %vm419_vm6, %v714_v28  ;;  %v719_v29 = vpop.permute.xlu1 %718 }
 0x873   :  { %721 = vst.msk [vmem:[#allocation4] sm:$0xff] %vm425_vm7, %v719_v29  ;;  %1452 = vst.msk [vmem:[%s2297_s9 + $0x28] sm:$0xff] %vm425_vm7, %v719_v29 }
 0x875   :  { %v724_v31 = vpop.permute.xlu0 %723 }
 0x876   :  { %726 = vst.msk [vmem:[#allocation5] sm:$0xff] %vm419_vm6, %v724_v31 }
 0x877   :  { %727 = vst.msk [vmem:[#allocation5] sm:$0xff] %vm425_vm7, %v711_v32 }
 0x87a   :  { %v2055_v33 = vld [vmem:[#allocation4] sm:$0xff] }
 0x87b   :  { %v734_v37 = vpack.c.bf16 %v2055_v33, %v2055_v33 }
 0x87d   :  { %1453 = vmatmul.mubr.msk.bf16.vlgmr.msra.gmra.mrb[12].mxu1 %vm34_vm1, %v734_v37 }
 0x87e   :  { %1021 = vmatpush1.bf16.msra.mxu1 %v1744_v10  ;;  %1052 = vmatprep.mubr.bf16.mxu1 %v1661_v1  ;;  %v2073_v49 = vld [vmem:[#allocation5] sm:$0xff] }
 0x87f   :  { %1022 = vmatprep.subr.bf16.mxu1 %v1751_v11 }
 0x882   :  { %1023 = vmatpush1.bf16.msra.mxu1 %v1756_v12 }
 0x883   :  { %1024 = vmatprep.subr.bf16.mxu1 %v1776_v18 }
 0x886   :  { %1025 = vmatpush1.bf16.msra.mxu1 %v1791_v22 }
 0x887   :  { %1026 = vmatprep.subr.bf16.mxu1 %v1800_v23 }
 0x88a   :  { %1027 = vmatpush1.bf16.msra.mxu1 %v1809_v24 }
 0x88b   :  { %1288 = vmatprep.subr.bf16.mxu1 %v1735_v8 }
 0x950   :  { %v772_v35 = vpop.f32.mrb[12].mxu1 }
 0x951   :  { %v781_v30 = vadd.f32 %v772_v35, %v1849_v34  ;;  %v774_v62 = vpop.f32.mrb[13].mxu1 }
 0x952   :  { %v784_v39 = vadd.f32 %v774_v62, %v1871_v56  ;;  %v776_v41 = vpop.f32.mrb[14].mxu1 }
 0x953   :  { %1575 = vtanh.f32 %v781_v30  ;;  %v777_v43 = vpop.f32.mrb[15].mxu1  ;;  %v1454_v8 = vmul.f32 -1.442695, %v781_v30 }
 0x954   :  { %1577 = vtanh.f32 %v784_v39  ;;  %v1455_v34 = vmul.f32 -1.442695, %v784_v39 }
 0x955   :  { %1579 = vpow2.f32 %v1454_v8 }
 0x956   :  { %1581 = vpow2.f32 %v1455_v34 }
 0x95d   :  { %v1576_v44 = vpop.eup %1575 }
 0x95e   :  { %v1578_v47 = vpop.eup %1577  ;;  %798 = vrot.lane.b32.xlu1 %v1576_v44, %s1663_s7 }
 0x95f   :  { %822 = vrot.lane.b32.xlu0 %v1578_v47, %s1663_s7  ;;  %v1580_v56 = vpop.eup %1579 }
 0x960   :  { %v1582_v55 = vpop.eup %1581  ;;  %v788_v57 = vadd.f32 1.0, %v1580_v56 }
 0x961   :  { %v816_v58 = vadd.f32 1.0, %v1582_v55 }
 0x962   :  { %793 = vrot.lane.b32.xlu1 %v2073_v49, %s1662_s22  ;;  %1583 = vrcp.f32 %v788_v57 }
 0x963   :  { %1585 = vrcp.f32 %v816_v58 }
 0x96c   :  { %v1584_v59 = vpop.eup %1583 }
 0x96d   :  { %v1586_v61 = vpop.eup %1585 }
 0x96e   :  { %v820_v14 = vmul.f32 %v1586_v61, %v2073_v49 }
 0x9d0   :  { %v799_v60 = vpop.permute.xlu1 %798 }
 0x9d1   :  { %v801_v63 = vmul.f32 %v1584_v59, %v799_v60  ;;  %v823_v2 = vpop.permute.xlu0 %822 }
 0x9d2   :  { %v825_v3 = vmul.f32 %v1586_v61, %v823_v2 }
 0x9d3   :  { %803 = vrot.lane.b32.xlu0 %v801_v63, %s1662_s22 }
 0x9d4   :  { %827 = vrot.lane.b32.xlu1 %v825_v3, %s1662_s22  ;;  %v794_v7 = vpop.permute.xlu1 %793 }
 0x9d5   :  { %v796_v26 = vmul.f32 %v1584_v59, %v794_v7 }
 0x9d7   :  { %841 = vperm.xlu0 %1512, %v839_v4  }
 0x9d8   :  { %852 = vperm.xlu1 %1511, %v850_v5  }
 0xa45   :  { %v804_v9 = vpop.permute.xlu0 %803 }
 0xa46   :  { %v806_v15 = vadd.f32 %v804_v9, %v796_v26  ;;  %v828_v16 = vpop.permute.xlu1 %827 }
 0xa47   :  { %v830_v19 = vadd.f32 %v828_v16, %v820_v14 }
 0xa48   :  { %1587 = vtanh.f32 %v806_v15 }
 0xa49   :  { %1589 = vtanh.f32 %v830_v19 }
 0xa52   :  { %v1588_v17 = vpop.eup %1587 }
 0xa53   :  { %v1590_v27 = vpop.eup %1589  ;;  %809 = vrot.lane.b32.xlu0 %v1588_v17, %s1663_s7 }
 0xa54   :  { %833 = vrot.lane.b32.xlu1 %v1590_v27, %s1663_s7 }
 0xa56   :  { %v2090_v21 = vpop.permute.xlu0 %841 }
 0xa57   :  { %845 = vrot.lane.b32.xlu0 %v2055_v33, %s1664_s1  ;;  %v2092_v36 = vpop.permute.xlu1 %852  ;;  %vm843_vm3 = vcmp.eq.s32.totalorder %v2090_v21, 1  ;;  %v1656_v21 = vld [vmem:[%s2290_s6 + $0x14] ss:$8 sps:$4 sm:$0xff]  }
 0xa58   :  { %855 = vrot.lane.b32.xlu1 %v2055_v33, %s1663_s7  ;;  %vm854_vm8 = vcmp.eq.s32.totalorder %v2092_v36, 1  ;;  %v849_v35 = vsel %vm843_vm3, %v806_v15, %v794_v7 }
 0xa59   :  { %v859_v41 = vsel %vm854_vm8, %v830_v19, %v2073_v49 }
 0xac5   :  { %v810_v20 = vpop.permute.xlu0 %809 }
 0xac6   :  { %v834_v54 = vpop.permute.xlu1 %833  ;;  %v812_v28 = vmul.f32 %v1584_v59, %v810_v20 }
 0xac7   :  { %v836_v29 = vmul.f32 %v1586_v61, %v834_v54 }
 0xac9   :  { %v846_v31 = vpop.permute.xlu0 %845 }
 0xaca   :  { %v856_v32 = vpop.permute.xlu1 %855  ;;  %v848_v37 = vsel %vm843_vm3, %v812_v28, %v846_v31 }
 0xacb   :  { %861 = vrot.lane.b32.xlu0 %v848_v37, %s1662_s22  ;;  %v858_v33 = vsel %vm854_vm8, %v836_v29, %v856_v32 }
 0xacc   :  { %866 = vrot.lane.b32.xlu1 %v858_v33, %s1663_s7 }
 0xacf   :  { %871 = vrot.lane.b32.xlu0 %v849_v35, %s1664_s1 }
 0xb3d   :  { %v862_v30 = vpop.permute.xlu0 %861 }
 0xb3e   :  { %864 = vst.msk [vmem:[#allocation4] sm:$0xff] %vm419_vm6, %v862_v30  ;;  %1456 = vst.msk [vmem:[%s2297_s9 + $0x18] sm:$0xff] %vm419_vm6, %v862_v30  ;;  %v867_v62 = vpop.permute.xlu1 %866 }
 0xb3f   :  { %869 = vst.msk [vmem:[#allocation4] sm:$0xff] %vm425_vm7, %v867_v62  ;;  %1457 = vst.msk [vmem:[%s2297_s9 + $0x20] sm:$0xff] %vm425_vm7, %v867_v62 }
 0xb41   :  { %v872_v39 = vpop.permute.xlu0 %871 }
 0xb42   :  { %874 = vst.msk [vmem:[#allocation5] sm:$0xff] %vm419_vm6, %v872_v39  ;;  %v1655_v39 = vld [vmem:[%s2290_s6] ss:$8 sps:$4 sm:$0xff]  }
 0xb43   :  { %875 = vst.msk [vmem:[#allocation5] sm:$0xff] %vm425_vm7, %v859_v41  ;;  %v1657_v41 = vld [vmem:[%s2290_s6 + $0x10] ss:$8 sps:$4 sm:$0xff]  }
 0xb46   :  { %v880_v43 = vld [vmem:[#allocation4] sm:$0xff] }
 0xb47   :  { %v882_v44 = vpack.c.bf16 %v880_v43, %v880_v43 }
 0xb49   :  { %1458 = vmatmul.mubr.msk.bf16.vlgmr.msra.gmra.mrb[16].mxu0 %vm34_vm1, %v882_v44  ;;  %v1659_v44 = vld [vmem:[%s2290_s6 + $0x20] ss:$8 sps:$4 sm:$0xff]  }
 0xb4a   :  { %1155 = vmatpush1.bf16.msra.mxu0 %v1744_v10  ;;  %1186 = vmatprep.mubr.bf16.mxu0 %v1661_v1 }
 0xb4b   :  { %1156 = vmatprep.subr.bf16.mxu0 %v1751_v11 }
 0xb4e   :  { %1157 = vmatpush1.bf16.msra.mxu0 %v1756_v12 }
 0xb4f   :  { %1158 = vmatprep.subr.bf16.mxu0 %v1776_v18  ;;  %v881_v18 = vld [vmem:[#allocation5] sm:$0xff] }
 0xb52   :  { %1159 = vmatpush1.bf16.msra.mxu0 %v1791_v22 }
 0xb53   :  { %1160 = vmatprep.subr.bf16.mxu0 %v1800_v23 }
 0xb56   :  { %1161 = vmatpush1.bf16.msra.mxu0 %v1809_v24 }
 0xc1c   :  { %v920_v47 = vpop.f32.mrb[16].mxu0 }
 0xc1d   :  { %v929_v49 = vadd.f32 %v920_v47, %v1863_v48  ;;  %v922_v8 = vpop.f32.mrb[17].mxu0 }
 0xc1e   :  { %v932_v10 = vadd.f32 %v922_v8, %v1857_v42  ;;  %v924_v34 = vpop.f32.mrb[18].mxu0 }
 0xc1f   :  { %1591 = vtanh.f32 %v929_v49  ;;  %v925_v56 = vpop.f32.mrb[19].mxu0  ;;  %v1459_v22 = vmul.f32 -1.442695, %v929_v49 }
 0xc20   :  { %1593 = vtanh.f32 %v932_v10  ;;  %v1460_v23 = vmul.f32 -1.442695, %v932_v10 }
 0xc21   :  { %1595 = vpow2.f32 %v1459_v22 }
 0xc22   :  { %1597 = vpow2.f32 %v1460_v23 }
 0xc29   :  { %v1592_v11 = vpop.eup %1591 }
 0xc2a   :  { %v1594_v12 = vpop.eup %1593  ;;  %946 = vrot.lane.b32.xlu1 %v1592_v11, %s1663_s7 }
 0xc2b   :  { %970 = vrot.lane.b32.xlu0 %v1594_v12, %s1663_s7  ;;  %v1596_v48 = vpop.eup %1595 }
 0xc2c   :  { %v1598_v55 = vpop.eup %1597  ;;  %v936_v42 = vadd.f32 1.0, %v1596_v48 }
 0xc2d   :  { %v964_v57 = vadd.f32 1.0, %v1598_v55 }
 0xc2e   :  { %941 = vrot.lane.b32.xlu1 %v881_v18, %s1662_s22  ;;  %1599 = vrcp.f32 %v936_v42 }
 0xc2f   :  { %1601 = vrcp.f32 %v964_v57 }
 0xc38   :  { %v1600_v58 = vpop.eup %1599 }
 0xc39   :  { %v1602_v60 = vpop.eup %1601 }
 0xc3a   :  { %v968_v7 = vmul.f32 %v1602_v60, %v881_v18 }
 0xc9c   :  { %v947_v59 = vpop.permute.xlu1 %946 }
 0xc9d   :  { %v949_v61 = vmul.f32 %v1600_v58, %v947_v59  ;;  %v971_v63 = vpop.permute.xlu0 %970 }
 0xc9e   :  { %v973_v2 = vmul.f32 %v1602_v60, %v971_v63 }
 0xc9f   :  { %951 = vrot.lane.b32.xlu0 %v949_v61, %s1662_s22 }
 0xca0   :  { %975 = vrot.lane.b32.xlu1 %v973_v2, %s1662_s22  ;;  %v942_v3 = vpop.permute.xlu1 %941 }
 0xca1   :  { %v944_v4 = vmul.f32 %v1600_v58, %v942_v3 }
 0xd11   :  { %v952_v5 = vpop.permute.xlu0 %951 }
 0xd12   :  { %v954_v26 = vadd.f32 %v952_v5, %v944_v4  ;;  %v976_v9 = vpop.permute.xlu1 %975 }
 0xd13   :  { %v978_v14 = vadd.f32 %v976_v9, %v968_v7 }
 0xd14   :  { %1603 = vtanh.f32 %v954_v26  ;;  %v990_v32 = vsel %vm854_vm8, %v954_v26, %v942_v3 }
 0xd15   :  { %1605 = vtanh.f32 %v978_v14  ;;  %v995_v35 = vsel %vm843_vm3, %v978_v14, %v881_v18 }
 0xd1e   :  { %v1604_v15 = vpop.eup %1603 }
 0xd1f   :  { %v1606_v16 = vpop.eup %1605  ;;  %957 = vrot.lane.b32.xlu0 %v1604_v15, %s1663_s7 }
 0xd20   :  { %981 = vrot.lane.b32.xlu1 %v1606_v16, %s1663_s7 }
 0xd23   :  { %986 = vrot.lane.b32.xlu0 %v880_v43, %s1664_s1 }
 0xd24   :  { %991 = vrot.lane.b32.xlu1 %v880_v43, %s1663_s7  ;;  %v1658_v43 = vld [vmem:[%s2290_s6 + $0x24] ss:$8 sps:$4 sm:$0xff]  }
 0xd91   :  { %v958_v19 = vpop.permute.xlu0 %957 }
 0xd92   :  { %v982_v17 = vpop.permute.xlu1 %981  ;;  %v960_v27 = vmul.f32 %v1600_v58, %v958_v19 }
 0xd93   :  { %v984_v20 = vmul.f32 %v1602_v60, %v982_v17 }
 0xd95   :  { %v987_v54 = vpop.permute.xlu0 %986 }
 0xd96   :  { %v992_v28 = vpop.permute.xlu1 %991  ;;  %v989_v29 = vsel %vm854_vm8, %v960_v27, %v987_v54 }
 0xd97   :  { %997 = vrot.lane.b32.xlu0 %v989_v29, %s1662_s22  ;;  %v994_v31 = vsel %vm843_vm3, %v984_v20, %v992_v28 }
 0xd98   :  { %1002 = vrot.lane.b32.xlu1 %v994_v31, %s1663_s7 }
 0xd9b   :  { %1007 = vrot.lane.b32.xlu0 %v990_v32, %s1664_s1 }
 0xe09   :  { %v998_v37 = vpop.permute.xlu0 %997 }
 0xe0a   :  { %1000 = vst.msk [vmem:[#allocation4] sm:$0xff] %vm419_vm6, %v998_v37  ;;  %1461 = vst.msk [vmem:[%s2297_s9 + $0x20] sm:$0xff] %vm419_vm6, %v998_v37  ;;  %v1003_v33 = vpop.permute.xlu1 %1002 }
 0xe0b   :  { %1005 = vst.msk [vmem:[#allocation4] sm:$0xff] %vm425_vm7, %v1003_v33  ;;  %1462 = vst.msk [vmem:[%s2297_s9 + $0x18] sm:$0xff] %vm425_vm7, %v1003_v33 }
 0xe0d   :  { %v1008_v36 = vpop.permute.xlu0 %1007 }
 0xe0e   :  { %1010 = vst.msk [vmem:[#allocation5] sm:$0xff] %vm419_vm6, %v1008_v36 }
 0xe0f   :  { %1011 = vst.msk [vmem:[#allocation5] sm:$0xff] %vm425_vm7, %v995_v35 }
 0xe12   :  { %v1014_v30 = vld [vmem:[#allocation4] sm:$0xff] }
 0xe13   :  { %v1016_v62 = vpack.c.bf16 %v1014_v30, %v1014_v30 }
 0xe15   :  { %1463 = vmatmul.mubr.msk.bf16.vlgmr.msra.gmra.mrb[16].mxu1 %vm34_vm1, %v1016_v62 }
 0xe16   :  { %1289 = vmatpush1.bf16.msra.mxu1 %v1655_v39  ;;  %1320 = vmatprep.mubr.bf16.mxu1 %v1661_v1  ;;  %v1660_v1 = vld [vmem:[%s2290_s6 + $0x34] ss:$8 sps:$4 sm:$0xff]   ;;  %v1015_v18 = vld [vmem:[#allocation5] sm:$0xff] }
 0xe17   :  { %1290 = vmatprep.subr.bf16.mxu1 %v1656_v21 }
 0xe1a   :  { %1291 = vmatpush1.bf16.msra.mxu1 %v1657_v41 }
 0xe1b   :  { %1292 = vmatprep.subr.bf16.mxu1 %v1658_v43 }
 0xe1e   :  { %1293 = vmatpush1.bf16.msra.mxu1 %v1659_v44 }
 0xe1f   :  { %1294 = vmatprep.subr.bf16.mxu1 %v1660_v1 }
 0xe22   :  { %1295 = vmatpush1.bf16.msra.mxu1 %v1809_v24 }
 0xee8   :  { %v1054_v47 = vpop.f32.mrb[16].mxu1 }
 0xee9   :  { %v1063_v49 = vadd.f32 %v1054_v47, %v1867_v52  ;;  %v1056_v8 = vpop.f32.mrb[17].mxu1 }
 0xeea   :  { %v1066_v10 = vadd.f32 %v1056_v8, %v1853_v38  ;;  %v1058_v34 = vpop.f32.mrb[18].mxu1 }
 0xeeb   :  { %1607 = vtanh.f32 %v1063_v49  ;;  %v1059_v56 = vpop.f32.mrb[19].mxu1  ;;  %v1464_v24 = vmul.f32 -1.442695, %v1063_v49 }
 0xeec   :  { %1609 = vtanh.f32 %v1066_v10  ;;  %v1465_v22 = vmul.f32 -1.442695, %v1066_v10 }
 0xeed   :  { %1611 = vpow2.f32 %v1464_v24 }
 0xeee   :  { %1613 = vpow2.f32 %v1465_v22 }
 0xef5   :  { %v1608_v11 = vpop.eup %1607 }
 0xef6   :  { %v1610_v12 = vpop.eup %1609  ;;  %1080 = vrot.lane.b32.xlu1 %v1608_v11, %s1663_s7 }
 0xef7   :  { %1104 = vrot.lane.b32.xlu0 %v1610_v12, %s1663_s7  ;;  %v1612_v52 = vpop.eup %1611 }
 0xef8   :  { %v1614_v23 = vpop.eup %1613  ;;  %v1070_v38 = vadd.f32 1.0, %v1612_v52 }
 0xef9   :  { %v1098_v48 = vadd.f32 1.0, %v1614_v23 }
 0xefa   :  { %1075 = vrot.lane.b32.xlu1 %v1015_v18, %s1662_s22  ;;  %1615 = vrcp.f32 %v1070_v38 }
 0xefb   :  { %1617 = vrcp.f32 %v1098_v48 }
 0xf04   :  { %v1616_v55 = vpop.eup %1615 }
 0xf05   :  { %v1618_v57 = vpop.eup %1617 }
 0xf06   :  { %v1102_v3 = vmul.f32 %v1618_v57, %v1015_v18 }
 0xf68   :  { %v1081_v42 = vpop.permute.xlu1 %1080 }
 0xf69   :  { %v1083_v58 = vmul.f32 %v1616_v55, %v1081_v42  ;;  %v1105_v59 = vpop.permute.xlu0 %1104 }
 0xf6a   :  { %v1107_v60 = vmul.f32 %v1618_v57, %v1105_v59 }
 0xf6b   :  { %1085 = vrot.lane.b32.xlu0 %v1083_v58, %s1662_s22 }
 0xf6c   :  { %1109 = vrot.lane.b32.xlu1 %v1107_v60, %s1662_s22  ;;  %v1076_v61 = vpop.permute.xlu1 %1075 }
 0xf6d   :  { %v1078_v63 = vmul.f32 %v1616_v55, %v1076_v61 }
 0xfdd   :  { %v1086_v2 = vpop.permute.xlu0 %1085 }
 0xfde   :  { %v1088_v4 = vadd.f32 %v1086_v2, %v1078_v63  ;;  %v1110_v5 = vpop.permute.xlu1 %1109 }
 0xfdf   :  { %v1112_v7 = vadd.f32 %v1110_v5, %v1102_v3 }
 0xfe0   :  { %1619 = vtanh.f32 %v1088_v4  ;;  %v1124_v28 = vsel %vm706_vm15, %v1088_v4, %v1076_v61 }
 0xfe1   :  { %1621 = vtanh.f32 %v1112_v7  ;;  %v1129_v32 = vsel %vm695_vm14, %v1112_v7, %v1015_v18 }
 0xfea   :  { %v1620_v26 = vpop.eup %1619 }
 0xfeb   :  { %v1622_v9 = vpop.eup %1621  ;;  %1091 = vrot.lane.b32.xlu0 %v1620_v26, %s1663_s7 }
 0xfec   :  { %1115 = vrot.lane.b32.xlu1 %v1622_v9, %s1663_s7 }
 0xfef   :  { %1120 = vrot.lane.b32.xlu0 %v1014_v30, %s1664_s1 }
 0xff0   :  { %1125 = vrot.lane.b32.xlu1 %v1014_v30, %s1663_s7 }
0x105d   :  { %v1092_v14 = vpop.permute.xlu0 %1091 }
0x105e   :  { %v1116_v15 = vpop.permute.xlu1 %1115  ;;  %v1094_v16 = vmul.f32 %v1616_v55, %v1092_v14 }
0x105f   :  { %v1118_v19 = vmul.f32 %v1618_v57, %v1116_v15 }
0x1061   :  { %v1121_v17 = vpop.permute.xlu0 %1120 }
0x1062   :  { %v1126_v27 = vpop.permute.xlu1 %1125  ;;  %v1123_v20 = vsel %vm706_vm15, %v1094_v16, %v1121_v17 }
0x1063   :  { %1131 = vrot.lane.b32.xlu0 %v1123_v20, %s1662_s22  ;;  %v1128_v54 = vsel %vm695_vm14, %v1118_v19, %v1126_v27 }
0x1064   :  { %1136 = vrot.lane.b32.xlu1 %v1128_v54, %s1663_s7 }
0x1067   :  { %1141 = vrot.lane.b32.xlu0 %v1124_v28, %s1664_s1 }
0x10d5   :  { %v1132_v29 = vpop.permute.xlu0 %1131 }
0x10d6   :  { %1134 = vst.msk [vmem:[#allocation4] sm:$0xff] %vm419_vm6, %v1132_v29  ;;  %1466 = vst.msk [vmem:[%s2297_s9 + $0x28] sm:$0xff] %vm419_vm6, %v1132_v29  ;;  %v1137_v31 = vpop.permute.xlu1 %1136 }
0x10d7   :  { %1139 = vst.msk [vmem:[#allocation4] sm:$0xff] %vm425_vm7, %v1137_v31  ;;  %1467 = vst.msk [vmem:[%s2297_s9 + $0x10] sm:$0xff] %vm425_vm7, %v1137_v31 }
0x10d9   :  { %v1142_v13 = vpop.permute.xlu0 %1141 }
0x10da   :  { %1144 = vst.msk [vmem:[#allocation5] sm:$0xff] %vm419_vm6, %v1142_v13 }
0x10db   :  { %1145 = vst.msk [vmem:[#allocation5] sm:$0xff] %vm425_vm7, %v1129_v32 }
0x10de   :  { %v1148_v37 = vld [vmem:[#allocation4] sm:$0xff] }
0x10df   :  { %v1150_v33 = vpack.c.bf16 %v1148_v37, %v1148_v37 }
0x10e1   :  { %1468 = vmatmul.mubr.msk.bf16.vlgmr.msra.gmra.mrb[20].mxu0 %vm34_vm1, %v1150_v33 }
0x10e2   :  { %v1149_v43 = vld [vmem:[#allocation5] sm:$0xff] }
0x11b4   :  { %v1188_v36 = vpop.f32.mrb[20].mxu0 }
0x11b5   :  { %v1197_v35 = vadd.f32 %v1188_v36, %v1861_v46  ;;  %v1190_v30 = vpop.f32.mrb[21].mxu0 }
0x11b6   :  { %v1200_v62 = vadd.f32 %v1190_v30, %v1859_v45  ;;  %v1192_v39 = vpop.f32.mrb[22].mxu0 }
0x11b7   :  { %1623 = vtanh.f32 %v1197_v35  ;;  %v1193_v21 = vpop.f32.mrb[23].mxu0  ;;  %v1469_v44 = vmul.f32 -1.442695, %v1197_v35 }
0x11b8   :  { %1625 = vtanh.f32 %v1200_v62  ;;  %v1470_v1 = vmul.f32 -1.442695, %v1200_v62 }
0x11b9   :  { %1627 = vpow2.f32 %v1469_v44 }
0x11ba   :  { %1629 = vpow2.f32 %v1470_v1 }
0x11c1   :  { %v1624_v6 = vpop.eup %1623 }
0x11c2   :  { %v1626_v41 = vpop.eup %1625  ;;  %1214 = vrot.lane.b32.xlu1 %v1624_v6, %s1663_s7 }
0x11c3   :  { %1238 = vrot.lane.b32.xlu0 %v1626_v41, %s1663_s7  ;;  %v1628_v46 = vpop.eup %1627 }
0x11c4   :  { %v1630_v47 = vpop.eup %1629  ;;  %v1204_v45 = vadd.f32 1.0, %v1628_v46 }
0x11c5   :  { %v1232_v49 = vadd.f32 1.0, %v1630_v47 }
0x11c6   :  { %1209 = vrot.lane.b32.xlu1 %v1149_v43, %s1662_s22  ;;  %1631 = vrcp.f32 %v1204_v45 }
0x11c7   :  { %1633 = vrcp.f32 %v1232_v49 }
0x11d0   :  { %v1632_v8 = vpop.eup %1631 }
0x11d1   :  { %v1634_v34 = vpop.eup %1633 }
0x11d2   :  { %v1236_v52 = vmul.f32 %v1634_v34, %v1149_v43 }
0x1234   :  { %v1215_v10 = vpop.permute.xlu1 %1214 }
0x1235   :  { %v1217_v56 = vmul.f32 %v1632_v8, %v1215_v10  ;;  %v1239_v11 = vpop.permute.xlu0 %1238 }
0x1236   :  { %v1241_v12 = vmul.f32 %v1634_v34, %v1239_v11 }
0x1237   :  { %1219 = vrot.lane.b32.xlu0 %v1217_v56, %s1662_s22 }
0x1238   :  { %1243 = vrot.lane.b32.xlu1 %v1241_v12, %s1662_s22  ;;  %v1210_v18 = vpop.permute.xlu1 %1209 }
0x1239   :  { %v1212_v24 = vmul.f32 %v1632_v8, %v1210_v18 }
0x12a9   :  { %v1220_v22 = vpop.permute.xlu0 %1219 }
0x12aa   :  { %v1222_v23 = vadd.f32 %v1220_v22, %v1212_v24  ;;  %v1244_v38 = vpop.permute.xlu1 %1243 }
0x12ab   :  { %v1246_v48 = vadd.f32 %v1244_v38, %v1236_v52 }
0x12ac   :  { %1635 = vtanh.f32 %v1222_v23  ;;  %v1258_v4 = vsel %vm558_vm11, %v1222_v23, %v1210_v18 }
0x12ad   :  { %1637 = vtanh.f32 %v1246_v48  ;;  %v1263_v26 = vsel %vm547_vm10, %v1246_v48, %v1149_v43 }
0x12b6   :  { %v1636_v55 = vpop.eup %1635 }
0x12b7   :  { %v1638_v42 = vpop.eup %1637  ;;  %1225 = vrot.lane.b32.xlu0 %v1636_v55, %s1663_s7 }
0x12b8   :  { %1249 = vrot.lane.b32.xlu1 %v1638_v42, %s1663_s7 }
0x12bb   :  { %1254 = vrot.lane.b32.xlu0 %v1148_v37, %s1664_s1 }
0x12bc   :  { %1259 = vrot.lane.b32.xlu1 %v1148_v37, %s1663_s7 }
0x1329   :  { %v1226_v57 = vpop.permute.xlu0 %1225 }
0x132a   :  { %v1250_v58 = vpop.permute.xlu1 %1249  ;;  %v1228_v59 = vmul.f32 %v1632_v8, %v1226_v57 }
0x132b   :  { %v1252_v60 = vmul.f32 %v1634_v34, %v1250_v58 }
0x132d   :  { %v1255_v61 = vpop.permute.xlu0 %1254 }
0x132e   :  { %v1260_v63 = vpop.permute.xlu1 %1259  ;;  %v1257_v2 = vsel %vm558_vm11, %v1228_v59, %v1255_v61 }
0x132f   :  { %1265 = vrot.lane.b32.xlu0 %v1257_v2, %s1662_s22  ;;  %v1262_v3 = vsel %vm547_vm10, %v1252_v60, %v1260_v63 }
0x1330   :  { %1270 = vrot.lane.b32.xlu1 %v1262_v3, %s1663_s7 }
0x1333   :  { %1275 = vrot.lane.b32.xlu0 %v1258_v4, %s1664_s1 }
0x13a1   :  { %v1266_v5 = vpop.permute.xlu0 %1265 }
0x13a2   :  { %1268 = vst.msk [vmem:[#allocation4] sm:$0xff] %vm419_vm6, %v1266_v5  ;;  %1471 = vst.msk [vmem:[%s2297_s9 + $0x30] sm:$0xff] %vm419_vm6, %v1266_v5  ;;  %v1271_v7 = vpop.permute.xlu1 %1270 }
0x13a3   :  { %1273 = vst.msk [vmem:[#allocation4] sm:$0xff] %vm425_vm7, %v1271_v7  ;;  %1472 = vst.msk [vmem:[%s2297_s9 + $0x8] sm:$0xff] %vm425_vm7, %v1271_v7 }
0x13a5   :  { %v1276_v0 = vpop.permute.xlu0 %1275 }
0x13a6   :  { %1278 = vst.msk [vmem:[#allocation5] sm:$0xff] %vm419_vm6, %v1276_v0 }
0x13a7   :  { %1279 = vst.msk [vmem:[#allocation5] sm:$0xff] %vm425_vm7, %v1263_v26 }
0x13aa   :  { %v1282_v9 = vld [vmem:[#allocation4] sm:$0xff] }
0x13ab   :  { %v1284_v14 = vpack.c.bf16 %v1282_v9, %v1282_v9 }
0x13ad   :  { %1473 = vmatmul.mubr.msk.bf16.vlgmr.msra.gmra.mrb[20].mxu1 %vm34_vm1, %v1284_v14 }
0x13ae   :  { %v1283_v28 = vld [vmem:[#allocation5] sm:$0xff] }
0x1480   :  { %v1322_v15 = vpop.f32.mrb[20].mxu1 }
0x1481   :  { %v1331_v16 = vadd.f32 %v1322_v15, %v1865_v50  ;;  %v1324_v19 = vpop.f32.mrb[21].mxu1 }
0x1482   :  { %v1333_v17 = vadd.f32 %v1324_v19, %v1855_v40  ;;  %v1326_v27 = vpop.f32.mrb[22].mxu1 }
0x1483   :  { %1639 = vtanh.f32 %v1331_v16  ;;  %v1327_v20 = vpop.f32.mrb[23].mxu1  ;;  %v1474_v29 = vmul.f32 -1.442695, %v1331_v16 }
0x1484   :  { %1641 = vtanh.f32 %v1333_v17  ;;  %v1475_v31 = vmul.f32 -1.442695, %v1333_v17 }
0x1485   :  { %1643 = vpow2.f32 %v1474_v29 }
0x1486   :  { %1645 = vpow2.f32 %v1475_v31 }
0x148d   :  { %v1640_v25 = vpop.eup %1639 }
0x148e   :  { %v1642_v54 = vpop.eup %1641  ;;  %1347 = vrot.lane.b32.xlu1 %v1640_v25, %s1663_s7 }
0x148f   :  { %1371 = vrot.lane.b32.xlu0 %v1642_v54, %s1663_s7  ;;  %v1644_v50 = vpop.eup %1643 }
0x1490   :  { %v1646_v13 = vpop.eup %1645  ;;  %v1337_v40 = vadd.f32 1.0, %v1644_v50 }
0x1491   :  { %v1365_v32 = vadd.f32 1.0, %v1646_v13 }
0x1492   :  { %1342 = vrot.lane.b32.xlu1 %v1283_v28, %s1662_s22  ;;  %1647 = vrcp.f32 %v1337_v40 }
0x1493   :  { %1649 = vrcp.f32 %v1365_v32 }
0x149c   :  { %v1648_v37 = vpop.eup %1647 }
0x149d   :  { %v1650_v36 = vpop.eup %1649 }
0x149e   :  { %v1369_v41 = vmul.f32 %v1650_v36, %v1283_v28 }
0x1500   :  { %v1348_v33 = vpop.permute.xlu1 %1347 }
0x1501   :  { %v1350_v35 = vmul.f32 %v1648_v37, %v1348_v33  ;;  %v1372_v30 = vpop.permute.xlu0 %1371 }
0x1502   :  { %v1374_v62 = vmul.f32 %v1650_v36, %v1372_v30 }
0x1503   :  { %1352 = vrot.lane.b32.xlu0 %v1350_v35, %s1662_s22 }
0x1504   :  { %1376 = vrot.lane.b32.xlu1 %v1374_v62, %s1662_s22  ;;  %v1343_v39 = vpop.permute.xlu1 %1342 }
0x1505   :  { %v1345_v21 = vmul.f32 %v1648_v37, %v1343_v39 }
0x1575   :  { %v1353_v6 = vpop.permute.xlu0 %1352 }
0x1576   :  { %v1355_v43 = vadd.f32 %v1353_v6, %v1345_v21  ;;  %v1377_v44 = vpop.permute.xlu1 %1376 }
0x1577   :  { %v1379_v1 = vadd.f32 %v1377_v44, %v1369_v41 }
0x1578   :  { %1651 = vtanh.f32 %v1355_v43  ;;  %v1391_v45 = vsel %vm409_vm5, %v1355_v43, %v1343_v39 }
0x1579   :  { %1653 = vtanh.f32 %v1379_v1  ;;  %v1396_v22 = vsel %vm398_vm4, %v1379_v1, %v1283_v28 }
0x1582   :  { %v1652_v46 = vpop.eup %1651 }
0x1583   :  { %v1654_v47 = vpop.eup %1653  ;;  %1358 = vrot.lane.b32.xlu0 %v1652_v46, %s1663_s7 }
0x1584   :  { %1382 = vrot.lane.b32.xlu1 %v1654_v47, %s1663_s7 }
0x1587   :  { %1387 = vrot.lane.b32.xlu0 %v1282_v9, %s1664_s1 }
0x1588   :  { %1392 = vrot.lane.b32.xlu1 %v1282_v9, %s1663_s7 }
0x158c   :  { %1408 = vrot.lane.b32.xlu1 %v1391_v45, %s1664_s1 }
0x15f5   :  { %v1359_v49 = vpop.permute.xlu0 %1358 }
0x15f6   :  { %v1383_v8 = vpop.permute.xlu1 %1382  ;;  %v1361_v10 = vmul.f32 %v1648_v37, %v1359_v49 }
0x15f7   :  { %v1385_v12 = vmul.f32 %v1650_v36, %v1383_v8 }
0x15f9   :  { %v1388_v34 = vpop.permute.xlu0 %1387 }
0x15fa   :  { %v1390_v56 = vsel %vm409_vm5, %v1361_v10, %v1388_v34  ;;  %v1393_v11 = vpop.permute.xlu1 %1392 }
0x15fb   :  { %1398 = vrot.lane.b32.xlu0 %v1390_v56, %s1662_s22  ;;  %v1395_v18 = vsel %vm398_vm4, %v1385_v12, %v1393_v11 }
0x15fe   :  { %v1409_v24 = vpop.permute.xlu1 %1408 }
0x15ff   :  { %1411 = vst.msk [vmem:[#allocation5] sm:$0xff] %vm419_vm6, %v1409_v24  ;;  %1403 = vrot.lane.b32.xlu0 %v1395_v18, %s1663_s7 }
0x1600   :  { %1412 = vst.msk [vmem:[#allocation5] sm:$0xff] %vm425_vm7, %v1396_v22 }
0x166d   :  { %v1399_v52 = vpop.permute.xlu0 %1398 }
0x166e   :  { %1401 = vst.msk [vmem:[#allocation4] sm:$0xff] %vm419_vm6, %v1399_v52  ;;  %1476 = vst.msk [vmem:[%s2297_s9 + $0x38] sm:$0xff] %vm419_vm6, %v1399_v52 }
0x1671   :  { %v1404_v53 = vpop.permute.xlu0 %1403 }
0x1672   :  { %1406 = vst.msk [vmem:[#allocation4] sm:$0xff] %vm425_vm7, %v1404_v53  ;;  %1414 = vst.msk [vmem:[%s2297_s9] sm:$0xff] %vm425_vm7, %v1404_v53 }

// kernel: net_forward.3
= control target key start
LH: loop header
LB: loop body
LE: loop exit
PB: predicated region body
PF: predicated region fallthrough
CT: control target
= control target key end

     0   :  { %v2074_v1 = vmov 0   ;;  %vm40_vm0 = vcmask 523264   ;;  %s2075_s23 = smov 32   ;;  %vm44_vm5 = vcmask 261120   ;;  %vm479_vm6 = vcmask 523520   ;;  %s2831_s4 = inlined_call_operand.vmem [shape: bf16[64,128], index: 4, kind: input, shape index: {}]   ;;  %s2832_s5 = inlined_call_operand.vmem [shape: bf16[64,128], index: 5, kind: input, shape index: {}]   ;;  %s2833_s0 = inlined_call_operand.vmem [shape: f32[8,8,64], index: 0, kind: input, shape index: {}]   ;;  %s2834_s6 = inlined_call_operand.vmem [shape: bf16[64,256], index: 6, kind: input, shape index: {}]   ;;  %s2835_s2 = inlined_call_operand.vmem [shape: f32[8,64], index: 2, kind: input, shape index: {}]   ;;  %s2836_s3 = inlined_call_operand.vmem [shape: f32[8,64], index: 3, kind: input, shape index: {}]   ;;  %s2837_s7 = inlined_call_operand.vmem [shape: f32[1,128], index: 7, kind: input, shape index: {}]   ;;  %s2838_s8 = inlined_call_operand.vmem [shape: f32[1,128], index: 8, kind: input, shape index: {}]   ;;  %s2839_s1 = inlined_call_operand.vmem [shape: s32[8,1], index: 1, kind: input, shape index: {}]   ;;  %s2840_s9 = inlined_call_operand.vmem [shape: f32[64,4], index: 9, kind: input, shape index: {}]   ;;  %s2841_s10 = inlined_call_operand.vmem [shape: f32[1,4], index: 10, kind: input, shape index: {}]   ;;  %s2842_s11 = inlined_call_operand.vmem [shape: f32[8,4], index: 11, kind: output, shape index: {}]  }
   0x1   :  { %v1919_v0 = vld [vmem:[%s2831_s4] sm:$0xff]   ;;  %1917 = vset.pattern.permute.xlu1 %v2074_v1  ;;  %1918 = vset.pattern.permute.xlu0 %v2074_v1  ;;  %v1920_v2 = vld [vmem:[%s2831_s4 + $0x8] sm:$0xff]   ;;  %v1922_v4 = vld [vmem:[%s2831_s4 + $0x10] sm:$0xff]  }
   0x2   :  { %1844 = vmatprep.subr.bf16.mxu0 %v1919_v0  ;;  %v1921_v3 = vld [vmem:[%s2832_s5] sm:$0xff]   ;;  %v1923_v5 = vld [vmem:[%s2832_s5 + $0x8] sm:$0xff]   ;;  %v1925_v6 = vld [vmem:[%s2832_s5 + $0x10] sm:$0xff]  }
   0x3   :  { %1845 = vmatpush3.bf16.msra.mxu0 %v1919_v0  ;;  %1860 = vmatprep.subr.bf16.mxu1 %v1921_v3  ;;  %v46_v7 = vld [vmem:[%s2833_s0] sm:$0xff]  ;;  %v47_v8 = vld [vmem:[%s2833_s0 + $0x8] sm:$0xff]  ;;  %v1924_v9 = vld [vmem:[%s2831_s4 + $0x18] sm:$0xff]  }
   0x4   :  { %1846 = vmatprep.subr.bf16.mxu0 %v1920_v2  ;;  %1861 = vmatpush3.bf16.msra.mxu1 %v1921_v3  ;;  %v54_v10 = vpack.c.bf16 %v47_v8, %v46_v7  ;;  %v1928_v11 = vld [vmem:[%s2832_s5 + $0x18] sm:$0xff]   ;;  %v48_v12 = vld [vmem:[%s2833_s0 + $0x10] sm:$0xff]  ;;  %v2184_v14 = vld [vmem:[%s2834_s6 + $0x4] ss:$8 sps:$4 sm:$0xff]  }
   0x5   :  { %1862 = vmatprep.subr.bf16.mxu1 %v1923_v5  ;;  %v49_v13 = vld [vmem:[%s2833_s0 + $0x18] sm:$0xff]  ;;  %v50_v15 = vld [vmem:[%s2833_s0 + $0x20] sm:$0xff]  ;;  %v51_v16 = vld [vmem:[%s2833_s0 + $0x28] sm:$0xff] }
   0x6   :  { %1852 = vmatprep.mubr.msk.bf16.mxu0 %vm40_vm0, %v54_v10  ;;  %1868 = vmatprep.mubr.msk.bf16.mxu1 %vm40_vm0, %v54_v10  ;;  %v55_v17 = vpack.c.bf16 %v49_v13, %v48_v12  ;;  %v2195_v18 = vld [vmem:[%s2834_s6] ss:$8 sps:$4 sm:$0xff]   ;;  %v56_v19 = vpack.c.bf16 %v51_v16, %v50_v15  ;;  %v2201_v20 = vld [vmem:[%s2834_s6 + $0x14] ss:$8 sps:$4 sm:$0xff]   ;;  %v2217_v23 = vld [vmem:[%s2834_s6 + $0x10] ss:$8 sps:$4 sm:$0xff]  }
   0x7   :  { %1847 = vmatpush3.bf16.msra.mxu0 %v1920_v2  ;;  %v39_v21 = vld [vmem:[%s2835_s2] sm:$0xff]  ;;  %v52_v24 = vld [vmem:[%s2833_s0 + $0x30] sm:$0xff]  ;;  %v53_v25 = vld [vmem:[%s2833_s0 + $0x38] sm:$0xff] }
   0x8   :  { %1848 = vmatprep.subr.bf16.mxu0 %v1922_v4  ;;  %1863 = vmatpush3.bf16.msra.mxu1 %v1923_v5  ;;  %v42_v22 = vld [vmem:[%s2836_s3] sm:$0xff]  ;;  %41 = vst.msk [vmem:[#allocation4] sm:$0xff] %vm40_vm0, %v39_v21  ;;  %v57_v27 = vpack.c.bf16 %v53_v25, %v52_v24  ;;  %v2246_v29 = vld [vmem:[%s2834_s6 + $0x34] ss:$8 sps:$4 sm:$0xff]   ;;  %v2259_v31 = vld [vmem:[%s2834_s6 + $0x30] ss:$8 sps:$4 sm:$0xff]  }
   0x9   :  { %1864 = vmatprep.subr.bf16.mxu1 %v1925_v6  ;;  %43 = vst.msk [vmem:[#allocation5] sm:$0xff] %vm40_vm0, %v42_v22  ;;  %v2231_v26 = vld [vmem:[%s2834_s6 + $0x24] ss:$8 sps:$4 sm:$0xff]   ;;  %v2240_v28 = vld [vmem:[%s2834_s6 + $0x20] ss:$8 sps:$4 sm:$0xff]  }
   0xa   :  { %v1764_v34 = vld [vmem:[%s2837_s7] ss:$0 sm:$0xff]  ;;  %s2076_s7 = smov 64  }
   0xb   :  { %1849 = vmatpush3.bf16.msra.mxu0 %v1922_v4  ;;  %v1773_v36 = vld [vmem:[%s2838_s8] ss:$0 sm:$0xff] }
   0xc   :  { %1850 = vmatprep.subr.bf16.mxu0 %v1924_v9  ;;  %1865 = vmatpush3.bf16.msra.mxu1 %v1925_v6  ;;  %v2324_v22 = vld [vmem:[%s2839_s1] sm:$0xff]  ;;  %s2077_s1 = smov 96  }
   0xd   :  { %1866 = vmatprep.subr.bf16.mxu1 %v1928_v11  ;;  %vm447_vm1 = vcmp.gt.s32.totalorder %v2324_v22, 0  ;;  %vm448_vm2 = vcmp.gt.s32.totalorder %v2324_v22, 7  ;;  %vm610_vm7 = vcmp.gt.s32.totalorder %v2324_v22, 1  ;;  %vm611_vm8 = vcmp.gt.s32.totalorder %v2324_v22, 6 }
   0xe   :  { %vm771_vm11 = vcmp.gt.s32.totalorder %v2324_v22, 2  ;;  %vm772_vm12 = vcmp.gt.s32.totalorder %v2324_v22, 5  ;;  %vm932_vm15 = vcmp.gt.s32.totalorder %v2324_v22, 3 }
   0xf   :  { %1851 = vmatpush3.bf16.msra.mxu0 %v1924_v9  ;;  %v2262_v32 = vld [vmem:[#allocation4] sm:$0xff] }
  0x10   :  { %349 = vmatprep.subr.bf16.mxu0 %v2184_v14  ;;  %1867 = vmatpush3.bf16.msra.mxu1 %v1928_v11  ;;  %v2248_v30 = vld [vmem:[#allocation5] sm:$0xff]  ;;  %v305_v33 = vpack.c.bf16 %v2262_v32, %v2262_v32 }
  0x11   :  { %511 = vmatprep.subr.bf16.mxu1 %v2184_v14  ;;  %403 = vrot.lane.b32.xlu1 %v2248_v30, %s2075_s23 }
  0x12   :  { %1853 = vmatmul.mubr.msk.bf16.vlgmr.msra.gmra.mrb[0].mxu0 %vm40_vm0, %v55_v17 }
  0x13   :  { %350 = vmatpush1.bf16.msra.mxu0 %v2195_v18  ;;  %1856 = vmatprep.mubr.msk.bf16.mxu0 %vm40_vm0, %v56_v19 }
  0x14   :  { %351 = vmatprep.subr.bf16.mxu0 %v2201_v20  ;;  %1869 = vmatmul.mubr.msk.bf16.vlgmr.msra.gmra.mrb[0].mxu1 %vm40_vm0, %v55_v17 }
  0x15   :  { %1872 = vmatprep.mubr.msk.bf16.mxu1 %vm40_vm0, %v56_v19  ;;  %512 = vmatpush1.bf16.msra.mxu1 %v2195_v18 }
  0x16   :  { %513 = vmatprep.subr.bf16.mxu1 %v2201_v20 }
  0x17   :  { %352 = vmatpush1.bf16.msra.mxu0 %v2217_v23 }
  0x18   :  { %353 = vmatprep.subr.bf16.mxu0 %v2231_v26 }
  0x19   :  { %514 = vmatpush1.bf16.msra.mxu1 %v2217_v23 }
  0x1a   :  { %1857 = vmatmul.mubr.msk.bf16.gmra.mrb[4].mxu0 %vm40_vm0, %v57_v27  ;;  %515 = vmatprep.subr.bf16.mxu1 %v2231_v26 }
  0x1b   :  { %354 = vmatpush1.bf16.msra.mxu0 %v2240_v28  ;;  %381 = vmatprep.mubr.bf16.mxu0 %v2074_v1 }
  0x1c   :  { %355 = vmatprep.subr.bf16.mxu0 %v2246_v29  ;;  %1873 = vmatmul.mubr.msk.bf16.gmra.mrb[4].mxu1 %vm40_vm0, %v57_v27 }
  0x1d   :  { %516 = vmatpush1.bf16.msra.mxu1 %v2240_v28  ;;  %543 = vmatprep.mubr.bf16.mxu1 %v2074_v1 }
  0x1e   :  { %517 = vmatprep.subr.bf16.mxu1 %v2246_v29 }
  0x1f   :  { %356 = vmatpush1.bf16.msra.mxu0 %v2259_v31 }
  0x20   :  { %672 = vmatprep.subr.bf16.mxu0 %v2184_v14 }
  0x21   :  { %518 = vmatpush1.bf16.msra.mxu1 %v2259_v31 }
  0x22   :  { %1790 = vmatmul.mubr.msk.bf16.vlgmr.msra.gmra.mrb[8].mxu0 %vm40_vm0, %v305_v33  ;;  %833 = vmatprep.subr.bf16.mxu1 %v2184_v14 }
  0x23   :  { %673 = vmatpush1.bf16.msra.mxu0 %v2195_v18  ;;  %704 = vmatprep.mubr.bf16.mxu0 %v2074_v1 }
  0x24   :  { %674 = vmatprep.subr.bf16.mxu0 %v2201_v20 }
  0x27   :  { %675 = vmatpush1.bf16.msra.mxu0 %v2217_v23 }
  0x28   :  { %676 = vmatprep.subr.bf16.mxu0 %v2231_v26 }
  0x2b   :  { %677 = vmatpush1.bf16.msra.mxu0 %v2240_v28 }
  0x2c   :  { %678 = vmatprep.subr.bf16.mxu0 %v2246_v29 }
  0x2f   :  { %679 = vmatpush1.bf16.msra.mxu0 %v2259_v31 }
  0x30   :  { %994 = vmatprep.subr.bf16.mxu0 %v2184_v14 }
  0xe5   :  { %v1854_v35 = vpop.f32.mrb[0].mxu0 }
  0xe6   :  { %v2291_v37 = vadd.f32 %v1854_v35, %v1764_v34  ;;  %v143_v38 = vpop.f32.mrb[1].mxu0  ;;  %v449_v35 = vsel %vm447_vm1, 1, %v2074_v1  ;;  %vm933_vm1 = vcmp.gt.s32.totalorder %v2324_v22, 4 }
  0xe7   :  { %v1855_v39 = vpop.f32.mrb[2].mxu0  ;;  %v1870_v40 = vpop.f32.mrb[0].mxu1  ;;  %v144_v4 = vadd.f32 %v1764_v34, %v143_v38  ;;  %v460_v38 = vsel %vm448_vm2, 1, %v2074_v1 }
  0xe8   :  { %v2293_v41 = vadd.f32 %v1855_v39, %v1764_v34  ;;  %v146_v42 = vpop.f32.mrb[3].mxu0  ;;  %v2295_v43 = vadd.f32 %v1870_v40, %v1773_v36  ;;  %v255_v44 = vpop.f32.mrb[1].mxu1 }
  0xe9   :  { %v2297_v45 = vadd.f32 %v1764_v34, %v146_v42  ;;  %v2299_v46 = vadd.f32 %v1773_v36, %v255_v44  ;;  %v1871_v47 = vpop.f32.mrb[2].mxu1  ;;  %v404_v39 = vpop.permute.xlu1 %403 }
  0xea   :  { %v2301_v48 = vadd.f32 %v1871_v47, %v1773_v36  ;;  %v258_v49 = vpop.f32.mrb[3].mxu1 }
  0xeb   :  { %v2303_v50 = vadd.f32 %v1773_v36, %v258_v49 }
  0xed   :  { %v1858_v51 = vpop.f32.mrb[4].mxu0 }
  0xee   :  { %v2305_v52 = vadd.f32 %v1858_v51, %v1764_v34  ;;  %v159_v53 = vpop.f32.mrb[5].mxu0 }
  0xef   :  { %v2307_v54 = vadd.f32 %v1764_v34, %v159_v53  ;;  %v1859_v55 = vpop.f32.mrb[6].mxu0  ;;  %v1874_v56 = vpop.f32.mrb[4].mxu1 }
  0xf0   :  { %v2309_v57 = vadd.f32 %v1859_v55, %v1764_v34  ;;  %v162_v58 = vpop.f32.mrb[7].mxu0  ;;  %v2311_v59 = vadd.f32 %v1874_v56, %v1773_v36  ;;  %v271_v60 = vpop.f32.mrb[5].mxu1 }
  0xf1   :  { %v2313_v61 = vadd.f32 %v1764_v34, %v162_v58  ;;  %v2315_v62 = vadd.f32 %v1773_v36, %v271_v60  ;;  %v1875_v63 = vpop.f32.mrb[6].mxu1 }
  0xf2   :  { %v274_v0 = vpop.f32.mrb[7].mxu1  ;;  %v283_v2 = vadd.f32 %v1875_v63, %v1773_v36 }
  0xf3   :  { %v2317_v3 = vadd.f32 %v1773_v36, %v274_v0 }
  0xf5   :  { %v383_v5 = vpop.f32.mrb[8].mxu0 }
  0xf6   :  { %v391_v6 = vadd.f32 %v383_v5, %v144_v4  ;;  %v385_v7 = vpop.f32.mrb[9].mxu0 }
  0xf7   :  { %v394_v8 = vadd.f32 %v385_v7, %v283_v2  ;;  %v387_v9 = vpop.f32.mrb[10].mxu0 }
  0xf8   :  { %1939 = vtanh.f32 %v391_v6  ;;  %v388_v10 = vpop.f32.mrb[11].mxu0  ;;  %v1791_v13 = vmul.f32 -1.442695, %v391_v6 }
  0xf9   :  { %1941 = vtanh.f32 %v394_v8  ;;  %v1792_v15 = vmul.f32 -1.442695, %v394_v8 }
  0xfa   :  { %1943 = vpow2.f32 %v1791_v13 }
  0xfb   :  { %1945 = vpow2.f32 %v1792_v15 }
 0x102   :  { %v1940_v11 = vpop.eup %1939 }
 0x103   :  { %408 = vrot.lane.b32.xlu0 %v1940_v11, %s2076_s7  ;;  %v1942_v12 = vpop.eup %1941 }
 0x104   :  { %v1944_v16 = vpop.eup %1943 }
 0x105   :  { %v398_v17 = vadd.f32 1.0, %v1944_v16  ;;  %v1946_v19 = vpop.eup %1945 }
 0x106   :  { %v426_v21 = vadd.f32 1.0, %v1946_v19 }
 0x107   :  { %432 = vrot.lane.b32.xlu0 %v1942_v12, %s2076_s7  ;;  %1947 = vrcp.f32 %v398_v17 }
 0x108   :  { %1949 = vrcp.f32 %v426_v21 }
 0x111   :  { %v1948_v24 = vpop.eup %1947 }
 0x112   :  { %v1950_v33 = vpop.eup %1949  ;;  %v406_v40 = vmul.f32 %v1948_v24, %v404_v39 }
 0x113   :  { %v430_v47 = vmul.f32 %v1950_v33, %v2248_v30 }
 0x175   :  { %v409_v25 = vpop.permute.xlu0 %408 }
 0x176   :  { %v411_v27 = vmul.f32 %v1948_v24, %v409_v25 }
 0x178   :  { %413 = vrot.lane.b32.xlu1 %v411_v27, %s2075_s23 }
 0x179   :  { %v433_v34 = vpop.permute.xlu0 %432 }
 0x17a   :  { %v435_v36 = vmul.f32 %v1950_v33, %v433_v34 }
 0x17c   :  { %437 = vrot.lane.b32.xlu0 %v435_v36, %s2075_s23  ;;  %451 = vperm.xlu1 %1917, %v449_v35  }
 0x180   :  { %462 = vperm.xlu0 %1918, %v460_v38  }
 0x184   :  { %455 = vrot.lane.b32.xlu0 %v2262_v32, %s2077_s1 }
 0x1ea   :  { %v414_v42 = vpop.permute.xlu1 %413 }
 0x1eb   :  { %v416_v44 = vadd.f32 %v414_v42, %v406_v40 }
 0x1ed   :  { %1951 = vtanh.f32 %v416_v44 }
 0x1ee   :  { %v438_v49 = vpop.permute.xlu0 %437 }
 0x1ef   :  { %v440_v51 = vadd.f32 %v438_v49, %v430_v47  ;;  %v612_v49 = vsel %vm610_vm7, 1, %v2074_v1 }
 0x1f1   :  { %1953 = vtanh.f32 %v440_v51 }
 0x1f7   :  { %v1952_v53 = vpop.eup %1951 }
 0x1f8   :  { %419 = vrot.lane.b32.xlu1 %v1952_v53, %s2076_s7 }
 0x1fb   :  { %v1954_v55 = vpop.eup %1953  ;;  %v2339_v56 = vpop.permute.xlu1 %451 }
 0x1fc   :  { %443 = vrot.lane.b32.xlu1 %v1954_v55, %s2076_s7  ;;  %vm453_vm3 = vcmp.eq.s32.totalorder %v2339_v56, 1 }
 0x1fd   :  { %v459_v6 = vsel %vm453_vm3, %v416_v44, %v404_v39 }
 0x1ff   :  { %v2341_v58 = vpop.permute.xlu0 %462 }
 0x200   :  { %465 = vrot.lane.b32.xlu1 %v2262_v32, %s2076_s7  ;;  %vm464_vm4 = vcmp.eq.s32.totalorder %v2341_v58, 1 }
 0x201   :  { %v469_v10 = vsel %vm464_vm4, %v440_v51, %v2248_v30  ;;  %v623_v51 = vsel %vm611_vm8, 1, %v2074_v1 }
 0x203   :  { %v456_v63 = vpop.permute.xlu0 %455 }
 0x26a   :  { %v420_v60 = vpop.permute.xlu1 %419 }
 0x26b   :  { %v422_v0 = vmul.f32 %v1948_v24, %v420_v60 }
 0x26d   :  { %v458_v2 = vsel %vm453_vm3, %v422_v0, %v456_v63 }
 0x26e   :  { %471 = vrot.lane.b32.xlu0 %v458_v2, %s2075_s23  ;;  %v444_v4 = vpop.permute.xlu1 %443 }
 0x26f   :  { %v446_v5 = vmul.f32 %v1950_v33, %v444_v4 }
 0x272   :  { %482 = vrot.lane.b32.xlu0 %v459_v6, %s2077_s1  ;;  %v466_v32 = vpop.permute.xlu1 %465 }
 0x273   :  { %v2353_v7 = vsel %vm464_vm4, %v446_v5, %v466_v32 }
 0x274   :  { %476 = vrot.lane.b32.xlu1 %v2353_v7, %s2076_s7 }
 0x2e0   :  { %v472_v8 = vpop.permute.xlu0 %471 }
 0x2e1   :  { %474 = vst.msk [vmem:[#allocation4] sm:$0xff] %vm44_vm5, %v472_v8 }
 0x2e4   :  { %v483_v9 = vpop.permute.xlu0 %482 }
 0x2e5   :  { %485 = vst.msk [vmem:[#allocation5] sm:$0xff] %vm44_vm5, %v483_v9 }
 0x2e6   :  { %486 = vst.msk [vmem:[#allocation5] sm:$0xff] %vm479_vm6, %v469_v10  ;;  %v477_v11 = vpop.permute.xlu1 %476 }
 0x2e7   :  { %480 = vst.msk [vmem:[#allocation4] sm:$0xff] %vm479_vm6, %v477_v11 }
 0x2ed   :  { %v2382_v27 = vld [vmem:[#allocation5] sm:$0xff] }
 0x2ee   :  { %v2364_v12 = vld [vmem:[#allocation4] sm:$0xff] }
 0x2ef   :  { %v507_v13 = vpack.c.bf16 %v2364_v12, %v2364_v12 }
 0x2f1   :  { %1794 = vmatmul.mubr.msk.bf16.vlgmr.msra.gmra.mrb[8].mxu1 %vm40_vm0, %v507_v13 }
 0x2f2   :  { %834 = vmatpush1.bf16.msra.mxu1 %v2195_v18  ;;  %865 = vmatprep.mubr.bf16.mxu1 %v2074_v1 }
 0x2f3   :  { %835 = vmatprep.subr.bf16.mxu1 %v2201_v20 }
 0x2f6   :  { %836 = vmatpush1.bf16.msra.mxu1 %v2217_v23 }
 0x2f7   :  { %837 = vmatprep.subr.bf16.mxu1 %v2231_v26 }
 0x2fa   :  { %838 = vmatpush1.bf16.msra.mxu1 %v2240_v28 }
 0x2fb   :  { %839 = vmatprep.subr.bf16.mxu1 %v2246_v29 }
 0x2fe   :  { %840 = vmatpush1.bf16.msra.mxu1 %v2259_v31 }
 0x2ff   :  { %1143 = vmatprep.subr.bf16.mxu1 %v2184_v14 }
 0x3c4   :  { %v545_v30 = vpop.f32.mrb[8].mxu1 }
 0x3c5   :  { %v554_v15 = vadd.f32 %v545_v30, %v2297_v45  ;;  %v547_v16 = vpop.f32.mrb[9].mxu1 }
 0x3c6   :  { %v557_v17 = vadd.f32 %v547_v16, %v2311_v59  ;;  %v549_v19 = vpop.f32.mrb[10].mxu1 }
 0x3c7   :  { %1955 = vtanh.f32 %v554_v15  ;;  %v550_v21 = vpop.f32.mrb[11].mxu1  ;;  %v1795_v33 = vmul.f32 -1.442695, %v554_v15 }
 0x3c8   :  { %1957 = vtanh.f32 %v557_v17  ;;  %v1796_v45 = vmul.f32 -1.442695, %v557_v17 }
 0x3c9   :  { %1959 = vpow2.f32 %v1795_v33 }
 0x3ca   :  { %1961 = vpow2.f32 %v1796_v45 }
 0x3d1   :  { %v1956_v24 = vpop.eup %1955 }
 0x3d2   :  { %v1958_v25 = vpop.eup %1957  ;;  %571 = vrot.lane.b32.xlu1 %v1956_v24, %s2076_s7 }
 0x3d3   :  { %595 = vrot.lane.b32.xlu0 %v1958_v25, %s2076_s7  ;;  %v1960_v59 = vpop.eup %1959 }
 0x3d4   :  { %v1962_v34 = vpop.eup %1961  ;;  %v561_v35 = vadd.f32 1.0, %v1960_v59 }
 0x3d5   :  { %v589_v36 = vadd.f32 1.0, %v1962_v34 }
 0x3d6   :  { %566 = vrot.lane.b32.xlu1 %v2382_v27, %s2075_s23  ;;  %1963 = vrcp.f32 %v561_v35 }
 0x3d7   :  { %1965 = vrcp.f32 %v589_v36 }
 0x3e0   :  { %v1964_v38 = vpop.eup %1963 }
 0x3e1   :  { %v1966_v40 = vpop.eup %1965 }
 0x3e2   :  { %v593_v63 = vmul.f32 %v1966_v40, %v2382_v27 }
 0x444   :  { %v572_v39 = vpop.permute.xlu1 %571 }
 0x445   :  { %v574_v42 = vmul.f32 %v1964_v38, %v572_v39  ;;  %v596_v44 = vpop.permute.xlu0 %595 }
 0x446   :  { %v598_v47 = vmul.f32 %v1966_v40, %v596_v44 }
 0x447   :  { %576 = vrot.lane.b32.xlu0 %v574_v42, %s2075_s23 }
 0x448   :  { %600 = vrot.lane.b32.xlu1 %v598_v47, %s2075_s23  ;;  %v567_v53 = vpop.permute.xlu1 %566 }
 0x449   :  { %v569_v55 = vmul.f32 %v1964_v38, %v567_v53 }
 0x44b   :  { %614 = vperm.xlu0 %1918, %v612_v49  }
 0x44c   :  { %625 = vperm.xlu1 %1917, %v623_v51  }
 0x4b9   :  { %v577_v60 = vpop.permute.xlu0 %576 }
 0x4ba   :  { %v579_v0 = vadd.f32 %v577_v60, %v569_v55  ;;  %v601_v2 = vpop.permute.xlu1 %600 }
 0x4bb   :  { %v603_v4 = vadd.f32 %v601_v2, %v593_v63 }
 0x4bc   :  { %1967 = vtanh.f32 %v579_v0 }
 0x4bd   :  { %1969 = vtanh.f32 %v603_v4 }
 0x4c6   :  { %v1968_v5 = vpop.eup %1967 }
 0x4c7   :  { %v1970_v6 = vpop.eup %1969  ;;  %582 = vrot.lane.b32.xlu0 %v1968_v5, %s2076_s7  ;;  %v784_v5 = vsel %vm772_vm12, 1, %v2074_v1 }
 0x4c8   :  { %606 = vrot.lane.b32.xlu1 %v1970_v6, %s2076_s7 }
 0x4ca   :  { %v2399_v32 = vpop.permute.xlu0 %614 }
 0x4cb   :  { %618 = vrot.lane.b32.xlu0 %v2364_v12, %s2077_s1  ;;  %v2401_v8 = vpop.permute.xlu1 %625  ;;  %vm616_vm9 = vcmp.eq.s32.totalorder %v2399_v32, 1 }
 0x4cc   :  { %628 = vrot.lane.b32.xlu1 %v2364_v12, %s2076_s7  ;;  %vm627_vm10 = vcmp.eq.s32.totalorder %v2401_v8, 1  ;;  %v622_v17 = vsel %vm616_vm9, %v579_v0, %v567_v53 }
 0x4cd   :  { %v632_v25 = vsel %vm627_vm10, %v603_v4, %v2382_v27  ;;  %v773_v4 = vsel %vm771_vm11, 1, %v2074_v1 }
 0x539   :  { %v583_v9 = vpop.permute.xlu0 %582 }
 0x53a   :  { %v607_v10 = vpop.permute.xlu1 %606  ;;  %v585_v11 = vmul.f32 %v1964_v38, %v583_v9 }
 0x53b   :  { %v609_v13 = vmul.f32 %v1966_v40, %v607_v10 }
 0x53d   :  { %v619_v30 = vpop.permute.xlu0 %618 }
 0x53e   :  { %v629_v15 = vpop.permute.xlu1 %628  ;;  %v621_v16 = vsel %vm616_vm9, %v585_v11, %v619_v30 }
 0x53f   :  { %634 = vrot.lane.b32.xlu0 %v621_v16, %s2075_s23  ;;  %v2410_v12 = vsel %vm627_vm10, %v609_v13, %v629_v15 }
 0x540   :  { %639 = vrot.lane.b32.xlu1 %v2410_v12, %s2076_s7 }
 0x543   :  { %644 = vrot.lane.b32.xlu0 %v622_v17, %s2077_s1 }
 0x5b1   :  { %v635_v19 = vpop.permute.xlu0 %634 }
 0x5b2   :  { %637 = vst.msk [vmem:[#allocation4] sm:$0xff] %vm44_vm5, %v635_v19  ;;  %v640_v21 = vpop.permute.xlu1 %639 }
 0x5b3   :  { %642 = vst.msk [vmem:[#allocation4] sm:$0xff] %vm479_vm6, %v640_v21 }
 0x5b5   :  { %v645_v24 = vpop.permute.xlu0 %644 }
 0x5b6   :  { %647 = vst.msk [vmem:[#allocation5] sm:$0xff] %vm44_vm5, %v645_v24 }
 0x5b7   :  { %648 = vst.msk [vmem:[#allocation5] sm:$0xff] %vm479_vm6, %v632_v25 }
 0x5ba   :  { %v2424_v33 = vld [vmem:[#allocation4] sm:$0xff] }
 0x5bb   :  { %v668_v45 = vpack.c.bf16 %v2424_v33, %v2424_v33 }
 0x5bd   :  { %1797 = vmatmul.mubr.msk.bf16.vlgmr.msra.gmra.mrb[12].mxu0 %vm40_vm0, %v668_v45 }
 0x5be   :  { %995 = vmatpush1.bf16.msra.mxu0 %v2195_v18  ;;  %1026 = vmatprep.mubr.bf16.mxu0 %v2074_v1  ;;  %v2442_v42 = vld [vmem:[#allocation5] sm:$0xff] }
 0x5bf   :  { %996 = vmatprep.subr.bf16.mxu0 %v2201_v20 }
 0x5c2   :  { %997 = vmatpush1.bf16.msra.mxu0 %v2217_v23 }
 0x5c3   :  { %998 = vmatprep.subr.bf16.mxu0 %v2231_v26 }
 0x5c6   :  { %999 = vmatpush1.bf16.msra.mxu0 %v2240_v28 }
 0x5c7   :  { %1000 = vmatprep.subr.bf16.mxu0 %v2246_v29 }
 0x5ca   :  { %1001 = vmatpush1.bf16.msra.mxu0 %v2259_v31 }
 0x5cb   :  { %1292 = vmatprep.subr.bf16.mxu0 %v2184_v14 }
 0x690   :  { %v706_v27 = vpop.f32.mrb[12].mxu0 }
 0x691   :  { %v715_v59 = vadd.f32 %v706_v27, %v2291_v37  ;;  %v708_v34 = vpop.f32.mrb[13].mxu0 }
 0x692   :  { %v718_v35 = vadd.f32 %v708_v34, %v2317_v3  ;;  %v710_v36 = vpop.f32.mrb[14].mxu0 }
 0x693   :  { %1971 = vtanh.f32 %v715_v59  ;;  %v711_v38 = vpop.f32.mrb[15].mxu0  ;;  %v1798_v44 = vmul.f32 -1.442695, %v715_v59 }
 0x694   :  { %1973 = vtanh.f32 %v718_v35  ;;  %v1799_v37 = vmul.f32 -1.442695, %v718_v35 }
 0x695   :  { %1975 = vpow2.f32 %v1798_v44 }
 0x696   :  { %1977 = vpow2.f32 %v1799_v37 }
 0x69d   :  { %v1972_v39 = vpop.eup %1971 }
 0x69e   :  { %v1974_v40 = vpop.eup %1973  ;;  %732 = vrot.lane.b32.xlu1 %v1972_v39, %s2076_s7 }
 0x69f   :  { %756 = vrot.lane.b32.xlu0 %v1974_v40, %s2076_s7  ;;  %v1976_v3 = vpop.eup %1975 }
 0x6a0   :  { %v1978_v47 = vpop.eup %1977  ;;  %v722_v49 = vadd.f32 1.0, %v1976_v3 }
 0x6a1   :  { %v750_v51 = vadd.f32 1.0, %v1978_v47 }
 0x6a2   :  { %727 = vrot.lane.b32.xlu1 %v2442_v42, %s2075_s23  ;;  %1979 = vrcp.f32 %v722_v49 }
 0x6a3   :  { %1981 = vrcp.f32 %v750_v51 }
 0x6ac   :  { %v1980_v53 = vpop.eup %1979 }
 0x6ad   :  { %v1982_v60 = vpop.eup %1981 }
 0x6ae   :  { %v754_v11 = vmul.f32 %v1982_v60, %v2442_v42 }
 0x710   :  { %v733_v55 = vpop.permute.xlu1 %732 }
 0x711   :  { %v735_v63 = vmul.f32 %v1980_v53, %v733_v55  ;;  %v757_v0 = vpop.permute.xlu0 %756 }
 0x712   :  { %v759_v2 = vmul.f32 %v1982_v60, %v757_v0 }
 0x713   :  { %737 = vrot.lane.b32.xlu0 %v735_v63, %s2075_s23 }
 0x714   :  { %761 = vrot.lane.b32.xlu1 %v759_v2, %s2075_s23  ;;  %v728_v6 = vpop.permute.xlu1 %727 }
 0x715   :  { %v730_v9 = vmul.f32 %v1980_v53, %v728_v6 }
 0x717   :  { %775 = vperm.xlu0 %1918, %v773_v4  }
 0x718   :  { %786 = vperm.xlu1 %1917, %v784_v5  }
 0x785   :  { %v738_v10 = vpop.permute.xlu0 %737 }
 0x786   :  { %v740_v13 = vadd.f32 %v738_v10, %v730_v9  ;;  %v762_v30 = vpop.permute.xlu1 %761 }
 0x787   :  { %v764_v15 = vadd.f32 %v762_v30, %v754_v11 }
 0x788   :  { %1983 = vtanh.f32 %v740_v13 }
 0x789   :  { %1985 = vtanh.f32 %v764_v15 }
 0x792   :  { %v1984_v16 = vpop.eup %1983 }
 0x793   :  { %v1986_v17 = vpop.eup %1985  ;;  %743 = vrot.lane.b32.xlu0 %v1984_v16, %s2076_s7  ;;  %v945_v16 = vsel %vm933_vm1, 1, %v2074_v1 }
 0x794   :  { %767 = vrot.lane.b32.xlu1 %v1986_v17, %s2076_s7 }
 0x796   :  { %v2459_v19 = vpop.permute.xlu0 %775 }
 0x797   :  { %779 = vrot.lane.b32.xlu0 %v2424_v33, %s2077_s1  ;;  %v2461_v21 = vpop.permute.xlu1 %786  ;;  %vm777_vm13 = vcmp.eq.s32.totalorder %v2459_v19, 1 }
 0x798   :  { %789 = vrot.lane.b32.xlu1 %v2424_v33, %s2076_s7  ;;  %vm788_vm14 = vcmp.eq.s32.totalorder %v2461_v21, 1  ;;  %v783_v36 = vsel %vm777_vm13, %v740_v13, %v728_v6 }
 0x799   :  { %v793_v44 = vsel %vm788_vm14, %v764_v15, %v2442_v42  ;;  %v934_v15 = vsel %vm932_vm15, 1, %v2074_v1 }
 0x805   :  { %v744_v24 = vpop.permute.xlu0 %743 }
 0x806   :  { %v768_v25 = vpop.permute.xlu1 %767  ;;  %v746_v45 = vmul.f32 %v1980_v53, %v744_v24 }
 0x807   :  { %v770_v27 = vmul.f32 %v1982_v60, %v768_v25 }
 0x809   :  { %v780_v59 = vpop.permute.xlu0 %779 }
 0x80a   :  { %v790_v34 = vpop.permute.xlu1 %789  ;;  %v782_v35 = vsel %vm777_vm13, %v746_v45, %v780_v59 }
 0x80b   :  { %795 = vrot.lane.b32.xlu0 %v782_v35, %s2075_s23  ;;  %v2470_v33 = vsel %vm788_vm14, %v770_v27, %v790_v34 }
 0x80c   :  { %800 = vrot.lane.b32.xlu1 %v2470_v33, %s2076_s7 }
 0x80f   :  { %805 = vrot.lane.b32.xlu0 %v783_v36, %s2077_s1 }
 0x87d   :  { %v796_v38 = vpop.permute.xlu0 %795 }
 0x87e   :  { %798 = vst.msk [vmem:[#allocation4] sm:$0xff] %vm44_vm5, %v796_v38  ;;  %v801_v39 = vpop.permute.xlu1 %800 }
 0x87f   :  { %803 = vst.msk [vmem:[#allocation4] sm:$0xff] %vm479_vm6, %v801_v39 }
 0x881   :  { %v806_v40 = vpop.permute.xlu0 %805 }
 0x882   :  { %808 = vst.msk [vmem:[#allocation5] sm:$0xff] %vm44_vm5, %v806_v40 }
 0x883   :  { %809 = vst.msk [vmem:[#allocation5] sm:$0xff] %vm479_vm6, %v793_v44 }
 0x886   :  { %v2484_v37 = vld [vmem:[#allocation4] sm:$0xff] }
 0x887   :  { %v829_v3 = vpack.c.bf16 %v2484_v37, %v2484_v37 }
 0x889   :  { %1800 = vmatmul.mubr.msk.bf16.vlgmr.msra.gmra.mrb[12].mxu1 %vm40_vm0, %v829_v3 }
 0x88a   :  { %1144 = vmatpush1.bf16.msra.mxu1 %v2195_v18  ;;  %1175 = vmatprep.mubr.bf16.mxu1 %v2074_v1  ;;  %v2502_v0 = vld [vmem:[#allocation5] sm:$0xff] }
 0x88b   :  { %1145 = vmatprep.subr.bf16.mxu1 %v2201_v20 }
 0x88e   :  { %1146 = vmatpush1.bf16.msra.mxu1 %v2217_v23 }
 0x88f   :  { %1147 = vmatprep.subr.bf16.mxu1 %v2231_v26 }
 0x892   :  { %1148 = vmatpush1.bf16.msra.mxu1 %v2240_v28 }
 0x893   :  { %1149 = vmatprep.subr.bf16.mxu1 %v2246_v29 }
 0x896   :  { %1150 = vmatpush1.bf16.msra.mxu1 %v2259_v31 }
 0x897   :  { %1441 = vmatprep.subr.bf16.mxu1 %v2184_v14 }
 0x95c   :  { %v867_v42 = vpop.f32.mrb[12].mxu1 }
 0x95d   :  { %v876_v47 = vadd.f32 %v867_v42, %v2293_v41  ;;  %v869_v49 = vpop.f32.mrb[13].mxu1 }
 0x95e   :  { %v879_v51 = vadd.f32 %v869_v49, %v2315_v62  ;;  %v871_v53 = vpop.f32.mrb[14].mxu1 }
 0x95f   :  { %1987 = vtanh.f32 %v876_v47  ;;  %v872_v55 = vpop.f32.mrb[15].mxu1  ;;  %v1801_v14 = vmul.f32 -1.442695, %v876_v47 }
 0x960   :  { %1989 = vtanh.f32 %v879_v51  ;;  %v1802_v41 = vmul.f32 -1.442695, %v879_v51 }
 0x961   :  { %1991 = vpow2.f32 %v1801_v14 }
 0x962   :  { %1993 = vpow2.f32 %v1802_v41 }
 0x969   :  { %v1988_v60 = vpop.eup %1987 }
 0x96a   :  { %v1990_v63 = vpop.eup %1989  ;;  %893 = vrot.lane.b32.xlu1 %v1988_v60, %s2076_s7 }
 0x96b   :  { %917 = vrot.lane.b32.xlu0 %v1990_v63, %s2076_s7  ;;  %v1992_v62 = vpop.eup %1991 }
 0x96c   :  { %v1994_v2 = vpop.eup %1993  ;;  %v883_v4 = vadd.f32 1.0, %v1992_v62 }
 0x96d   :  { %v911_v5 = vadd.f32 1.0, %v1994_v2 }
 0x96e   :  { %888 = vrot.lane.b32.xlu1 %v2502_v0, %s2075_s23  ;;  %1995 = vrcp.f32 %v883_v4 }
 0x96f   :  { %1997 = vrcp.f32 %v911_v5 }
 0x978   :  { %v1996_v6 = vpop.eup %1995 }
 0x979   :  { %v1998_v10 = vpop.eup %1997 }
 0x97a   :  { %v915_v45 = vmul.f32 %v1998_v10, %v2502_v0 }
 0x9dc   :  { %v894_v9 = vpop.permute.xlu1 %893 }
 0x9dd   :  { %v896_v11 = vmul.f32 %v1996_v6, %v894_v9  ;;  %v918_v13 = vpop.permute.xlu0 %917 }
 0x9de   :  { %v920_v30 = vmul.f32 %v1998_v10, %v918_v13 }
 0x9df   :  { %898 = vrot.lane.b32.xlu0 %v896_v11, %s2075_s23 }
 0x9e0   :  { %922 = vrot.lane.b32.xlu1 %v920_v30, %s2075_s23  ;;  %v889_v17 = vpop.permute.xlu1 %888 }
 0x9e1   :  { %v891_v24 = vmul.f32 %v1996_v6, %v889_v17 }
 0x9e3   :  { %936 = vperm.xlu0 %1918, %v934_v15  }
 0x9e4   :  { %947 = vperm.xlu1 %1917, %v945_v16  }
 0xa51   :  { %v899_v25 = vpop.permute.xlu0 %898 }
 0xa52   :  { %v901_v27 = vadd.f32 %v899_v25, %v891_v24  ;;  %v923_v59 = vpop.permute.xlu1 %922 }
 0xa53   :  { %v925_v34 = vadd.f32 %v923_v59, %v915_v45 }
 0xa54   :  { %1999 = vtanh.f32 %v901_v27 }
 0xa55   :  { %2001 = vtanh.f32 %v925_v34 }
 0xa5e   :  { %v2000_v35 = vpop.eup %1999 }
 0xa5f   :  { %v2002_v36 = vpop.eup %2001  ;;  %904 = vrot.lane.b32.xlu0 %v2000_v35, %s2076_s7 }
 0xa60   :  { %928 = vrot.lane.b32.xlu1 %v2002_v36, %s2076_s7 }
 0xa62   :  { %v2519_v38 = vpop.permute.xlu0 %936 }
 0xa63   :  { %940 = vrot.lane.b32.xlu0 %v2484_v37, %s2077_s1  ;;  %v2521_v39 = vpop.permute.xlu1 %947  ;;  %vm938_vm2 = vcmp.eq.s32.totalorder %v2519_v38, 1  ;;  %v2072_v38 = vld [vmem:[%s2834_s6 + $0x14] ss:$8 sps:$4 sm:$0xff]  }
 0xa64   :  { %950 = vrot.lane.b32.xlu1 %v2484_v37, %s2076_s7  ;;  %vm949_vm7 = vcmp.eq.s32.totalorder %v2521_v39, 1  ;;  %v944_v53 = vsel %vm938_vm2, %v901_v27, %v889_v17  ;;  %v2071_v39 = vld [vmem:[%s2834_s6] ss:$8 sps:$4 sm:$0xff]  }
 0xa65   :  { %v954_v14 = vsel %vm949_vm7, %v925_v34, %v2502_v0 }
 0xad1   :  { %v905_v40 = vpop.permute.xlu0 %904 }
 0xad2   :  { %v929_v44 = vpop.permute.xlu1 %928  ;;  %v907_v3 = vmul.f32 %v1996_v6, %v905_v40 }
 0xad3   :  { %v931_v42 = vmul.f32 %v1998_v10, %v929_v44 }
 0xad5   :  { %v941_v47 = vpop.permute.xlu0 %940 }
 0xad6   :  { %v951_v49 = vpop.permute.xlu1 %950  ;;  %v943_v51 = vsel %vm938_vm2, %v907_v3, %v941_v47 }
 0xad7   :  { %956 = vrot.lane.b32.xlu0 %v943_v51, %s2075_s23  ;;  %v2530_v37 = vsel %vm949_vm7, %v931_v42, %v951_v49 }
 0xad8   :  { %961 = vrot.lane.b32.xlu1 %v2530_v37, %s2076_s7 }
 0xadb   :  { %966 = vrot.lane.b32.xlu0 %v944_v53, %s2077_s1 }
 0xb49   :  { %v957_v55 = vpop.permute.xlu0 %956 }
 0xb4a   :  { %959 = vst.msk [vmem:[#allocation4] sm:$0xff] %vm44_vm5, %v957_v55  ;;  %v962_v60 = vpop.permute.xlu1 %961 }
 0xb4b   :  { %964 = vst.msk [vmem:[#allocation4] sm:$0xff] %vm479_vm6, %v962_v60 }
 0xb4d   :  { %v967_v63 = vpop.permute.xlu0 %966 }
 0xb4e   :  { %969 = vst.msk [vmem:[#allocation5] sm:$0xff] %vm44_vm5, %v967_v63 }
 0xb4f   :  { %970 = vst.msk [vmem:[#allocation5] sm:$0xff] %vm479_vm6, %v954_v14 }
 0xb52   :  { %v988_v41 = vld [vmem:[#allocation4] sm:$0xff] }
 0xb53   :  { %v990_v62 = vpack.c.bf16 %v988_v41, %v988_v41 }
 0xb55   :  { %1803 = vmatmul.mubr.msk.bf16.vlgmr.msra.gmra.mrb[16].mxu0 %vm40_vm0, %v990_v62 }
 0xb56   :  { %1293 = vmatpush1.bf16.msra.mxu0 %v2195_v18  ;;  %1324 = vmatprep.mubr.bf16.mxu0 %v2074_v1  ;;  %v989_v9 = vld [vmem:[#allocation5] sm:$0xff] }
 0xb57   :  { %1294 = vmatprep.subr.bf16.mxu0 %v2201_v20 }
 0xb5a   :  { %1295 = vmatpush1.bf16.msra.mxu0 %v2217_v23 }
 0xb5b   :  { %1296 = vmatprep.subr.bf16.mxu0 %v2231_v26 }
 0xb5e   :  { %1297 = vmatpush1.bf16.msra.mxu0 %v2240_v28 }
 0xb5f   :  { %1298 = vmatprep.subr.bf16.mxu0 %v2246_v29 }
 0xb62   :  { %1299 = vmatpush1.bf16.msra.mxu0 %v2259_v31 }
 0xc28   :  { %v1028_v0 = vpop.f32.mrb[16].mxu0 }
 0xc29   :  { %v1037_v2 = vadd.f32 %v1028_v0, %v2307_v54  ;;  %v1030_v4 = vpop.f32.mrb[17].mxu0 }
 0xc2a   :  { %v1040_v18 = vadd.f32 %v1030_v4, %v2301_v48  ;;  %v1032_v5 = vpop.f32.mrb[18].mxu0 }
 0xc2b   :  { %2003 = vtanh.f32 %v1037_v2  ;;  %v1033_v6 = vpop.f32.mrb[19].mxu0  ;;  %v1804_v10 = vmul.f32 -1.442695, %v1037_v2 }
 0xc2c   :  { %2005 = vtanh.f32 %v1040_v18  ;;  %v1805_v11 = vmul.f32 -1.442695, %v1040_v18  ;;  %v2073_v6 = vld [vmem:[%s2834_s6 + $0x10] ss:$8 sps:$4 sm:$0xff]  }
 0xc2d   :  { %2007 = vpow2.f32 %v1804_v10 }
 0xc2e   :  { %2009 = vpow2.f32 %v1805_v11 }
 0xc35   :  { %v2004_v20 = vpop.eup %2003 }
 0xc36   :  { %v2006_v23 = vpop.eup %2005  ;;  %1054 = vrot.lane.b32.xlu1 %v2004_v20, %s2076_s7 }
 0xc37   :  { %1078 = vrot.lane.b32.xlu0 %v2006_v23, %s2076_s7  ;;  %v2008_v54 = vpop.eup %2007 }
 0xc38   :  { %v2010_v13 = vpop.eup %2009  ;;  %v1044_v48 = vadd.f32 1.0, %v2008_v54 }
 0xc39   :  { %v1072_v30 = vadd.f32 1.0, %v2010_v13 }
 0xc3a   :  { %1049 = vrot.lane.b32.xlu1 %v989_v9, %s2075_s23  ;;  %2011 = vrcp.f32 %v1044_v48 }
 0xc3b   :  { %2013 = vrcp.f32 %v1072_v30 }
 0xc44   :  { %v2012_v15 = vpop.eup %2011 }
 0xc45   :  { %v2014_v17 = vpop.eup %2013 }
 0xc46   :  { %v1076_v35 = vmul.f32 %v2014_v17, %v989_v9 }
 0xca8   :  { %v1055_v16 = vpop.permute.xlu1 %1054 }
 0xca9   :  { %v1057_v24 = vmul.f32 %v2012_v15, %v1055_v16  ;;  %v1079_v25 = vpop.permute.xlu0 %1078 }
 0xcaa   :  { %v1081_v45 = vmul.f32 %v2014_v17, %v1079_v25 }
 0xcab   :  { %1059 = vrot.lane.b32.xlu0 %v1057_v24, %s2075_s23 }
 0xcac   :  { %1083 = vrot.lane.b32.xlu1 %v1081_v45, %s2075_s23  ;;  %v1050_v27 = vpop.permute.xlu1 %1049 }
 0xcad   :  { %v1052_v59 = vmul.f32 %v2012_v15, %v1050_v27 }
 0xd1d   :  { %v1060_v34 = vpop.permute.xlu0 %1059 }
 0xd1e   :  { %v1062_v36 = vadd.f32 %v1060_v34, %v1052_v59  ;;  %v1084_v40 = vpop.permute.xlu1 %1083 }
 0xd1f   :  { %v1086_v44 = vadd.f32 %v1084_v40, %v1076_v35 }
 0xd20   :  { %2015 = vtanh.f32 %v1062_v36 }
 0xd21   :  { %2017 = vtanh.f32 %v1086_v44  ;;  %v1103_v4 = vsel %vm938_vm2, %v1086_v44, %v989_v9 }
 0xd2a   :  { %v2016_v3 = vpop.eup %2015 }
 0xd2b   :  { %v2018_v42 = vpop.eup %2017  ;;  %1065 = vrot.lane.b32.xlu0 %v2016_v3, %s2076_s7  ;;  %v2078_v3 = vmov 0.0  }
 0xd2c   :  { %1089 = vrot.lane.b32.xlu1 %v2018_v42, %s2076_s7  ;;  %45 = vst.msk [vmem:[#allocation6] sm:$0xff] %vm44_vm5, %v2078_v3 }
 0xd2f   :  { %1094 = vrot.lane.b32.xlu0 %v988_v41, %s2077_s1 }
 0xd30   :  { %1099 = vrot.lane.b32.xlu1 %v988_v41, %s2076_s7  ;;  %v1098_v41 = vsel %vm949_vm7, %v1062_v36, %v1050_v27 }
 0xd9d   :  { %v1066_v47 = vpop.permute.xlu0 %1065 }
 0xd9e   :  { %v1090_v49 = vpop.permute.xlu1 %1089  ;;  %v1068_v51 = vmul.f32 %v2012_v15, %v1066_v47 }
 0xd9f   :  { %v1092_v53 = vmul.f32 %v2014_v17, %v1090_v49 }
 0xda1   :  { %v1095_v55 = vpop.permute.xlu0 %1094 }
 0xda2   :  { %v1100_v60 = vpop.permute.xlu1 %1099  ;;  %v1097_v63 = vsel %vm949_vm7, %v1068_v51, %v1095_v55  ;;  %v2624_v51 = vadd.s32 4294967295, %v2324_v22 }
 0xda3   :  { %1105 = vrot.lane.b32.xlu0 %v1097_v63, %s2075_s23  ;;  %v2569_v14 = vsel %vm938_vm2, %v1092_v53, %v1100_v60 }
 0xda4   :  { %1110 = vrot.lane.b32.xlu1 %v2569_v14, %s2076_s7  ;;  %vm488_vm8 = vcmp.eq.s32.totalorder %v2624_v51, 7  ;;  %vm649_vm11 = vcmp.eq.s32.totalorder %v2624_v51, 6  ;;  %vm810_vm15 = vcmp.eq.s32.totalorder %v2624_v51, 5  ;;  %vm1120_vm7 = vcmp.eq.s32.totalorder %v2624_v51, 3 }
 0xda5   :  { %v490_v22 = vsel %vm488_vm8, 1, %v2074_v1  ;;  %vm1269_vm8 = vcmp.eq.s32.totalorder %v2624_v51, 2 }
 0xda7   :  { %1115 = vrot.lane.b32.xlu0 %v1098_v41, %s2077_s1 }
 0xe15   :  { %v1106_v62 = vpop.permute.xlu0 %1105 }
 0xe16   :  { %1108 = vst.msk [vmem:[#allocation4] sm:$0xff] %vm44_vm5, %v1106_v62  ;;  %v1111_v0 = vpop.permute.xlu1 %1110 }
 0xe17   :  { %1113 = vst.msk [vmem:[#allocation4] sm:$0xff] %vm479_vm6, %v1111_v0 }
 0xe19   :  { %v1116_v2 = vpop.permute.xlu0 %1115 }
 0xe1a   :  { %1118 = vst.msk [vmem:[#allocation5] sm:$0xff] %vm44_vm5, %v1116_v2  ;;  %v489_v2 = vld [vmem:[#allocation6] sm:$0xff] }
 0xe1b   :  { %1119 = vst.msk [vmem:[#allocation5] sm:$0xff] %vm479_vm6, %v1103_v4  ;;  %v651_v4 = vsel %vm649_vm11, 1, %v2074_v1 }
 0xe1e   :  { %v1137_v18 = vld [vmem:[#allocation4] sm:$0xff] }
 0xe1f   :  { %v1139_v5 = vpack.c.bf16 %v1137_v18, %v1137_v18 }
 0xe21   :  { %1806 = vmatmul.mubr.msk.bf16.vlgmr.msra.gmra.mrb[16].mxu1 %vm40_vm0, %v1139_v5 }
 0xe22   :  { %1442 = vmatpush1.bf16.msra.mxu1 %v2071_v39  ;;  %1473 = vmatprep.mubr.bf16.mxu1 %v2074_v1 }
 0xe23   :  { %1443 = vmatprep.subr.bf16.mxu1 %v2072_v38 }
 0xe26   :  { %1444 = vmatpush1.bf16.msra.mxu1 %v2073_v6 }
 0xe27   :  { %1445 = vmatprep.subr.bf16.mxu1 %v2231_v26  ;;  %v2601_v26 = vld [vmem:[#allocation5] sm:$0xff] }
 0xe2a   :  { %1446 = vmatpush1.bf16.msra.mxu1 %v2240_v28 }
 0xe2b   :  { %1447 = vmatprep.subr.bf16.mxu1 %v2246_v29 }
 0xe2e   :  { %1448 = vmatpush1.bf16.msra.mxu1 %v2259_v31 }
 0xef4   :  { %v1177_v20 = vpop.f32.mrb[16].mxu1 }
 0xef5   :  { %v1186_v23 = vadd.f32 %v1177_v20, %v2313_v61  ;;  %v1179_v9 = vpop.f32.mrb[17].mxu1 }
 0xef6   :  { %v1189_v10 = vadd.f32 %v1179_v9, %v2295_v43  ;;  %v1181_v11 = vpop.f32.mrb[18].mxu1 }
 0xef7   :  { %2019 = vtanh.f32 %v1186_v23  ;;  %v1182_v54 = vpop.f32.mrb[19].mxu1  ;;  %v1807_v28 = vmul.f32 -1.442695, %v1186_v23  ;;  %v812_v11 = vsel %vm810_vm15, 1, %v2074_v1  ;;  %vm2080_vm15 = vmmov 0  }
 0xef8   :  { %2021 = vtanh.f32 %v1189_v10  ;;  %v1808_v29 = vmul.f32 -1.442695, %v1189_v10 }
 0xef9   :  { %2023 = vpow2.f32 %v1807_v28 }
 0xefa   :  { %2025 = vpow2.f32 %v1808_v29 }
 0xf01   :  { %v2020_v13 = vpop.eup %2019 }
 0xf02   :  { %v2022_v48 = vpop.eup %2021  ;;  %1203 = vrot.lane.b32.xlu1 %v2020_v13, %s2076_s7 }
 0xf03   :  { %1227 = vrot.lane.b32.xlu0 %v2022_v48, %s2076_s7  ;;  %v2024_v31 = vpop.eup %2023 }
 0xf04   :  { %v2026_v43 = vpop.eup %2025  ;;  %v1193_v61 = vadd.f32 1.0, %v2024_v31 }
 0xf05   :  { %v1221_v30 = vadd.f32 1.0, %v2026_v43 }
 0xf06   :  { %1198 = vrot.lane.b32.xlu1 %v2601_v26, %s2075_s23  ;;  %2027 = vrcp.f32 %v1193_v61 }
 0xf07   :  { %2029 = vrcp.f32 %v1221_v30 }
 0xf10   :  { %v2028_v15 = vpop.eup %2027 }
 0xf11   :  { %v2030_v17 = vpop.eup %2029 }
 0xf12   :  { %v1225_v35 = vmul.f32 %v2030_v17, %v2601_v26 }
 0xf74   :  { %v1204_v16 = vpop.permute.xlu1 %1203 }
 0xf75   :  { %v1206_v24 = vmul.f32 %v2028_v15, %v1204_v16  ;;  %v1228_v25 = vpop.permute.xlu0 %1227 }
 0xf76   :  { %v1230_v45 = vmul.f32 %v2030_v17, %v1228_v25 }
 0xf77   :  { %1208 = vrot.lane.b32.xlu0 %v1206_v24, %s2075_s23 }
 0xf78   :  { %1232 = vrot.lane.b32.xlu1 %v1230_v45, %s2075_s23  ;;  %v2607_v27 = vpop.permute.xlu1 %1198 }
 0xf79   :  { %v1201_v59 = vmul.f32 %v2028_v15, %v2607_v27 }
 0xfe9   :  { %v1209_v34 = vpop.permute.xlu0 %1208 }
 0xfea   :  { %v2611_v36 = vadd.f32 %v1209_v34, %v1201_v59  ;;  %v1233_v40 = vpop.permute.xlu1 %1232 }
 0xfeb   :  { %v2613_v44 = vadd.f32 %v1233_v40, %v1225_v35 }
 0xfec   :  { %2031 = vtanh.f32 %v2611_v36  ;;  %v1247_v30 = vsel %vm788_vm14, %v2611_v36, %v2607_v27 }
 0xfed   :  { %2033 = vtanh.f32 %v2613_v44 }
 0xff6   :  { %v2032_v42 = vpop.eup %2031 }
 0xff7   :  { %v2034_v47 = vpop.eup %2033  ;;  %1214 = vrot.lane.b32.xlu0 %v2032_v42, %s2076_s7 }
 0xff8   :  { %1238 = vrot.lane.b32.xlu1 %v2034_v47, %s2076_s7 }
 0xffb   :  { %1243 = vrot.lane.b32.xlu0 %v1137_v18, %s2077_s1 }
 0xffc   :  { %1248 = vrot.lane.b32.xlu1 %v1137_v18, %s2076_s7 }
0x1069   :  { %v1215_v49 = vpop.permute.xlu0 %1214 }
0x106a   :  { %v1239_v53 = vpop.permute.xlu1 %1238  ;;  %v1217_v55 = vmul.f32 %v2028_v15, %v1215_v49 }
0x106b   :  { %v1241_v60 = vmul.f32 %v2030_v17, %v1239_v53 }
0x106d   :  { %v1244_v63 = vpop.permute.xlu0 %1243 }
0x106e   :  { %v1249_v41 = vpop.permute.xlu1 %1248  ;;  %v1246_v62 = vsel %vm788_vm14, %v1217_v55, %v1244_v63  ;;  %vm971_vm14 = vcmp.eq.s32.totalorder %v2624_v51, 4 }
0x106f   :  { %1254 = vrot.lane.b32.xlu0 %v1246_v62, %s2075_s23  ;;  %v2632_v0 = vsel %vm777_vm13, %v1241_v60, %v1249_v41  ;;  %v973_v53 = vsel %vm971_vm14, 1, %v2074_v1 }
0x1070   :  { %1259 = vrot.lane.b32.xlu1 %v2632_v0, %s2076_s7 }
0x1073   :  { %492 = vperm.xlu0 %1918, %v490_v22  }
0x1074   :  { %496 = vrot.lane.b32.xlu1 %v489_v2, %s2077_s1 }
0x1078   :  { %653 = vperm.xlu1 %1917, %v651_v4  }
0x10e1   :  { %v1255_v18 = vpop.permute.xlu0 %1254 }
0x10e2   :  { %1257 = vst.msk [vmem:[#allocation4] sm:$0xff] %vm44_vm5, %v1255_v18  ;;  %v1260_v5 = vpop.permute.xlu1 %1259 }
0x10e3   :  { %1262 = vst.msk [vmem:[#allocation4] sm:$0xff] %vm479_vm6, %v1260_v5 }
0x10e6   :  { %v497_v6 = vpop.permute.xlu1 %496 }
0x10ea   :  { %v2642_v39 = vld [vmem:[#allocation4] sm:$0xff] }
0x10eb   :  { %v1288_v38 = vpack.c.bf16 %v2642_v39, %v2642_v39 }
0x10ed   :  { %1809 = vmatmul.mubr.msk.bf16.vlgmr.msra.gmra.mrb[20].mxu0 %vm40_vm0, %v1288_v38 }
0x10ee   :  { %1884 = vmatprep.mubr.msk.f32.mxu0 %vm2080_vm15, %v2078_v3 }
0x10f2   :  { %v493_v20 = vpop.permute.xlu0 %492 }
0x10f3   :  { %vm494_vm12 = vcmp.eq.s32.totalorder %v493_v20, 1 }
0x10f4   :  { %v499_v23 = vsel %vm494_vm12, %v2353_v7, %v497_v6 }
0x10f5   :  { %501 = vrot.lane.b32.xlu0 %v499_v23, %s2075_s23 }
0x10f7   :  { %v654_v31 = vpop.permute.xlu1 %653 }
0x10f8   :  { %vm655_vm1 = vcmp.eq.s32.totalorder %v654_v31, 1 }
0x1167   :  { %v502_v9 = vpop.permute.xlu0 %501 }
0x1168   :  { %504 = vst.msk [vmem:[#allocation6] sm:$0xff] %vm44_vm5, %v502_v9 }
0x116f   :  { %v650_v10 = vld [vmem:[#allocation6] sm:$0xff] }
0x1170   :  { %657 = vrot.lane.b32.xlu0 %v650_v10, %s2077_s1 }
0x1174   :  { %814 = vperm.xlu0 %1918, %v812_v11  }
0x11c0   :  { %v1326_v54 = vpop.f32.mrb[20].mxu0 }
0x11c1   :  { %v1335_v13 = vadd.f32 %v1326_v54, %v2305_v52  ;;  %v1328_v48 = vpop.f32.mrb[21].mxu0 }
0x11c2   :  { %v1338_v28 = vadd.f32 %v1328_v48, %v2303_v50  ;;  %v1330_v7 = vpop.f32.mrb[22].mxu0 }
0x11c3   :  { %v1331_v29 = vpop.f32.mrb[23].mxu0  ;;  %2035 = vtanh.f32 %v1335_v13  ;;  %v1810_v24 = vmul.f32 -1.442695, %v1335_v13 }
0x11c4   :  { %2037 = vtanh.f32 %v1338_v28  ;;  %v1811_v25 = vmul.f32 -1.442695, %v1338_v28  ;;  %v1271_v29 = vsel %vm1269_vm8, 1, %v2074_v1 }
0x11c5   :  { %2039 = vpow2.f32 %v1810_v24 }
0x11c6   :  { %2041 = vpow2.f32 %v1811_v25 }
0x11cd   :  { %v2036_v52 = vpop.eup %2035 }
0x11ce   :  { %v2038_v16 = vpop.eup %2037 }
0x11cf   :  { %v2040_v19 = vpop.eup %2039 }
0x11d0   :  { %v1342_v45 = vadd.f32 1.0, %v2040_v19 }
0x11d2   :  { %2043 = vrcp.f32 %v1342_v45 }
0x11e2   :  { %v658_v43 = vpop.permute.xlu0 %657 }
0x11e3   :  { %v660_v61 = vsel %vm655_vm1, %v2410_v12, %v658_v43  ;;  %v1252_v12 = vsel %vm777_vm13, %v2613_v44, %v2601_v26  ;;  %v2042_v26 = vpop.eup %2041 }
0x11e4   :  { %662 = vrot.lane.b32.xlu1 %v660_v61, %s2075_s23  ;;  %v1370_v27 = vadd.f32 1.0, %v2042_v26  ;;  %v2044_v40 = vpop.eup %2043 }
0x11e6   :  { %2045 = vrcp.f32 %v1370_v27 }
0x11e8   :  { %1264 = vrot.lane.b32.xlu1 %v1247_v30, %s2077_s1 }
0x11ec   :  { %1352 = vrot.lane.b32.xlu1 %v2036_v52, %s2076_s7 }
0x11f0   :  { %v2046_v44 = vpop.eup %2045 }
0x11f3   :  { %v815_v59 = vpop.permute.xlu0 %814 }
0x11f4   :  { %vm816_vm13 = vcmp.eq.s32.totalorder %v815_v59, 1 }
0x1256   :  { %v663_v50 = vpop.permute.xlu1 %662 }
0x1257   :  { %665 = vst.msk [vmem:[#allocation6] sm:$0xff] %vm44_vm5, %v663_v50 }
0x125a   :  { %v1265_v15 = vpop.permute.xlu1 %1264 }
0x125b   :  { %1267 = vst.msk [vmem:[#allocation5] sm:$0xff] %vm44_vm5, %v1265_v15 }
0x125c   :  { %1268 = vst.msk [vmem:[#allocation5] sm:$0xff] %vm479_vm6, %v1252_v12 }
0x125e   :  { %v811_v21 = vld [vmem:[#allocation6] sm:$0xff]  ;;  %v1353_v35 = vpop.permute.xlu1 %1352 }
0x125f   :  { %818 = vrot.lane.b32.xlu0 %v811_v21, %s2077_s1  ;;  %v1355_v42 = vmul.f32 %v2044_v40, %v1353_v35 }
0x1263   :  { %1376 = vrot.lane.b32.xlu0 %v2038_v16, %s2076_s7  ;;  %v2672_v17 = vld [vmem:[#allocation5] sm:$0xff] }
0x1264   :  { %v1374_v41 = vmul.f32 %v2046_v44, %v2672_v17 }
0x1267   :  { %1347 = vrot.lane.b32.xlu0 %v2672_v17, %s2075_s23 }
0x12d1   :  { %v819_v34 = vpop.permute.xlu0 %818 }
0x12d2   :  { %v821_v36 = vsel %vm816_vm13, %v2470_v33, %v819_v34  ;;  %vm1747_vm13 = vcmask 31744  }
0x12d3   :  { %823 = vrot.lane.b32.xlu1 %v821_v36, %s2075_s23 }
0x12d5   :  { %v1377_v47 = vpop.permute.xlu0 %1376 }
0x12d6   :  { %v1379_v49 = vmul.f32 %v2046_v44, %v1377_v47 }
0x12d7   :  { %1357 = vrot.lane.b32.xlu1 %v1355_v42, %s2075_s23 }
0x12d8   :  { %1381 = vrot.lane.b32.xlu0 %v1379_v49, %s2075_s23 }
0x12d9   :  { %v2682_v55 = vpop.permute.xlu0 %1347 }
0x12da   :  { %v1350_v33 = vmul.f32 %v2044_v40, %v2682_v55 }
0x12db   :  { %975 = vperm.xlu1 %1917, %v973_v53  }
0x1345   :  { %v824_v60 = vpop.permute.xlu1 %823 }
0x1346   :  { %826 = vst.msk [vmem:[#allocation6] sm:$0xff] %vm44_vm5, %v824_v60 }
0x1349   :  { %v1358_v63 = vpop.permute.xlu1 %1357 }
0x134a   :  { %v1360_v62 = vadd.f32 %v1358_v63, %v1350_v33  ;;  %v1382_v22 = vpop.permute.xlu0 %1381 }
0x134b   :  { %v2687_v2 = vadd.f32 %v1382_v22, %v1374_v41 }
0x134c   :  { %2047 = vtanh.f32 %v1360_v62 }
0x134d   :  { %2049 = vtanh.f32 %v2687_v2  ;;  %v972_v4 = vld [vmem:[#allocation6] sm:$0xff] }
0x134e   :  { %979 = vrot.lane.b32.xlu0 %v972_v4, %s2077_s1 }
0x1356   :  { %v2048_v18 = vpop.eup %2047 }
0x1357   :  { %v2050_v5 = vpop.eup %2049  ;;  %1363 = vrot.lane.b32.xlu1 %v2048_v18, %s2076_s7 }
0x1358   :  { %1387 = vrot.lane.b32.xlu0 %v2050_v5, %s2076_s7 }
0x135a   :  { %v976_v38 = vpop.permute.xlu1 %975 }
0x135b   :  { %1392 = vrot.lane.b32.xlu1 %v2642_v39, %s2077_s1  ;;  %vm977_vm2 = vcmp.eq.s32.totalorder %v976_v38, 1 }
0x135c   :  { %1397 = vrot.lane.b32.xlu0 %v2642_v39, %s2076_s7 }
0x13c0   :  { %v980_v6 = vpop.permute.xlu0 %979 }
0x13c1   :  { %v982_v20 = vsel %vm977_vm2, %v2530_v37, %v980_v6  ;;  %v1122_v37 = vsel %vm1120_vm7, 1, %v2074_v1 }
0x13c2   :  { %984 = vrot.lane.b32.xlu1 %v982_v20, %s2075_s23 }
0x13c9   :  { %v1364_v23 = vpop.permute.xlu1 %1363 }
0x13ca   :  { %v1388_v9 = vpop.permute.xlu0 %1387  ;;  %v1366_v10 = vmul.f32 %v2044_v40, %v1364_v23 }
0x13cb   :  { %v1390_v11 = vmul.f32 %v2046_v44, %v1388_v9  ;;  %v1401_v44 = vsel %vm616_vm9, %v2687_v2, %v2672_v17 }
0x13cd   :  { %v1393_v54 = vpop.permute.xlu1 %1392 }
0x13ce   :  { %v1395_v13 = vsel %vm627_vm10, %v1366_v10, %v1393_v54  ;;  %v1398_v48 = vpop.permute.xlu0 %1397 }
0x13cf   :  { %v2704_v39 = vsel %vm616_vm9, %v1390_v11, %v1398_v48  ;;  %1403 = vrot.lane.b32.xlu0 %v1395_v13, %s2075_s23  ;;  %vm1566_vm9 = vcmp.eq.s32.totalorder %v2624_v51, 0  ;;  %v1584_v48 = vld [vmem:[%s2840_s9] sm:$0xff] }
0x13d0   :  { %1408 = vrot.lane.b32.xlu1 %v2704_v39, %s2076_s7  ;;  %v1568_v32 = vsel %vm1566_vm9, 1, %v2074_v1 }
0x13d3   :  { %1124 = vperm.xlu0 %1918, %v1122_v37  }
0x1434   :  { %v985_v28 = vpop.permute.xlu1 %984 }
0x1435   :  { %987 = vst.msk [vmem:[#allocation6] sm:$0xff] %vm44_vm5, %v985_v28 }
0x143c   :  { %v1121_v7 = vld [vmem:[#allocation6] sm:$0xff] }
0x143d   :  { %1128 = vrot.lane.b32.xlu1 %v1121_v7, %s2077_s1  ;;  %v2079_v7 = vmov 0.0|0.0  }
0x143e   :  { %1904 = vmatprep.subr.bf16.mxu1 %v2079_v7  ;;  %1898 = vmatprep.subr.bf16.mxu0 %v2079_v7 }
0x1441   :  { %v1404_v31 = vpop.permute.xlu0 %1403  ;;  %1273 = vperm.xlu1 %1917, %v1271_v29   ;;  %v1586_v29 = vld [vmem:[%s2840_s9 + $0x10] sm:$0xff] }
0x1442   :  { %1406 = vst.msk [vmem:[#allocation4] sm:$0xff] %vm44_vm5, %v1404_v31  ;;  %v1409_v43 = vpop.permute.xlu1 %1408  ;;  %v1587_v31 = vld [vmem:[%s2840_s9 + $0x18] sm:$0xff] }
0x1443   :  { %1411 = vst.msk [vmem:[#allocation4] sm:$0xff] %vm479_vm6, %v1409_v43 }
0x144a   :  { %v2716_v61 = vld [vmem:[#allocation4] sm:$0xff] }
0x144b   :  { %v1437_v30 = vpack.c.bf16 %v2716_v61, %v2716_v61 }
0x144d   :  { %1812 = vmatmul.mubr.msk.bf16.vlgmr.msra.gmra.mrb[20].mxu1 %vm40_vm0, %v1437_v30 }
0x144e   :  { %1895 = vmatprep.mubr.msk.f32.mxu1 %vm2080_vm15, %v2078_v3  ;;  %v1589_v3 = vld [vmem:[%s2840_s9 + $0x28] sm:$0xff] }
0x1452   :  { %v1125_v52 = vpop.permute.xlu0 %1124 }
0x1453   :  { %vm1126_vm11 = vcmp.eq.s32.totalorder %v1125_v52, 1 }
0x14af   :  { %v1129_v50 = vpop.permute.xlu1 %1128 }
0x14b0   :  { %v1131_v15 = vsel %vm1126_vm11, %v2569_v14, %v1129_v50  ;;  %v1396_v14 = vsel %vm627_vm10, %v1360_v62, %v2682_v55  ;;  %vm1418_vm10 = vcmp.eq.s32.totalorder %v2624_v51, 1 }
0x14b1   :  { %1133 = vrot.lane.b32.xlu0 %v1131_v15, %s2075_s23 }
0x1520   :  { %v1475_v12 = vpop.f32.mrb[20].mxu1 }
0x1521   :  { %v1484_v21 = vadd.f32 %v1475_v12, %v2309_v57  ;;  %v1477_v16 = vpop.f32.mrb[21].mxu1 }
0x1522   :  { %v1486_v24 = vadd.f32 %v1477_v16, %v2299_v46  ;;  %v1479_v25 = vpop.f32.mrb[22].mxu1  ;;  %v1274_v46 = vpop.permute.xlu1 %1273  ;;  %v1588_v16 = vld [vmem:[%s2840_s9 + $0x20] sm:$0xff] }
0x1523   :  { %v1134_v19 = vpop.permute.xlu0 %1133  ;;  %v1480_v26 = vpop.f32.mrb[23].mxu1  ;;  %vm1275_vm0 = vcmp.eq.s32.totalorder %v1274_v46, 1  ;;  %v1813_v17 = vmul.f32 -1.442695, %v1484_v21  ;;  %v1590_v25 = vld [vmem:[%s2840_s9 + $0x30] sm:$0xff] }
0x1524   :  { %1136 = vst.msk [vmem:[#allocation6] sm:$0xff] %vm44_vm5, %v1134_v19  ;;  %2051 = vtanh.f32 %v1486_v24  ;;  %v1814_v57 = vmul.f32 -1.442695, %v1486_v24  ;;  %v1899_v24 = vpack.c.bf16 %v1589_v3, %v1588_v16  ;;  %v1591_v19 = vld [vmem:[%s2840_s9 + $0x38] sm:$0xff] }
0x1525   :  { %v1902_v26 = vpack.c.bf16 %v1591_v19, %v1590_v25 }
0x1526   :  { %2053 = vpow2.f32 %v1814_v57  ;;  %1900 = vmatpush3.bf16.msra.mxu0 %v1899_v24 }
0x1527   :  { %2055 = vtanh.f32 %v1484_v21  ;;  %1901 = vmatprep.subr.bf16.mxu0 %v2079_v7 }
0x152a   :  { %1903 = vmatpush3.bf16.msra.mxu0 %v1902_v26 }
0x152b   :  { %v1270_v45 = vld [vmem:[#allocation6] sm:$0xff] }
0x152c   :  { %1277 = vrot.lane.b32.xlu0 %v1270_v45, %s2077_s1 }
0x152e   :  { %v2052_v27 = vpop.eup %2051 }
0x1530   :  { %1413 = vrot.lane.b32.xlu0 %v1396_v14, %s2077_s1  ;;  %v2054_v59 = vpop.eup %2053 }
0x1531   :  { %v1518_v35 = vadd.f32 1.0, %v2054_v59  ;;  %v2056_v8 = vpop.eup %2055 }
0x1533   :  { %2057 = vrcp.f32 %v1518_v35 }
0x1534   :  { %1524 = vrot.lane.b32.xlu0 %v2052_v27, %s2076_s7  ;;  %2059 = vpow2.f32 %v1813_v17 }
0x153d   :  { %v2058_v49 = vpop.eup %2057 }
0x153e   :  { %v2060_v55 = vpop.eup %2059 }
0x153f   :  { %v1490_v60 = vadd.f32 1.0, %v2060_v55 }
0x1541   :  { %2061 = vrcp.f32 %v1490_v60 }
0x154b   :  { %v2062_v62 = vpop.eup %2061 }
0x159e   :  { %v1278_v34 = vpop.permute.xlu0 %1277 }
0x159f   :  { %v1280_v36 = vsel %vm1275_vm0, %v2632_v0, %v1278_v34  ;;  %v1420_v0 = vsel %vm1418_vm10, 1, %v2074_v1 }
0x15a0   :  { %1282 = vrot.lane.b32.xlu1 %v1280_v36, %s2075_s23 }
0x15a2   :  { %v1414_v40 = vpop.permute.xlu0 %1413 }
0x15a3   :  { %1416 = vst.msk [vmem:[#allocation5] sm:$0xff] %vm44_vm5, %v1414_v40 }
0x15a4   :  { %1417 = vst.msk [vmem:[#allocation5] sm:$0xff] %vm479_vm6, %v1401_v44  ;;  %1500 = vrot.lane.b32.xlu1 %v2056_v8, %s2076_s7  ;;  %v1817_v8 = vld [vmem:[%s2841_s10] ss:$0 sm:$0xff] }
0x15a6   :  { %v1525_v42 = vpop.permute.xlu0 %1524 }
0x15a7   :  { %v1527_v53 = vmul.f32 %v2058_v49, %v1525_v42 }
0x15a8   :  { %1422 = vperm.xlu1 %1917, %v1420_v0  }
0x15ab   :  { %v2743_v47 = vld [vmem:[#allocation5] sm:$0xff] }
0x15ac   :  { %1495 = vrot.lane.b32.xlu1 %v2743_v47, %s2075_s23  ;;  %v1522_v1 = vmul.f32 %v2058_v49, %v2743_v47 }
0x15b0   :  { %1529 = vrot.lane.b32.xlu1 %v1527_v53, %s2075_s23 }
0x15b4   :  { %1570 = vperm.xlu1 %1917, %v1568_v32  }
0x1612   :  { %v1283_v33 = vpop.permute.xlu1 %1282 }
0x1613   :  { %1285 = vst.msk [vmem:[#allocation6] sm:$0xff] %vm44_vm5, %v1283_v33 }
0x1616   :  { %v1501_v63 = vpop.permute.xlu1 %1500 }
0x1617   :  { %v1503_v22 = vmul.f32 %v2062_v62, %v1501_v63 }
0x161a   :  { %v1419_v41 = vld [vmem:[#allocation6] sm:$0xff] }
0x161b   :  { %1426 = vrot.lane.b32.xlu0 %v1419_v41, %s2077_s1 }
0x161f   :  { %1505 = vrot.lane.b32.xlu0 %v1503_v22, %s2075_s23 }
0x1627   :  { %v1423_v51 = vpop.permute.xlu1 %1422 }
0x1628   :  { %vm1424_vm12 = vcmp.eq.s32.totalorder %v1423_v51, 1 }
0x162b   :  { %v2753_v2 = vpop.permute.xlu1 %1495 }
0x162c   :  { %v1498_v20 = vmul.f32 %v2062_v62, %v2753_v2 }
0x162f   :  { %v1530_v4 = vpop.permute.xlu1 %1529 }
0x1630   :  { %v2756_v18 = vadd.f32 %v1530_v4, %v1522_v1 }
0x1632   :  { %2063 = vtanh.f32 %v2756_v18  ;;  %v1549_v33 = vsel %vm453_vm3, %v2756_v18, %v2743_v47 }
0x1633   :  { %v1571_v11 = vpop.permute.xlu1 %1570 }
0x1634   :  { %vm1572_vm1 = vcmp.eq.s32.totalorder %v1571_v11, 1 }
0x163c   :  { %v2064_v5 = vpop.eup %2063 }
0x163d   :  { %1535 = vrot.lane.b32.xlu1 %v2064_v5, %s2076_s7 }
0x1641   :  { %1545 = vrot.lane.b32.xlu1 %v2716_v61, %s2076_s7 }
0x168d   :  { %v1427_v38 = vpop.permute.xlu0 %1426 }
0x168e   :  { %v1429_v6 = vsel %vm1424_vm12, %v2704_v39, %v1427_v38  ;;  %v1585_v39 = vld [vmem:[%s2840_s9 + $0x8] sm:$0xff] }
0x168f   :  { %1431 = vrot.lane.b32.xlu0 %v1429_v6, %s2075_s23  ;;  %v1905_v37 = vpack.c.bf16 %v1585_v39, %v1584_v48 }
0x1691   :  { %v1506_v23 = vpop.permute.xlu0 %1505  ;;  %1906 = vmatpush3.bf16.msra.mxu1 %v1905_v37 }
0x1692   :  { %v2765_v9 = vadd.f32 %v1506_v23, %v1498_v20  ;;  %1907 = vmatprep.subr.bf16.mxu1 %v2079_v7 }
0x1693   :  { %1540 = vrot.lane.b32.xlu0 %v2716_v61, %s2077_s1  ;;  %v1908_v61 = vpack.c.bf16 %v1587_v31, %v1586_v29 }
0x1694   :  { %2065 = vtanh.f32 %v2765_v9  ;;  %v1544_v53 = vsel %vm464_vm4, %v2765_v9, %v2753_v2 }
0x1695   :  { %1909 = vmatpush3.bf16.msra.mxu1 %v1908_v61 }
0x169e   :  { %v2066_v10 = vpop.eup %2065 }
0x169f   :  { %1511 = vrot.lane.b32.xlu0 %v2066_v10, %s2076_s7 }
0x16af   :  { %v1536_v13 = vpop.permute.xlu1 %1535 }
0x16b0   :  { %v1538_v30 = vmul.f32 %v2058_v49, %v1536_v13 }
0x16b3   :  { %v1546_v43 = vpop.permute.xlu1 %1545 }
0x16b4   :  { %v1548_v52 = vsel %vm453_vm3, %v1538_v30, %v1546_v43 }
0x1701   :  { %v1432_v54 = vpop.permute.xlu0 %1431 }
0x1702   :  { %1434 = vst.msk [vmem:[#allocation6] sm:$0xff] %vm44_vm5, %v1432_v54 }
0x1705   :  { %v1541_v50 = vpop.permute.xlu0 %1540 }
0x1709   :  { %v1567_v28 = vld [vmem:[#allocation6] sm:$0xff] }
0x170a   :  { %1574 = vrot.lane.b32.xlu0 %v1567_v28, %s2077_s1 }
0x170e   :  { %1556 = vrot.lane.b32.xlu0 %v1548_v52, %s2076_s7 }
0x1711   :  { %v1512_v15 = vpop.permute.xlu0 %1511 }
0x1712   :  { %v1514_v12 = vmul.f32 %v2062_v62, %v1512_v15 }
0x1714   :  { %v1543_v21 = vsel %vm464_vm4, %v1514_v12, %v1541_v50 }
0x1715   :  { %1551 = vrot.lane.b32.xlu1 %v1543_v21, %s2075_s23 }
0x177c   :  { %v1575_v45 = vpop.permute.xlu0 %1574 }
0x177d   :  { %v1577_v14 = vsel %vm1572_vm1, %v1548_v52, %v1575_v45 }
0x177e   :  { %1579 = vrot.lane.b32.xlu1 %v1577_v14, %s2075_s23 }
0x1780   :  { %v1557_v57 = vpop.permute.xlu0 %1556 }
0x1787   :  { %v1552_v27 = vpop.permute.xlu1 %1551 }
0x1788   :  { %1554 = vst.msk [vmem:[#allocation4] sm:$0xff] %vm44_vm5, %v1552_v27 }
0x1789   :  { %1559 = vst.msk [vmem:[#allocation4] sm:$0xff] %vm479_vm6, %v1557_v57 }
0x1790   :  { %v1583_v46 = vld [vmem:[#allocation4] sm:$0xff] }
0x1791   :  { %1896 = vmatmul.mubr.msk.f32.vlgmr.msra.gmra.mrb[24].mxu1 %vm44_vm5, %v1583_v46 }
0x17f0   :  { %v1580_v59 = vpop.permute.xlu1 %1579 }
0x17f1   :  { %1582 = vst.msk [vmem:[#allocation6] sm:$0xff] %vm44_vm5, %v1580_v59 }
0x17f8   :  { %v1592_v34 = vld [vmem:[#allocation6] sm:$0xff] }
0x17f9   :  { %1885 = vmatmul.mubr.msk.f32.vlgmr.msra.gmra.mrb[24].mxu0 %vm44_vm5, %v1592_v34 }
0x1864   :  { %v1735_v35 = vpop.f32.mrb[24].mxu1 }
0x1865   :  { %v1897_v36 = vpop.f32.mrb[25].mxu1 }
0x18cc   :  { %v1662_v40 = vpop.f32.mrb[24].mxu0 }
0x18cd   :  { %v1736_v44 = vadd.f32 %v1735_v35, %v1662_v40  ;;  %v1886_v0 = vpop.f32.mrb[25].mxu0 }
0x18cf   :  { %v1746_v42 = vadd.f32 %v1817_v8, %v1736_v44 }
0x18d1   :  { %v1748_v49 = vsel %vm1747_vm13, %v1746_v42, -inf }
0x18d2   :  { %1749 = vmax.xlane.f32.xlu0 %v1748_v49 }
0x18e8   :  { %1561 = vrot.lane.b32.xlu0 %v1544_v53, %s2077_s1 }
0x195f   :  { %v1750_v32 = vpop.xlane.xlu0 %1749 }
0x1960   :  { %v1751_v17 = vsub.f32 %v1746_v42, %v1750_v32 }
0x1962   :  { %v1752_v55 = vmul.f32 1.442695, %v1751_v17 }
0x1963   :  { %v1562_v60 = vpop.permute.xlu0 %1561 }
0x1964   :  { %2067 = vpow2.f32 %v1752_v55  ;;  %1564 = vst.msk [vmem:[#allocation5] sm:$0xff] %vm44_vm5, %v1562_v60 }
0x1965   :  { %1565 = vst.msk [vmem:[#allocation5] sm:$0xff] %vm479_vm6, %v1549_v33 }
0x196e   :  { %v2068_v63 = vpop.eup %2067 }
0x196f   :  { %v1754_v58 = vsel %vm1747_vm13, %v2068_v63, 0.0 }
0x1970   :  { %1755 = vadd.xlane.f32.xlu1 %v1754_v58 }
0x19fd   :  { %v1756_v41 = vpop.xlane.xlu1 %1755 }
0x19fe   :  { %2069 = vrcp.f32 %v1756_v41 }
0x1a08   :  { %v2070_v62 = vpop.eup %2069 }
0x1a09   :  { %v1758_v22 = vmul.f32 %v2070_v62, %v2068_v63 }
0x1a0b   :  { %1759 = vst.msk [vmem:[%s2842_s11] sm:$0xff] %vm1747_vm13, %v1758_v22 }

</bundles_post_ra>
